<compile_context>
chip_gen: v6e
topology: v6e:2x2x1
jax: 0.10.0
libtpu: 0.0.40
codegen_flags: <defaults>
</compile_context>

<pallas_src>
import functools

import jax
import jax.numpy as jnp
from jax.experimental import pallas as pl
from jax.experimental.pallas import tpu as pltpu

LATENT_DIM = 4  # module-level `latent_dim` in the reference script


# ----------------------------------------------------------------------------
# Small helpers
# ----------------------------------------------------------------------------
def _round_up(x, m):
    return (x + m - 1) // m * m


def _pick_tm(m, tm_max=256):
    """Pick a row tile TM (multiple of 8, <= tm_max) and padded row count Mp."""
    mp8 = _round_up(max(m, 1), 8)
    if mp8 <= tm_max:
        return mp8, mp8
    for d in range(tm_max, 63, -8):  # prefer an exact divisor -> no ragged tail
        if mp8 % d == 0:
            return d, mp8
    return tm_max, _round_up(mp8, tm_max)


# ----------------------------------------------------------------------------
# Pallas kernels
# ----------------------------------------------------------------------------
def _mm_bias_act_kernel(x_ref, w_ref, b_ref, o_ref, *, act):
    """out = act(x @ w + b) for one (TM, K) x (K, N) tile. f32 accum/epilogue."""
    acc = jnp.dot(x_ref[...], w_ref[...], preferred_element_type=jnp.float32)
    acc = acc + b_ref[...]
    if act == "relu":
        acc = jnp.maximum(acc, 0.0)
    elif act == "sigmoid":
        acc = jax.nn.sigmoid(acc)
    o_ref[...] = acc.astype(o_ref.dtype)


def _bottleneck_kernel(h_ref, we_ref, be_ref, wd_ref, bd_ref, o_ref):
    """Fused latent bottleneck: relu(sigmoid(h@We+be) @ Wd + bd)."""
    z = jnp.dot(h_ref[...], we_ref[...], preferred_element_type=jnp.float32)
    z = jax.nn.sigmoid(z + be_ref[...])
    d = jnp.dot(z.astype(wd_ref.dtype), wd_ref[...],
                preferred_element_type=jnp.float32)
    d = jnp.maximum(d + bd_ref[...], 0.0)
    o_ref[...] = d.astype(o_ref.dtype)


# ----------------------------------------------------------------------------
# Kernel wrappers (M-tiled, parallel grid)
# ----------------------------------------------------------------------------
def matmul_bias_act(x, w, b, act, out_dtype=jnp.bfloat16):
    """x: (M, K), w: (K, N) bf16, b: (1, N) f32 -> act(x @ w + b)."""
    m, k = x.shape
    n = w.shape[1]
    tm, mp = _pick_tm(m)
    x = x.astype(jnp.bfloat16)
    if mp != m:
        x = jnp.pad(x, ((0, mp - m), (0, 0)))
    out = pl.pallas_call(
        functools.partial(_mm_bias_act_kernel, act=act),
        out_shape=jax.ShapeDtypeStruct((mp, n), out_dtype),
        grid=(mp // tm,),
        in_specs=[
            pl.BlockSpec((tm, k), lambda i: (i, 0)),   # activation rows (tiled)
            pl.BlockSpec((k, n), lambda i: (0, 0)),    # weight (full block)
            pl.BlockSpec((1, n), lambda i: (0, 0)),    # bias   (full block)
        ],
        out_specs=pl.BlockSpec((tm, n), lambda i: (i, 0)),
        compiler_params=pltpu.CompilerParams(dimension_semantics=("parallel",)),
    )(x, w, b)
    return out if mp == m else out[:m]


def bottleneck(h, we, be, wd, bd):
    """h: (N, 2048) -> relu(sigmoid(h@We+be) @ Wd + bd), one fused kernel."""
    m, kin = h.shape
    latent = we.shape[1]
    n = wd.shape[1]
    tm, mp = _pick_tm(m)
    h = h.astype(jnp.bfloat16)
    if mp != m:
        h = jnp.pad(h, ((0, mp - m), (0, 0)))
    out = pl.pallas_call(
        _bottleneck_kernel,
        out_shape=jax.ShapeDtypeStruct((mp, n), jnp.bfloat16),
        grid=(mp // tm,),
        in_specs=[
            pl.BlockSpec((tm, kin), lambda i: (i, 0)),
            pl.BlockSpec((kin, latent), lambda i: (0, 0)),
            pl.BlockSpec((1, latent), lambda i: (0, 0)),
            pl.BlockSpec((latent, n), lambda i: (0, 0)),
            pl.BlockSpec((1, n), lambda i: (0, 0)),
        ],
        out_specs=pl.BlockSpec((tm, n), lambda i: (i, 0)),
        compiler_params=pltpu.CompilerParams(dimension_semantics=("parallel",)),
    )(h, we, be, wd, bd)
    return out if mp == m else out[:m]


# ----------------------------------------------------------------------------
# Layer glue (NHWC, no transposes between layers)
# ----------------------------------------------------------------------------
def conv2d_nhwc(x, w_packed, b, K, stride, pad, act, out_dtype=jnp.bfloat16):
    """PyTorch-semantics Conv2d on NHWC input. w_packed: (K*K*Cin, Cout)."""
    N, H, W, C = x.shape
    OH = (H + 2 * pad - K) // stride + 1
    OW = (W + 2 * pad - K) // stride + 1
    xp = jnp.pad(x, ((0, 0), (pad, pad), (pad, pad), (0, 0))) if pad else x
    cols = []
    for kh in range(K):
        for kw in range(K):
            cols.append(xp[:, kh:kh + stride * (OH - 1) + 1:stride,
                              kw:kw + stride * (OW - 1) + 1:stride, :])
    # channel-minor concat -> column order (kh, kw, cin); matches packed weight
    p = jnp.concatenate(cols, axis=-1).reshape(N * OH * OW, K * K * C)
    y = matmul_bias_act(p, w_packed, b, act, out_dtype)
    return y.reshape(N, OH, OW, w_packed.shape[1])


def conv_transpose2d_nhwc(x, w_packed, b, act, out_dtype=jnp.bfloat16):
    """ConvTranspose2d(k=3, s=2, p=1, op=1) via sub-pixel decomposition.

    x: (N, H, W, Cin) -> (N, 2H, 2W, Cout).  w_packed: (4*Cin, 4*Cout) holds the
    four output-phase kernels; no zero-dilated input is ever materialized.
    """
    N, H, W, C = x.shape
    xp = jnp.pad(x, ((0, 0), (0, 1), (0, 1), (0, 0)))  # bottom/right zero row/col
    cols = [xp[:, dh:dh + H, dw:dw + W, :] for dh in (0, 1) for dw in (0, 1)]
    p = jnp.concatenate(cols, axis=-1).reshape(N * H * W, 4 * C)
    y = matmul_bias_act(p, w_packed, b, act, out_dtype)      # (M, 4*Cout)
    Cout = w_packed.shape[1] // 4
    y = y.reshape(N, H, W, 2, 2, Cout)                        # (N, m, n, i, j, c)
    y = y.transpose(0, 1, 3, 2, 4, 5)                         # (N, m, i, n, j, c)
    return y.reshape(N, 2 * H, 2 * W, Cout)


# ----------------------------------------------------------------------------
# Parameters (PyTorch-layout) + one-time packing for the kernels
# ----------------------------------------------------------------------------
def init_params(key, latent_dim=LATENT_DIM):
    keys = jax.random.split(key, 18)

    def u(k, shape, fan_in):
        bound = 1.0 / jnp.sqrt(jnp.float32(fan_in))
        return jax.random.uniform(k, shape, jnp.float32, -bound, bound)

    p = {}
    p["e1_w"] = u(keys[0], (32, 1, 3, 3), 1 * 9);      p["e1_b"] = u(keys[1], (32,), 1 * 9)
    p["e2_w"] = u(keys[2], (64, 32, 3, 3), 32 * 9);    p["e2_b"] = u(keys[3], (64,), 32 * 9)
    p["e3_w"] = u(keys[4], (128, 64, 3, 3), 64 * 9);   p["e3_b"] = u(keys[5], (128,), 64 * 9)
    p["el_w"] = u(keys[6], (latent_dim, 2048), 2048);  p["el_b"] = u(keys[7], (latent_dim,), 2048)
    p["dl_w"] = u(keys[8], (2048, latent_dim), latent_dim)
    p["dl_b"] = u(keys[9], (2048,), latent_dim)
    p["d1_w"] = u(keys[10], (128, 64, 3, 3), 128 * 9); p["d1_b"] = u(keys[11], (64,), 128 * 9)
    p["d2_w"] = u(keys[12], (64, 32, 3, 3), 64 * 9);   p["d2_b"] = u(keys[13], (32,), 64 * 9)
    p["d3_w"] = u(keys[14], (32, 1, 3, 3), 32 * 9);    p["d3_b"] = u(keys[15], (1,), 32 * 9)
    p["fc_w"] = u(keys[16], (1, 1, 5, 5), 25);         p["fc_b"] = u(keys[17], (1,), 25)
    return p


def _pack_conv(w, b):
    """(Cout, Cin, K, K) -> (K*K*Cin, Cout) bf16, rows ordered (kh, kw, cin)."""
    Cout, Cin, K, _ = w.shape
    wp = jnp.transpose(w, (2, 3, 1, 0)).reshape(K * K * Cin, Cout)
    return wp.astype(jnp.bfloat16), b.reshape(1, Cout).astype(jnp.float32)


def _pack_conv_transpose(w, b):
    """(Cin, Cout, 3, 3) torch ConvTranspose weight -> sub-pixel (4Cin, 4Cout).

    Row blocks: input offsets (dh, dw) in {0,1}^2 of the bottom/right-padded x.
    Col blocks: output phases (i, j) = (oh % 2, ow % 2).
    Derived from ih = (oh + 1 - kh) / 2, iw = (ow + 1 - kw) / 2 (s=2, p=1, op=1).
    """
    Cin, Cout = w.shape[0], w.shape[1]
    taps = {
        (0, 0): [((0, 0), (1, 1))],
        (0, 1): [((0, 0), (1, 2)), ((0, 1), (1, 0))],
        (1, 0): [((0, 0), (2, 1)), ((1, 0), (0, 1))],
        (1, 1): [((0, 0), (2, 2)), ((0, 1), (2, 0)),
                 ((1, 0), (0, 2)), ((1, 1), (0, 0))],
    }
    wp = jnp.zeros((4 * Cin, 4 * Cout), jnp.float32)
    for (i, j), lst in taps.items():
        cb = (i * 2 + j) * Cout
        for (dh, dw), (kh, kw) in lst:
            rb = (dh * 2 + dw) * Cin
            wp = wp.at[rb:rb + Cin, cb:cb + Cout].set(w[:, :, kh, kw])
    bp = jnp.tile(b, 4).reshape(1, 4 * Cout)
    return wp.astype(jnp.bfloat16), bp.astype(jnp.float32)


def _pack_enc_linear(w, b, latent):
    """Linear(2048->latent): permute columns from NCHW-flatten to NHWC-flatten."""
    wp = w.reshape(latent, 128, 4, 4).transpose(0, 2, 3, 1).reshape(latent, 2048).T
    return wp.astype(jnp.bfloat16), b.reshape(1, latent).astype(jnp.float32)


def _pack_dec_linear(w, b, latent):
    """Linear(latent->2048): permute rows so the output is NHWC-flattened."""
    wp = w.reshape(128, 4, 4, latent).transpose(1, 2, 0, 3).reshape(2048, latent).T
    bp = b.reshape(128, 4, 4).transpose(1, 2, 0).reshape(1, 2048)
    return wp.astype(jnp.bfloat16), bp.astype(jnp.float32)


def pack_params(p, latent_dim=LATENT_DIM):
    """One-time weight preprocessing (hoisted out of the forward path)."""
    q = {}
    q["e1_w"], q["e1_b"] = _pack_conv(p["e1_w"], p["e1_b"])
    q["e2_w"], q["e2_b"] = _pack_conv(p["e2_w"], p["e2_b"])
    q["e3_w"], q["e3_b"] = _pack_conv(p["e3_w"], p["e3_b"])
    q["el_w"], q["el_b"] = _pack_enc_linear(p["el_w"], p["el_b"], latent_dim)
    q["dl_w"], q["dl_b"] = _pack_dec_linear(p["dl_w"], p["dl_b"], latent_dim)
    q["d1_w"], q["d1_b"] = _pack_conv_transpose(p["d1_w"], p["d1_b"])
    q["d2_w"], q["d2_b"] = _pack_conv_transpose(p["d2_w"], p["d2_b"])
    q["d3_w"], q["d3_b"] = _pack_conv_transpose(p["d3_w"], p["d3_b"])
    q["fc_w"], q["fc_b"] = _pack_conv(p["fc_w"], p["fc_b"])
    return q


# ----------------------------------------------------------------------------
# Forward pass (matches CNNAutoencoder.forward)
# ----------------------------------------------------------------------------
def forward(packed, x_nchw):
    # boundary: NCHW f32 -> NHWC bf16 (only layout change in the whole model)
    x = jnp.transpose(x_nchw, (0, 2, 3, 1)).astype(jnp.bfloat16)

    # ----- encoder -----
    h = conv2d_nhwc(x, packed["e1_w"], packed["e1_b"], 3, 2, 1, "relu")   # (N,14,14,32)
    h = conv2d_nhwc(h, packed["e2_w"], packed["e2_b"], 3, 2, 1, "relu")   # (N,7,7,64)
    h = conv2d_nhwc(h, packed["e3_w"], packed["e3_b"], 3, 2, 1, "relu")   # (N,4,4,128)

    # ----- latent bottleneck: Flatten -> Linear -> Sigmoid -> Linear -> ReLU -----
    N = h.shape[0]
    d = bottleneck(h.reshape(N, 4 * 4 * 128),
                   packed["el_w"], packed["el_b"],
                   packed["dl_w"], packed["dl_b"])                        # (N, 2048)
    d = d.reshape(N, 4, 4, 128)                                           # NHWC Unflatten

    # ----- decoder (sub-pixel transposed convs) -----
    d = conv_transpose2d_nhwc(d, packed["d1_w"], packed["d1_b"], "relu")      # (N,8,8,64)
    d = conv_transpose2d_nhwc(d, packed["d2_w"], packed["d2_b"], "relu")      # (N,16,16,32)
    d = conv_transpose2d_nhwc(d, packed["d3_w"], packed["d3_b"], "sigmoid")   # (N,32,32,1)

    # ----- final_crop: Conv2d(1,1,k=5,s=1,p=0) + Sigmoid -----
    d = conv2d_nhwc(d, packed["fc_w"], packed["fc_b"], 5, 1, 0, "sigmoid",
                    out_dtype=jnp.float32)                                # (N,28,28,1)

    return jnp.transpose(d, (0, 3, 1, 2))                                 # NHWC -> NCHW


if __name__ == "__main__":
    key = jax.random.PRNGKey(0)
    pkey, xkey = jax.random.split(key)

    params = init_params(pkey, latent_dim=LATENT_DIM)
    packed = pack_params(params, latent_dim=LATENT_DIM)   # one-time packing

    # MNIST-shaped input (batch=2, 1 channel, 28x28) — required by the
    # Flatten -> Linear(128*4*4) in the module.
    x = jax.random.uniform(xkey, (2, 1, 28, 28), jnp.float32)

    out = jax.jit(forward)(packed, x)
    out = jax.block_until_ready(out)
    assert out.shape == (2, 1, 28, 28), out.shape
    assert out.dtype == jnp.float32
    print("KERNEL_OK")
</pallas_src>

<mosaic_0001>
module attributes {stable_mosaic.version = 11 : i64} {
  func.func @_mm_bias_act_kernel(%arg0: i32, %arg1: memref<256x9xbf16, #tpu.memory_space<vmem>>, %arg2: memref<9x32xbf16, #tpu.memory_space<vmem>>, %arg3: memref<1x32xf32, #tpu.memory_space<vmem>>, %arg4: memref<256x32xbf16, #tpu.memory_space<vmem>>) attributes {dimension_semantics = [#tpu.dimension_semantics<parallel>], iteration_bounds = array<i64: 2>, scalar_prefetch = 0 : i64, scratch_operands = 0 : i64, tpu.core_type = #tpu.core_type<tc>, window_params = [{transform_indices = @transform_0, window_bounds = array<i64: 256, 9>}, {pipeline_mode = #tpu.pipeline_mode<synchronous>, transform_indices = @transform_1, window_bounds = array<i64: 9, 32>}, {pipeline_mode = #tpu.pipeline_mode<synchronous>, transform_indices = @transform_2, window_bounds = array<i64: 1, 32>}, {transform_indices = @transform_3, window_bounds = array<i64: 256, 32>}]} {
    %c0 = arith.constant 0 : index
    %c0_0 = arith.constant 0 : index
    %0 = vector.load %arg1[%c0, %c0_0] : memref<256x9xbf16, #tpu.memory_space<vmem>>, vector<256x9xbf16>
    %c0_1 = arith.constant 0 : index
    %c0_2 = arith.constant 0 : index
    %1 = vector.load %arg2[%c0_1, %c0_2] : memref<9x32xbf16, #tpu.memory_space<vmem>>, vector<9x32xbf16>
    %cst = arith.constant dense<0.000000e+00> : vector<256x32xf32>
    %2 = tpu.matmul %0, %1, %cst {dimension_numbers = #tpu.dot_dimension_numbers<[1], [0], [0], [1], [0, 0, 1, 1], [], []>} : vector<256x9xbf16>, vector<9x32xbf16>, vector<256x32xf32> -> vector<256x32xf32>
    %c0_3 = arith.constant 0 : index
    %c0_4 = arith.constant 0 : index
    %3 = vector.load %arg3[%c0_3, %c0_4] : memref<1x32xf32, #tpu.memory_space<vmem>>, vector<1x32xf32>
    %4 = vector.broadcast %3 : vector<1x32xf32> to vector<256x32xf32>
    %5 = arith.addf %2, %4 : vector<256x32xf32>
    %cst_5 = arith.constant 0.000000e+00 : f32
    %6 = vector.broadcast %cst_5 : f32 to vector<256x32xf32>
    %7 = arith.maximumf %5, %6 : vector<256x32xf32>
    %8 = arith.truncf %7 : vector<256x32xf32> to vector<256x32xbf16>
    %c0_6 = arith.constant 0 : index
    %c0_7 = arith.constant 0 : index
    %9 = vector.load %arg4[%c0_6, %c0_7] : memref<256x32xbf16, #tpu.memory_space<vmem>>, vector<256x32xbf16>
    tpu.vector_store %arg4[%c0_6, %c0_7], %8 {strides = array<i32>} : memref<256x32xbf16, #tpu.memory_space<vmem>>, vector<256x32xbf16>,
    return
  }
  func.func @transform_0(%arg0: i32) -> (i32, i32) {
    %c0_i32 = arith.constant 0 : i32
    %c0_i32_0 = arith.constant 0 : i32
    return %arg0, %c0_i32 : i32, i32
  }
  func.func @transform_1(%arg0: i32) -> (i32, i32) {
    %c0_i32 = arith.constant 0 : i32
    %c0_i32_0 = arith.constant 0 : i32
    %c0_i32_1 = arith.constant 0 : i32
    return %c0_i32, %c0_i32_0 : i32, i32
  }
  func.func @transform_2(%arg0: i32) -> (i32, i32) {
    %c0_i32 = arith.constant 0 : i32
    %c0_i32_0 = arith.constant 0 : i32
    %c0_i32_1 = arith.constant 0 : i32
    return %c0_i32, %c0_i32_0 : i32, i32
  }
  func.func @transform_3(%arg0: i32) -> (i32, i32) {
    %c0_i32 = arith.constant 0 : i32
    %c0_i32_0 = arith.constant 0 : i32
    return %arg0, %c0_i32 : i32, i32
  }
}

module attributes {stable_mosaic.version = 11 : i64} {
  func.func @_mm_bias_act_kernel(%arg0: i32, %arg1: memref<104x288xbf16, #tpu.memory_space<vmem>>, %arg2: memref<288x64xbf16, #tpu.memory_space<vmem>>, %arg3: memref<1x64xf32, #tpu.memory_space<vmem>>, %arg4: memref<104x64xbf16, #tpu.memory_space<vmem>>) attributes {dimension_semantics = [#tpu.dimension_semantics<parallel>], iteration_bounds = array<i64: 1>, scalar_prefetch = 0 : i64, scratch_operands = 0 : i64, tpu.core_type = #tpu.core_type<tc>, window_params = [{transform_indices = @transform_0, window_bounds = array<i64: 104, 288>}, {pipeline_mode = #tpu.pipeline_mode<synchronous>, transform_indices = @transform_1, window_bounds = array<i64: 288, 64>}, {pipeline_mode = #tpu.pipeline_mode<synchronous>, transform_indices = @transform_2, window_bounds = array<i64: 1, 64>}, {transform_indices = @transform_3, window_bounds = array<i64: 104, 64>}]} {
    %c0 = arith.constant 0 : index
    %c0_0 = arith.constant 0 : index
    %0 = vector.load %arg1[%c0, %c0_0] : memref<104x288xbf16, #tpu.memory_space<vmem>>, vector<104x288xbf16>
    %c0_1 = arith.constant 0 : index
    %c0_2 = arith.constant 0 : index
    %1 = vector.load %arg2[%c0_1, %c0_2] : memref<288x64xbf16, #tpu.memory_space<vmem>>, vector<288x64xbf16>
    %cst = arith.constant dense<0.000000e+00> : vector<104x64xf32>
    %2 = tpu.matmul %0, %1, %cst {dimension_numbers = #tpu.dot_dimension_numbers<[1], [0], [0], [1], [0, 0, 1, 1], [], []>} : vector<104x288xbf16>, vector<288x64xbf16>, vector<104x64xf32> -> vector<104x64xf32>
    %c0_3 = arith.constant 0 : index
    %c0_4 = arith.constant 0 : index
    %3 = vector.load %arg3[%c0_3, %c0_4] : memref<1x64xf32, #tpu.memory_space<vmem>>, vector<1x64xf32>
    %4 = vector.broadcast %3 : vector<1x64xf32> to vector<104x64xf32>
    %5 = arith.addf %2, %4 : vector<104x64xf32>
    %cst_5 = arith.constant 0.000000e+00 : f32
    %6 = vector.broadcast %cst_5 : f32 to vector<104x64xf32>
    %7 = arith.maximumf %5, %6 : vector<104x64xf32>
    %8 = arith.truncf %7 : vector<104x64xf32> to vector<104x64xbf16>
    %c0_6 = arith.constant 0 : index
    %c0_7 = arith.constant 0 : index
    %9 = vector.load %arg4[%c0_6, %c0_7] : memref<104x64xbf16, #tpu.memory_space<vmem>>, vector<104x64xbf16>
    tpu.vector_store %arg4[%c0_6, %c0_7], %8 {strides = array<i32>} : memref<104x64xbf16, #tpu.memory_space<vmem>>, vector<104x64xbf16>,
    return
  }
  func.func @transform_0(%arg0: i32) -> (i32, i32) {
    %c0_i32 = arith.constant 0 : i32
    %c0_i32_0 = arith.constant 0 : i32
    return %arg0, %c0_i32 : i32, i32
  }
  func.func @transform_1(%arg0: i32) -> (i32, i32) {
    %c0_i32 = arith.constant 0 : i32
    %c0_i32_0 = arith.constant 0 : i32
    %c0_i32_1 = arith.constant 0 : i32
    return %c0_i32, %c0_i32_0 : i32, i32
  }
  func.func @transform_2(%arg0: i32) -> (i32, i32) {
    %c0_i32 = arith.constant 0 : i32
    %c0_i32_0 = arith.constant 0 : i32
    %c0_i32_1 = arith.constant 0 : i32
    return %c0_i32, %c0_i32_0 : i32, i32
  }
  func.func @transform_3(%arg0: i32) -> (i32, i32) {
    %c0_i32 = arith.constant 0 : i32
    %c0_i32_0 = arith.constant 0 : i32
    return %arg0, %c0_i32 : i32, i32
  }
}

module attributes {stable_mosaic.version = 11 : i64} {
  func.func @_mm_bias_act_kernel(%arg0: i32, %arg1: memref<32x576xbf16, #tpu.memory_space<vmem>>, %arg2: memref<576x128xbf16, #tpu.memory_space<vmem>>, %arg3: memref<1x128xf32, #tpu.memory_space<vmem>>, %arg4: memref<32x128xbf16, #tpu.memory_space<vmem>>) attributes {dimension_semantics = [#tpu.dimension_semantics<parallel>], iteration_bounds = array<i64: 1>, scalar_prefetch = 0 : i64, scratch_operands = 0 : i64, tpu.core_type = #tpu.core_type<tc>, window_params = [{transform_indices = @transform_0, window_bounds = array<i64: 32, 576>}, {pipeline_mode = #tpu.pipeline_mode<synchronous>, transform_indices = @transform_1, window_bounds = array<i64: 576, 128>}, {pipeline_mode = #tpu.pipeline_mode<synchronous>, transform_indices = @transform_2, window_bounds = array<i64: 1, 128>}, {transform_indices = @transform_3, window_bounds = array<i64: 32, 128>}]} {
    %c0 = arith.constant 0 : index
    %c0_0 = arith.constant 0 : index
    %0 = vector.load %arg1[%c0, %c0_0] : memref<32x576xbf16, #tpu.memory_space<vmem>>, vector<32x576xbf16>
    %c0_1 = arith.constant 0 : index
    %c0_2 = arith.constant 0 : index
    %1 = vector.load %arg2[%c0_1, %c0_2] : memref<576x128xbf16, #tpu.memory_space<vmem>>, vector<576x128xbf16>
    %cst = arith.constant dense<0.000000e+00> : vector<32x128xf32>
    %2 = tpu.matmul %0, %1, %cst {dimension_numbers = #tpu.dot_dimension_numbers<[1], [0], [0], [1], [0, 0, 1, 1], [], []>} : vector<32x576xbf16>, vector<576x128xbf16>, vector<32x128xf32> -> vector<32x128xf32>
    %c0_3 = arith.constant 0 : index
    %c0_4 = arith.constant 0 : index
    %3 = vector.load %arg3[%c0_3, %c0_4] : memref<1x128xf32, #tpu.memory_space<vmem>>, vector<1x128xf32>
    %4 = vector.broadcast %3 : vector<1x128xf32> to vector<32x128xf32>
    %5 = arith.addf %2, %4 : vector<32x128xf32>
    %cst_5 = arith.constant 0.000000e+00 : f32
    %6 = vector.broadcast %cst_5 : f32 to vector<32x128xf32>
    %7 = arith.maximumf %5, %6 : vector<32x128xf32>
    %8 = arith.truncf %7 : vector<32x128xf32> to vector<32x128xbf16>
    %c0_6 = arith.constant 0 : index
    %c0_7 = arith.constant 0 : index
    %9 = vector.load %arg4[%c0_6, %c0_7] : memref<32x128xbf16, #tpu.memory_space<vmem>>, vector<32x128xbf16>
    tpu.vector_store %arg4[%c0_6, %c0_7], %8 {strides = array<i32>} : memref<32x128xbf16, #tpu.memory_space<vmem>>, vector<32x128xbf16>,
    return
  }
  func.func @transform_0(%arg0: i32) -> (i32, i32) {
    %c0_i32 = arith.constant 0 : i32
    %c0_i32_0 = arith.constant 0 : i32
    return %arg0, %c0_i32 : i32, i32
  }
  func.func @transform_1(%arg0: i32) -> (i32, i32) {
    %c0_i32 = arith.constant 0 : i32
    %c0_i32_0 = arith.constant 0 : i32
    %c0_i32_1 = arith.constant 0 : i32
    return %c0_i32, %c0_i32_0 : i32, i32
  }
  func.func @transform_2(%arg0: i32) -> (i32, i32) {
    %c0_i32 = arith.constant 0 : i32
    %c0_i32_0 = arith.constant 0 : i32
    %c0_i32_1 = arith.constant 0 : i32
    return %c0_i32, %c0_i32_0 : i32, i32
  }
  func.func @transform_3(%arg0: i32) -> (i32, i32) {
    %c0_i32 = arith.constant 0 : i32
    %c0_i32_0 = arith.constant 0 : i32
    return %arg0, %c0_i32 : i32, i32
  }
}

module attributes {stable_mosaic.version = 11 : i64} {
  func.func @_bottleneck_kernel(%arg0: i32, %arg1: memref<8x2048xbf16, #tpu.memory_space<vmem>>, %arg2: memref<2048x4xbf16, #tpu.memory_space<vmem>>, %arg3: memref<1x4xf32, #tpu.memory_space<vmem>>, %arg4: memref<4x2048xbf16, #tpu.memory_space<vmem>>, %arg5: memref<1x2048xf32, #tpu.memory_space<vmem>>, %arg6: memref<8x2048xbf16, #tpu.memory_space<vmem>>) attributes {dimension_semantics = [#tpu.dimension_semantics<parallel>], iteration_bounds = array<i64: 1>, scalar_prefetch = 0 : i64, scratch_operands = 0 : i64, tpu.core_type = #tpu.core_type<tc>, window_params = [{transform_indices = @transform_0, window_bounds = array<i64: 8, 2048>}, {pipeline_mode = #tpu.pipeline_mode<synchronous>, transform_indices = @transform_1, window_bounds = array<i64: 2048, 4>}, {pipeline_mode = #tpu.pipeline_mode<synchronous>, transform_indices = @transform_2, window_bounds = array<i64: 1, 4>}, {pipeline_mode = #tpu.pipeline_mode<synchronous>, transform_indices = @transform_3, window_bounds = array<i64: 4, 2048>}, {pipeline_mode = #tpu.pipeline_mode<synchronous>, transform_indices = @transform_4, window_bounds = array<i64: 1, 2048>}, {transform_indices = @transform_5, window_bounds = array<i64: 8, 2048>}]} {
    %c0 = arith.constant 0 : index
    %c0_0 = arith.constant 0 : index
    %0 = vector.load %arg1[%c0, %c0_0] : memref<8x2048xbf16, #tpu.memory_space<vmem>>, vector<8x2048xbf16>
    %c0_1 = arith.constant 0 : index
    %c0_2 = arith.constant 0 : index
    %1 = vector.load %arg2[%c0_1, %c0_2] : memref<2048x4xbf16, #tpu.memory_space<vmem>>, vector<2048x4xbf16>
    %cst = arith.constant dense<0.000000e+00> : vector<8x4xf32>
    %2 = tpu.matmul %0, %1, %cst {dimension_numbers = #tpu.dot_dimension_numbers<[1], [0], [0], [1], [0, 0, 1, 1], [], []>} : vector<8x2048xbf16>, vector<2048x4xbf16>, vector<8x4xf32> -> vector<8x4xf32>
    %c0_3 = arith.constant 0 : index
    %c0_4 = arith.constant 0 : index
    %3 = vector.load %arg3[%c0_3, %c0_4] : memref<1x4xf32, #tpu.memory_space<vmem>>, vector<1x4xf32>
    %4 = vector.broadcast %3 : vector<1x4xf32> to vector<8x4xf32>
    %5 = arith.addf %2, %4 : vector<8x4xf32>
    %6 = arith.negf %5 : vector<8x4xf32>
    %7 = math.exp %6 : vector<8x4xf32>
    %cst_5 = arith.constant 1.000000e+00 : f32
    %8 = vector.broadcast %cst_5 : f32 to vector<8x4xf32>
    %9 = arith.addf %8, %7 : vector<8x4xf32>
    %10 = arith.divf %8, %9 : vector<8x4xf32>
    %11 = arith.truncf %10 : vector<8x4xf32> to vector<8x4xbf16>
    %c0_6 = arith.constant 0 : index
    %c0_7 = arith.constant 0 : index
    %12 = vector.load %arg4[%c0_6, %c0_7] : memref<4x2048xbf16, #tpu.memory_space<vmem>>, vector<4x2048xbf16>
    %cst_8 = arith.constant dense<0.000000e+00> : vector<8x2048xf32>
    %13 = tpu.matmul %11, %12, %cst_8 {dimension_numbers = #tpu.dot_dimension_numbers<[1], [0], [0], [1], [0, 0, 1, 1], [], []>} : vector<8x4xbf16>, vector<4x2048xbf16>, vector<8x2048xf32> -> vector<8x2048xf32>
    %c0_9 = arith.constant 0 : index
    %c0_10 = arith.constant 0 : index
    %14 = vector.load %arg5[%c0_9, %c0_10] : memref<1x2048xf32, #tpu.memory_space<vmem>>, vector<1x2048xf32>
    %15 = vector.broadcast %14 : vector<1x2048xf32> to vector<8x2048xf32>
    %16 = arith.addf %13, %15 : vector<8x2048xf32>
    %cst_11 = arith.constant 0.000000e+00 : f32
    %17 = vector.broadcast %cst_11 : f32 to vector<8x2048xf32>
    %18 = arith.maximumf %16, %17 : vector<8x2048xf32>
    %19 = arith.truncf %18 : vector<8x2048xf32> to vector<8x2048xbf16>
    %c0_12 = arith.constant 0 : index
    %c0_13 = arith.constant 0 : index
    %20 = vector.load %arg6[%c0_12, %c0_13] : memref<8x2048xbf16, #tpu.memory_space<vmem>>, vector<8x2048xbf16>
    tpu.vector_store %arg6[%c0_12, %c0_13], %19 {strides = array<i32>} : memref<8x2048xbf16, #tpu.memory_space<vmem>>, vector<8x2048xbf16>,
    return
  }
  func.func @transform_0(%arg0: i32) -> (i32, i32) {
    %c0_i32 = arith.constant 0 : i32
    %c0_i32_0 = arith.constant 0 : i32
    return %arg0, %c0_i32 : i32, i32
  }
  func.func @transform_1(%arg0: i32) -> (i32, i32) {
    %c0_i32 = arith.constant 0 : i32
    %c0_i32_0 = arith.constant 0 : i32
    %c0_i32_1 = arith.constant 0 : i32
    return %c0_i32, %c0_i32_0 : i32, i32
  }
  func.func @transform_2(%arg0: i32) -> (i32, i32) {
    %c0_i32 = arith.constant 0 : i32
    %c0_i32_0 = arith.constant 0 : i32
    %c0_i32_1 = arith.constant 0 : i32
    return %c0_i32, %c0_i32_0 : i32, i32
  }
  func.func @transform_3(%arg0: i32) -> (i32, i32) {
    %c0_i32 = arith.constant 0 : i32
    %c0_i32_0 = arith.constant 0 : i32
    %c0_i32_1 = arith.constant 0 : i32
    return %c0_i32, %c0_i32_0 : i32, i32
  }
  func.func @transform_4(%arg0: i32) -> (i32, i32) {
    %c0_i32 = arith.constant 0 : i32
    %c0_i32_0 = arith.constant 0 : i32
    %c0_i32_1 = arith.constant 0 : i32
    return %c0_i32, %c0_i32_0 : i32, i32
  }
  func.func @transform_5(%arg0: i32) -> (i32, i32) {
    %c0_i32 = arith.constant 0 : i32
    %c0_i32_0 = arith.constant 0 : i32
    return %arg0, %c0_i32 : i32, i32
  }
}

module attributes {stable_mosaic.version = 11 : i64} {
  func.func @_mm_bias_act_kernel(%arg0: i32, %arg1: memref<32x512xbf16, #tpu.memory_space<vmem>>, %arg2: memref<512x256xbf16, #tpu.memory_space<vmem>>, %arg3: memref<1x256xf32, #tpu.memory_space<vmem>>, %arg4: memref<32x256xbf16, #tpu.memory_space<vmem>>) attributes {dimension_semantics = [#tpu.dimension_semantics<parallel>], iteration_bounds = array<i64: 1>, scalar_prefetch = 0 : i64, scratch_operands = 0 : i64, tpu.core_type = #tpu.core_type<tc>, window_params = [{transform_indices = @transform_0, window_bounds = array<i64: 32, 512>}, {pipeline_mode = #tpu.pipeline_mode<synchronous>, transform_indices = @transform_1, window_bounds = array<i64: 512, 256>}, {pipeline_mode = #tpu.pipeline_mode<synchronous>, transform_indices = @transform_2, window_bounds = array<i64: 1, 256>}, {transform_indices = @transform_3, window_bounds = array<i64: 32, 256>}]} {
    %c0 = arith.constant 0 : index
    %c0_0 = arith.constant 0 : index
    %0 = vector.load %arg1[%c0, %c0_0] : memref<32x512xbf16, #tpu.memory_space<vmem>>, vector<32x512xbf16>
    %c0_1 = arith.constant 0 : index
    %c0_2 = arith.constant 0 : index
    %1 = vector.load %arg2[%c0_1, %c0_2] : memref<512x256xbf16, #tpu.memory_space<vmem>>, vector<512x256xbf16>
    %cst = arith.constant dense<0.000000e+00> : vector<32x256xf32>
    %2 = tpu.matmul %0, %1, %cst {dimension_numbers = #tpu.dot_dimension_numbers<[1], [0], [0], [1], [0, 0, 1, 1], [], []>} : vector<32x512xbf16>, vector<512x256xbf16>, vector<32x256xf32> -> vector<32x256xf32>
    %c0_3 = arith.constant 0 : index
    %c0_4 = arith.constant 0 : index
    %3 = vector.load %arg3[%c0_3, %c0_4] : memref<1x256xf32, #tpu.memory_space<vmem>>, vector<1x256xf32>
    %4 = vector.broadcast %3 : vector<1x256xf32> to vector<32x256xf32>
    %5 = arith.addf %2, %4 : vector<32x256xf32>
    %cst_5 = arith.constant 0.000000e+00 : f32
    %6 = vector.broadcast %cst_5 : f32 to vector<32x256xf32>
    %7 = arith.maximumf %5, %6 : vector<32x256xf32>
    %8 = arith.truncf %7 : vector<32x256xf32> to vector<32x256xbf16>
    %c0_6 = arith.constant 0 : index
    %c0_7 = arith.constant 0 : index
    %9 = vector.load %arg4[%c0_6, %c0_7] : memref<32x256xbf16, #tpu.memory_space<vmem>>, vector<32x256xbf16>
    tpu.vector_store %arg4[%c0_6, %c0_7], %8 {strides = array<i32>} : memref<32x256xbf16, #tpu.memory_space<vmem>>, vector<32x256xbf16>,
    return
  }
  func.func @transform_0(%arg0: i32) -> (i32, i32) {
    %c0_i32 = arith.constant 0 : i32
    %c0_i32_0 = arith.constant 0 : i32
    return %arg0, %c0_i32 : i32, i32
  }
  func.func @transform_1(%arg0: i32) -> (i32, i32) {
    %c0_i32 = arith.constant 0 : i32
    %c0_i32_0 = arith.constant 0 : i32
    %c0_i32_1 = arith.constant 0 : i32
    return %c0_i32, %c0_i32_0 : i32, i32
  }
  func.func @transform_2(%arg0: i32) -> (i32, i32) {
    %c0_i32 = arith.constant 0 : i32
    %c0_i32_0 = arith.constant 0 : i32
    %c0_i32_1 = arith.constant 0 : i32
    return %c0_i32, %c0_i32_0 : i32, i32
  }
  func.func @transform_3(%arg0: i32) -> (i32, i32) {
    %c0_i32 = arith.constant 0 : i32
    %c0_i32_0 = arith.constant 0 : i32
    return %arg0, %c0_i32 : i32, i32
  }
}

module attributes {stable_mosaic.version = 11 : i64} {
  func.func @_mm_bias_act_kernel(%arg0: i32, %arg1: memref<128x256xbf16, #tpu.memory_space<vmem>>, %arg2: memref<256x128xbf16, #tpu.memory_space<vmem>>, %arg3: memref<1x128xf32, #tpu.memory_space<vmem>>, %arg4: memref<128x128xbf16, #tpu.memory_space<vmem>>) attributes {dimension_semantics = [#tpu.dimension_semantics<parallel>], iteration_bounds = array<i64: 1>, scalar_prefetch = 0 : i64, scratch_operands = 0 : i64, tpu.core_type = #tpu.core_type<tc>, window_params = [{transform_indices = @transform_0, window_bounds = array<i64: 128, 256>}, {pipeline_mode = #tpu.pipeline_mode<synchronous>, transform_indices = @transform_1, window_bounds = array<i64: 256, 128>}, {pipeline_mode = #tpu.pipeline_mode<synchronous>, transform_indices = @transform_2, window_bounds = array<i64: 1, 128>}, {transform_indices = @transform_3, window_bounds = array<i64: 128, 128>}]} {
    %c0 = arith.constant 0 : index
    %c0_0 = arith.constant 0 : index
    %0 = vector.load %arg1[%c0, %c0_0] : memref<128x256xbf16, #tpu.memory_space<vmem>>, vector<128x256xbf16>
    %c0_1 = arith.constant 0 : index
    %c0_2 = arith.constant 0 : index
    %1 = vector.load %arg2[%c0_1, %c0_2] : memref<256x128xbf16, #tpu.memory_space<vmem>>, vector<256x128xbf16>
    %cst = arith.constant dense<0.000000e+00> : vector<128x128xf32>
    %2 = tpu.matmul %0, %1, %cst {dimension_numbers = #tpu.dot_dimension_numbers<[1], [0], [0], [1], [0, 0, 1, 1], [], []>} : vector<128x256xbf16>, vector<256x128xbf16>, vector<128x128xf32> -> vector<128x128xf32>
    %c0_3 = arith.constant 0 : index
    %c0_4 = arith.constant 0 : index
    %3 = vector.load %arg3[%c0_3, %c0_4] : memref<1x128xf32, #tpu.memory_space<vmem>>, vector<1x128xf32>
    %4 = vector.broadcast %3 : vector<1x128xf32> to vector<128x128xf32>
    %5 = arith.addf %2, %4 : vector<128x128xf32>
    %cst_5 = arith.constant 0.000000e+00 : f32
    %6 = vector.broadcast %cst_5 : f32 to vector<128x128xf32>
    %7 = arith.maximumf %5, %6 : vector<128x128xf32>
    %8 = arith.truncf %7 : vector<128x128xf32> to vector<128x128xbf16>
    %c0_6 = arith.constant 0 : index
    %c0_7 = arith.constant 0 : index
    %9 = vector.load %arg4[%c0_6, %c0_7] : memref<128x128xbf16, #tpu.memory_space<vmem>>, vector<128x128xbf16>
    tpu.vector_store %arg4[%c0_6, %c0_7], %8 {strides = array<i32>} : memref<128x128xbf16, #tpu.memory_space<vmem>>, vector<128x128xbf16>,
    return
  }
  func.func @transform_0(%arg0: i32) -> (i32, i32) {
    %c0_i32 = arith.constant 0 : i32
    %c0_i32_0 = arith.constant 0 : i32
    return %arg0, %c0_i32 : i32, i32
  }
  func.func @transform_1(%arg0: i32) -> (i32, i32) {
    %c0_i32 = arith.constant 0 : i32
    %c0_i32_0 = arith.constant 0 : i32
    %c0_i32_1 = arith.constant 0 : i32
    return %c0_i32, %c0_i32_0 : i32, i32
  }
  func.func @transform_2(%arg0: i32) -> (i32, i32) {
    %c0_i32 = arith.constant 0 : i32
    %c0_i32_0 = arith.constant 0 : i32
    %c0_i32_1 = arith.constant 0 : i32
    return %c0_i32, %c0_i32_0 : i32, i32
  }
  func.func @transform_3(%arg0: i32) -> (i32, i32) {
    %c0_i32 = arith.constant 0 : i32
    %c0_i32_0 = arith.constant 0 : i32
    return %arg0, %c0_i32 : i32, i32
  }
}

module attributes {stable_mosaic.version = 11 : i64} {
  func.func @_mm_bias_act_kernel(%arg0: i32, %arg1: memref<256x128xbf16, #tpu.memory_space<vmem>>, %arg2: memref<128x4xbf16, #tpu.memory_space<vmem>>, %arg3: memref<1x4xf32, #tpu.memory_space<vmem>>, %arg4: memref<256x4xbf16, #tpu.memory_space<vmem>>) attributes {dimension_semantics = [#tpu.dimension_semantics<parallel>], iteration_bounds = array<i64: 2>, scalar_prefetch = 0 : i64, scratch_operands = 0 : i64, tpu.core_type = #tpu.core_type<tc>, window_params = [{transform_indices = @transform_0, window_bounds = array<i64: 256, 128>}, {pipeline_mode = #tpu.pipeline_mode<synchronous>, transform_indices = @transform_1, window_bounds = array<i64: 128, 4>}, {pipeline_mode = #tpu.pipeline_mode<synchronous>, transform_indices = @transform_2, window_bounds = array<i64: 1, 4>}, {transform_indices = @transform_3, window_bounds = array<i64: 256, 4>}]} {
    %c0 = arith.constant 0 : index
    %c0_0 = arith.constant 0 : index
    %0 = vector.load %arg1[%c0, %c0_0] : memref<256x128xbf16, #tpu.memory_space<vmem>>, vector<256x128xbf16>
    %c0_1 = arith.constant 0 : index
    %c0_2 = arith.constant 0 : index
    %1 = vector.load %arg2[%c0_1, %c0_2] : memref<128x4xbf16, #tpu.memory_space<vmem>>, vector<128x4xbf16>
    %cst = arith.constant dense<0.000000e+00> : vector<256x4xf32>
    %2 = tpu.matmul %0, %1, %cst {dimension_numbers = #tpu.dot_dimension_numbers<[1], [0], [0], [1], [0, 0, 1, 1], [], []>} : vector<256x128xbf16>, vector<128x4xbf16>, vector<256x4xf32> -> vector<256x4xf32>
    %c0_3 = arith.constant 0 : index
    %c0_4 = arith.constant 0 : index
    %3 = vector.load %arg3[%c0_3, %c0_4] : memref<1x4xf32, #tpu.memory_space<vmem>>, vector<1x4xf32>
    %4 = vector.broadcast %3 : vector<1x4xf32> to vector<256x4xf32>
    %5 = arith.addf %2, %4 : vector<256x4xf32>
    %6 = arith.negf %5 : vector<256x4xf32>
    %7 = math.exp %6 : vector<256x4xf32>
    %cst_5 = arith.constant 1.000000e+00 : f32
    %8 = vector.broadcast %cst_5 : f32 to vector<256x4xf32>
    %9 = arith.addf %8, %7 : vector<256x4xf32>
    %10 = arith.divf %8, %9 : vector<256x4xf32>
    %11 = arith.truncf %10 : vector<256x4xf32> to vector<256x4xbf16>
    %c0_6 = arith.constant 0 : index
    %c0_7 = arith.constant 0 : index
    %12 = vector.load %arg4[%c0_6, %c0_7] : memref<256x4xbf16, #tpu.memory_space<vmem>>, vector<256x4xbf16>
    tpu.vector_store %arg4[%c0_6, %c0_7], %11 {strides = array<i32>} : memref<256x4xbf16, #tpu.memory_space<vmem>>, vector<256x4xbf16>,
    return
  }
  func.func @transform_0(%arg0: i32) -> (i32, i32) {
    %c0_i32 = arith.constant 0 : i32
    %c0_i32_0 = arith.constant 0 : i32
    return %arg0, %c0_i32 : i32, i32
  }
  func.func @transform_1(%arg0: i32) -> (i32, i32) {
    %c0_i32 = arith.constant 0 : i32
    %c0_i32_0 = arith.constant 0 : i32
    %c0_i32_1 = arith.constant 0 : i32
    return %c0_i32, %c0_i32_0 : i32, i32
  }
  func.func @transform_2(%arg0: i32) -> (i32, i32) {
    %c0_i32 = arith.constant 0 : i32
    %c0_i32_0 = arith.constant 0 : i32
    %c0_i32_1 = arith.constant 0 : i32
    return %c0_i32, %c0_i32_0 : i32, i32
  }
  func.func @transform_3(%arg0: i32) -> (i32, i32) {
    %c0_i32 = arith.constant 0 : i32
    %c0_i32_0 = arith.constant 0 : i32
    return %arg0, %c0_i32 : i32, i32
  }
}

module attributes {stable_mosaic.version = 11 : i64} {
  func.func @_mm_bias_act_kernel(%arg0: i32, %arg1: memref<224x25xbf16, #tpu.memory_space<vmem>>, %arg2: memref<25x1xbf16, #tpu.memory_space<vmem>>, %arg3: memref<1x1xf32, #tpu.memory_space<vmem>>, %arg4: memref<224x1xf32, #tpu.memory_space<vmem>>) attributes {dimension_semantics = [#tpu.dimension_semantics<parallel>], iteration_bounds = array<i64: 7>, scalar_prefetch = 0 : i64, scratch_operands = 0 : i64, tpu.core_type = #tpu.core_type<tc>, window_params = [{transform_indices = @transform_0, window_bounds = array<i64: 224, 25>}, {pipeline_mode = #tpu.pipeline_mode<synchronous>, transform_indices = @transform_1, window_bounds = array<i64: 25, 1>}, {pipeline_mode = #tpu.pipeline_mode<synchronous>, transform_indices = @transform_2, window_bounds = array<i64: 1, 1>}, {transform_indices = @transform_3, window_bounds = array<i64: 224, 1>}]} {
    %c0 = arith.constant 0 : index
    %c0_0 = arith.constant 0 : index
    %0 = vector.load %arg1[%c0, %c0_0] : memref<224x25xbf16, #tpu.memory_space<vmem>>, vector<224x25xbf16>
    %c0_1 = arith.constant 0 : index
    %c0_2 = arith.constant 0 : index
    %1 = vector.load %arg2[%c0_1, %c0_2] : memref<25x1xbf16, #tpu.memory_space<vmem>>, vector<25x1xbf16>
    %cst = arith.constant dense<0.000000e+00> : vector<224x1xf32>
    %2 = tpu.matmul %0, %1, %cst {dimension_numbers = #tpu.dot_dimension_numbers<[1], [0], [0], [1], [0, 0, 1, 1], [], []>} : vector<224x25xbf16>, vector<25x1xbf16>, vector<224x1xf32> -> vector<224x1xf32>
    %c0_3 = arith.constant 0 : index
    %c0_4 = arith.constant 0 : index
    %3 = vector.load %arg3[%c0_3, %c0_4] : memref<1x1xf32, #tpu.memory_space<vmem>>, vector<1x1xf32>
    %4 = vector.broadcast %3 : vector<1x1xf32> to vector<224x1xf32>
    %5 = arith.addf %2, %4 : vector<224x1xf32>
    %6 = arith.negf %5 : vector<224x1xf32>
    %7 = math.exp %6 : vector<224x1xf32>
    %cst_5 = arith.constant 1.000000e+00 : f32
    %8 = vector.broadcast %cst_5 : f32 to vector<224x1xf32>
    %9 = arith.addf %8, %7 : vector<224x1xf32>
    %10 = arith.divf %8, %9 : vector<224x1xf32>
    %c0_6 = arith.constant 0 : index
    %c0_7 = arith.constant 0 : index
    %11 = vector.load %arg4[%c0_6, %c0_7] : memref<224x1xf32, #tpu.memory_space<vmem>>, vector<224x1xf32>
    tpu.vector_store %arg4[%c0_6, %c0_7], %10 {strides = array<i32>} : memref<224x1xf32, #tpu.memory_space<vmem>>, vector<224x1xf32>,
    return
  }
  func.func @transform_0(%arg0: i32) -> (i32, i32) {
    %c0_i32 = arith.constant 0 : i32
    %c0_i32_0 = arith.constant 0 : i32
    return %arg0, %c0_i32 : i32, i32
  }
  func.func @transform_1(%arg0: i32) -> (i32, i32) {
    %c0_i32 = arith.constant 0 : i32
    %c0_i32_0 = arith.constant 0 : i32
    %c0_i32_1 = arith.constant 0 : i32
    return %c0_i32, %c0_i32_0 : i32, i32
  }
  func.func @transform_2(%arg0: i32) -> (i32, i32) {
    %c0_i32 = arith.constant 0 : i32
    %c0_i32_0 = arith.constant 0 : i32
    %c0_i32_1 = arith.constant 0 : i32
    return %c0_i32, %c0_i32_0 : i32, i32
  }
  func.func @transform_3(%arg0: i32) -> (i32, i32) {
    %c0_i32 = arith.constant 0 : i32
    %c0_i32_0 = arith.constant 0 : i32
    return %arg0, %c0_i32 : i32, i32
  }
}

</mosaic_0001>

<bundles_post_ra>
// kernel: forward.8
= control target key start
LH: loop header
LB: loop body
LE: loop exit
PB: predicated region body
PF: predicated region fallthrough
CT: control target
= control target key end

     0   :  { %s984_s12 = smov 0   ;;  %s1148_s0 = inlined_call_operand.vmem [shape: bf16[512,9], index: 0, kind: input, shape index: {}]   ;;  %s1149_s1 = inlined_call_operand.vmem [shape: bf16[9,32], index: 1, kind: input, shape index: {}]   ;;  %s1150_s2 = inlined_call_operand.vmem [shape: f32[1,32], index: 2, kind: input, shape index: {}]   ;;  %s1151_s3 = inlined_call_operand.vmem [shape: bf16[512,32], index: 3, kind: output, shape index: {}]  }
   0x1 LB: > { %s767_s13 = sadd.s32 4294967295, %s961_s12   ;;  %p771_p0 = scmp.ge.s32.totalorder %s961_s12, 1  ;;  %s961_s12 = sphi %s984_s12, %s13_s12  }
   0x2   : > { %p138_p1 = scmp.lt.s32.totalorder %s961_s12, 3 }
   0x4   : > { %p139_p2 = pnand %p771_p0, %p138_p1 }
   0x5   : > { %s772_s16 = sshll.u32 (!%p139_p2), %s767_s13, 5 }
   0x6   : > { %142 = sbr.rel (%p139_p2) target bundleno = 250 (0xfa), region = 32  ;;  %p163_p3 = scmp.lt.s32.totalorder (!%p139_p2), %s772_s16, 63 }
   0xb   : > { %v938_v0 = vld [vmem:[%s1149_s1] sm:$0x1f]   ;;  %vm350_vm0 = vcmask 1043456   ;;  %vm351_vm1 = vcmask 1044480   ;;  %v963_v1 = vmov 65535   ;;  %s1153_s16 = smov (!%p163_p3, %s772_s16), 63 }
   0xc   : > { %v352_v2 = vsel %vm350_vm0, 4294967295, %v963_v1  ;;  %s773_s17 = sshll.u32 %s1153_s16, 2  ;;  %vm301_vm2 = vcmask 72704   ;;  %v1040_v21 = vld [vmem:[%s1150_s2] ss:$0 sm:$0xff]  ;;  %vm678_vm3 = vcmask 257024  }
   0xd   : > { %v353_v3 = vsel %vm351_vm1, %v352_v2, 0  ;;  %s1003_s20 = scalar_lea.vmem %s1148_s0, %s773_s17  ;;  %s1050_s25 = scalar_lea.vmem %s1151_s3, %s773_s17 }
   0xe   : > { %v355_v4 = vand.u32 %v938_v0, %v353_v3  ;;  %v939_v5 = vld [vmem:[%s1003_s20] sm:$0xff]   ;;  %v941_v7 = vld [vmem:[%s1003_s20 + $0x8] sm:$0xff]   ;;  %v943_v9 = vld [vmem:[%s1003_s20 + $0x10] sm:$0xff]  }
   0xf   : > { %v940_v6 = vld [vmem:[%s1003_s20 + $0x40] sm:$0xff]   ;;  %895 = vmatprep.mubr.msk.bf16.mxu0 %vm301_vm2, %v939_v5  ;;  %v942_v8 = vld [vmem:[%s1003_s20 + $0x48] sm:$0xff]   ;;  %v944_v10 = vld [vmem:[%s1003_s20 + $0x50] sm:$0xff]  }
  0x10   : > { %893 = vmatprep.subr.bf16.mxu0 %v355_v4  ;;  %927 = vmatprep.subr.bf16.mxu1 %v355_v4  ;;  %v945_v11 = vld [vmem:[%s1003_s20 + $0x18] sm:$0xff]   ;;  %v947_v13 = vld [vmem:[%s1003_s20 + $0x20] sm:$0xff]   ;;  %v949_v15 = vld [vmem:[%s1003_s20 + $0x28] sm:$0xff]  }
  0x11   : > { %894 = vmatpush3.bf16.msra.mxu0 %v355_v4  ;;  %928 = vmatpush3.bf16.msra.mxu1 %v355_v4  ;;  %v946_v12 = vld [vmem:[%s1003_s20 + $0x58] sm:$0xff]   ;;  %v948_v14 = vld [vmem:[%s1003_s20 + $0x60] sm:$0xff]   ;;  %v950_v16 = vld [vmem:[%s1003_s20 + $0x68] sm:$0xff]  }
  0x12   : > { %911 = vmatprep.mubr.msk.bf16.mxu1 %vm301_vm2, %v940_v6  ;;  %v951_v17 = vld [vmem:[%s1003_s20 + $0x30] sm:$0xff]   ;;  %v953_v19 = vld [vmem:[%s1003_s20 + $0x38] sm:$0xff]  }
  0x13   : > { %v952_v18 = vld [vmem:[%s1003_s20 + $0x70] sm:$0xff]   ;;  %v954_v20 = vld [vmem:[%s1003_s20 + $0x78] sm:$0xff]  }
  0x14   : > { %896 = vmatmul.mubr.msk.bf16.vlgmr.msra.gmra.mxu0 %vm301_vm2, %v941_v7  ;;  %912 = vmatmul.mubr.msk.bf16.vlgmr.msra.gmra.mxu1 %vm301_vm2, %v942_v8 }
  0x15   : > { %899 = vmatprep.mubr.msk.bf16.mxu0 %vm301_vm2, %v943_v9  ;;  %915 = vmatprep.mubr.msk.bf16.mxu1 %vm301_vm2, %v944_v10 }
  0x1c   : > { %900 = vmatmul.mubr.msk.bf16.gmra.mxu0 %vm301_vm2, %v945_v11  ;;  %916 = vmatmul.mubr.msk.bf16.gmra.mxu1 %vm301_vm2, %v946_v12 }
  0x1d   : > { %903 = vmatprep.mubr.msk.bf16.mxu0 %vm301_vm2, %v947_v13  ;;  %919 = vmatprep.mubr.msk.bf16.mxu1 %vm301_vm2, %v948_v14 }
  0x24   : > { %904 = vmatmul.mubr.msk.bf16.gmra.mxu0 %vm301_vm2, %v949_v15  ;;  %920 = vmatmul.mubr.msk.bf16.gmra.mxu1 %vm301_vm2, %v950_v16 }
  0x25   : > { %907 = vmatprep.mubr.msk.bf16.mxu0 %vm301_vm2, %v951_v17  ;;  %923 = vmatprep.mubr.msk.bf16.mxu1 %vm301_vm2, %v952_v18 }
  0x2c   : > { %908 = vmatmul.mubr.msk.bf16.gmra.mxu0 %vm301_vm2, %v953_v19  ;;  %924 = vmatmul.mubr.msk.bf16.gmra.mxu1 %vm301_vm2, %v954_v20 }
  0xd4   : > { %v897_v22 = vpop.f32.mrf.mxu0  ;;  %v913_v24 = vpop.f32.mrf.mxu1 }
  0xd5   : > { %v400_v23 = vadd.f32 %v897_v22, %v1040_v21  ;;  %v464_v25 = vadd.f32 %v913_v24, %v1040_v21 }
  0xd6   : > { %v391_v26 = vpop.f32.mrf.mxu0  ;;  %v455_v29 = vpop.f32.mrf.mxu1 }
  0xd7   : > { %v520_v27 = vmax.f32 %v400_v23, 0.0  ;;  %v392_v28 = vadd.f32 %v1040_v21, %v391_v26  ;;  %v536_v30 = vmax.f32 %v464_v25, 0.0  ;;  %v456_v31 = vadd.f32 %v1040_v21, %v455_v29 }
  0xd8   : > { %v898_v32 = vpop.f32.mrf.mxu0  ;;  %v914_v36 = vpop.f32.mrf.mxu1 }
  0xd9   : > { %v846_v33 = vpack.c.bf16 %v520_v27, %v520_v27  ;;  %v518_v34 = vmax.f32 %v392_v28, 0.0  ;;  %v403_v35 = vadd.f32 %v898_v32, %v1040_v21  ;;  %v862_v37 = vpack.c.bf16 %v536_v30, %v536_v30 }
  0xda   : > { %v534_v38 = vmax.f32 %v456_v31, 0.0  ;;  %v467_v39 = vadd.f32 %v914_v36, %v1040_v21  ;;  %v394_v40 = vpop.f32.mrf.mxu0  ;;  %v458_v44 = vpop.f32.mrf.mxu1 }
  0xdb   : > { %681 = vst.msk [vmem:[%s1050_s25 + $0x8] sm:$0xf] %vm678_vm3, %v846_v33  ;;  %v844_v41 = vpack.c.bf16 %v518_v34, %v518_v34  ;;  %v521_v42 = vmax.f32 %v403_v35, 0.0  ;;  %v395_v43 = vadd.f32 %v1040_v21, %v394_v40  ;;  %697 = vst.msk [vmem:[%s1050_s25 + $0x48] sm:$0xf] %vm678_vm3, %v862_v37  ;;  %v459_v47 = vadd.f32 %v1040_v21, %v458_v44 }
  0xdc   : > { %v860_v45 = vpack.c.bf16 %v534_v38, %v534_v38  ;;  %v537_v46 = vmax.f32 %v467_v39, 0.0  ;;  %v901_v48 = vpop.f32.mrf.mxu0  ;;  %v917_v52 = vpop.f32.mrf.mxu1 }
  0xdd   : > { %679 = vst.msk [vmem:[%s1050_s25] sm:$0xf] %vm678_vm3, %v844_v41  ;;  %v847_v49 = vpack.c.bf16 %v521_v42, %v521_v42  ;;  %v519_v50 = vmax.f32 %v395_v43, 0.0  ;;  %v416_v51 = vadd.f32 %v901_v48, %v1040_v21  ;;  %v535_v54 = vmax.f32 %v459_v47, 0.0 }
  0xde   : > { %695 = vst.msk [vmem:[%s1050_s25 + $0x40] sm:$0xf] %vm678_vm3, %v860_v45  ;;  %v863_v53 = vpack.c.bf16 %v537_v46, %v537_v46  ;;  %v480_v55 = vadd.f32 %v917_v52, %v1040_v21  ;;  %v407_v56 = vpop.f32.mrf.mxu0  ;;  %v471_v60 = vpop.f32.mrf.mxu1 }
  0xdf   : > { %682 = vst.msk [vmem:[%s1050_s25 + $0xc] sm:$0xf] %vm678_vm3, %v847_v49  ;;  %v845_v57 = vpack.c.bf16 %v519_v50, %v519_v50  ;;  %v524_v58 = vmax.f32 %v416_v51, 0.0  ;;  %v408_v59 = vadd.f32 %v1040_v21, %v407_v56  ;;  %v861_v61 = vpack.c.bf16 %v535_v54, %v535_v54 }
  0xe0   : > { %698 = vst.msk [vmem:[%s1050_s25 + $0x4c] sm:$0xf] %vm678_vm3, %v863_v53  ;;  %v540_v62 = vmax.f32 %v480_v55, 0.0  ;;  %v472_v63 = vadd.f32 %v1040_v21, %v471_v60  ;;  %v902_v0 = vpop.f32.mrf.mxu0  ;;  %v918_v4 = vpop.f32.mrf.mxu1 }
  0xe1   : > { %680 = vst.msk [vmem:[%s1050_s25 + $0x4] sm:$0xf] %vm678_vm3, %v845_v57  ;;  %v850_v1 = vpack.c.bf16 %v524_v58, %v524_v58  ;;  %v522_v2 = vmax.f32 %v408_v59, 0.0  ;;  %v419_v3 = vadd.f32 %v902_v0, %v1040_v21  ;;  %696 = vst.msk [vmem:[%s1050_s25 + $0x44] sm:$0xf] %vm678_vm3, %v861_v61  ;;  %v483_v7 = vadd.f32 %v918_v4, %v1040_v21 }
  0xe2   : > { %v866_v5 = vpack.c.bf16 %v540_v62, %v540_v62  ;;  %v538_v6 = vmax.f32 %v472_v63, 0.0  ;;  %v410_v8 = vpop.f32.mrf.mxu0  ;;  %v474_v12 = vpop.f32.mrf.mxu1 }
  0xe3   : > { %685 = vst.msk [vmem:[%s1050_s25 + $0x18] sm:$0xf] %vm678_vm3, %v850_v1  ;;  %v848_v9 = vpack.c.bf16 %v522_v2, %v522_v2  ;;  %v525_v10 = vmax.f32 %v419_v3, 0.0  ;;  %v411_v11 = vadd.f32 %v1040_v21, %v410_v8  ;;  %v541_v14 = vmax.f32 %v483_v7, 0.0 }
  0xe4   : > { %701 = vst.msk [vmem:[%s1050_s25 + $0x58] sm:$0xf] %vm678_vm3, %v866_v5  ;;  %v864_v13 = vpack.c.bf16 %v538_v6, %v538_v6  ;;  %v475_v15 = vadd.f32 %v1040_v21, %v474_v12  ;;  %v905_v16 = vpop.f32.mrf.mxu0  ;;  %v921_v20 = vpop.f32.mrf.mxu1 }
  0xe5   : > { %683 = vst.msk [vmem:[%s1050_s25 + $0x10] sm:$0xf] %vm678_vm3, %v848_v9  ;;  %v851_v17 = vpack.c.bf16 %v525_v10, %v525_v10  ;;  %v523_v18 = vmax.f32 %v411_v11, 0.0  ;;  %v432_v19 = vadd.f32 %v905_v16, %v1040_v21  ;;  %v867_v22 = vpack.c.bf16 %v541_v14, %v541_v14 }
  0xe6   : > { %699 = vst.msk [vmem:[%s1050_s25 + $0x50] sm:$0xf] %vm678_vm3, %v864_v13  ;;  %v539_v23 = vmax.f32 %v475_v15, 0.0  ;;  %v496_v24 = vadd.f32 %v921_v20, %v1040_v21  ;;  %v423_v25 = vpop.f32.mrf.mxu0  ;;  %v487_v29 = vpop.f32.mrf.mxu1 }
  0xe7   : > { %686 = vst.msk [vmem:[%s1050_s25 + $0x1c] sm:$0xf] %vm678_vm3, %v851_v17  ;;  %v849_v26 = vpack.c.bf16 %v523_v18, %v523_v18  ;;  %v528_v27 = vmax.f32 %v432_v19, 0.0  ;;  %v424_v28 = vadd.f32 %v1040_v21, %v423_v25  ;;  %702 = vst.msk [vmem:[%s1050_s25 + $0x5c] sm:$0xf] %vm678_vm3, %v867_v22  ;;  %v488_v32 = vadd.f32 %v1040_v21, %v487_v29 }
  0xe8   : > { %v865_v30 = vpack.c.bf16 %v539_v23, %v539_v23  ;;  %v544_v31 = vmax.f32 %v496_v24, 0.0  ;;  %v906_v33 = vpop.f32.mrf.mxu0  ;;  %v922_v37 = vpop.f32.mrf.mxu1 }
  0xe9   : > { %684 = vst.msk [vmem:[%s1050_s25 + $0x14] sm:$0xf] %vm678_vm3, %v849_v26  ;;  %v854_v34 = vpack.c.bf16 %v528_v27, %v528_v27  ;;  %v526_v35 = vmax.f32 %v424_v28, 0.0  ;;  %v435_v36 = vadd.f32 %v906_v33, %v1040_v21  ;;  %v542_v39 = vmax.f32 %v488_v32, 0.0 }
  0xea   : > { %700 = vst.msk [vmem:[%s1050_s25 + $0x54] sm:$0xf] %vm678_vm3, %v865_v30  ;;  %v870_v38 = vpack.c.bf16 %v544_v31, %v544_v31  ;;  %v499_v40 = vadd.f32 %v922_v37, %v1040_v21  ;;  %v426_v41 = vpop.f32.mrf.mxu0  ;;  %v490_v45 = vpop.f32.mrf.mxu1 }
  0xeb   : > { %689 = vst.msk [vmem:[%s1050_s25 + $0x28] sm:$0xf] %vm678_vm3, %v854_v34  ;;  %v852_v42 = vpack.c.bf16 %v526_v35, %v526_v35  ;;  %v529_v43 = vmax.f32 %v435_v36, 0.0  ;;  %v427_v44 = vadd.f32 %v1040_v21, %v426_v41  ;;  %v868_v46 = vpack.c.bf16 %v542_v39, %v542_v39 }
  0xec   : > { %705 = vst.msk [vmem:[%s1050_s25 + $0x68] sm:$0xf] %vm678_vm3, %v870_v38  ;;  %v545_v47 = vmax.f32 %v499_v40, 0.0  ;;  %v491_v48 = vadd.f32 %v1040_v21, %v490_v45  ;;  %v909_v49 = vpop.f32.mrf.mxu0  ;;  %v925_v53 = vpop.f32.mrf.mxu1 }
  0xed   : > { %687 = vst.msk [vmem:[%s1050_s25 + $0x20] sm:$0xf] %vm678_vm3, %v852_v42  ;;  %v855_v50 = vpack.c.bf16 %v529_v43, %v529_v43  ;;  %v527_v51 = vmax.f32 %v427_v44, 0.0  ;;  %v448_v52 = vadd.f32 %v909_v49, %v1040_v21  ;;  %703 = vst.msk [vmem:[%s1050_s25 + $0x60] sm:$0xf] %vm678_vm3, %v868_v46  ;;  %v512_v56 = vadd.f32 %v925_v53, %v1040_v21 }
  0xee   : > { %v871_v54 = vpack.c.bf16 %v545_v47, %v545_v47  ;;  %v543_v55 = vmax.f32 %v491_v48, 0.0  ;;  %v439_v57 = vpop.f32.mrf.mxu0  ;;  %v503_v61 = vpop.f32.mrf.mxu1 }
  0xef   : > { %690 = vst.msk [vmem:[%s1050_s25 + $0x2c] sm:$0xf] %vm678_vm3, %v855_v50  ;;  %v853_v58 = vpack.c.bf16 %v527_v51, %v527_v51  ;;  %v532_v59 = vmax.f32 %v448_v52, 0.0  ;;  %v440_v60 = vadd.f32 %v1040_v21, %v439_v57  ;;  %v548_v63 = vmax.f32 %v512_v56, 0.0 }
  0xf0   : > { %706 = vst.msk [vmem:[%s1050_s25 + $0x6c] sm:$0xf] %vm678_vm3, %v871_v54  ;;  %v869_v62 = vpack.c.bf16 %v543_v55, %v543_v55  ;;  %v504_v0 = vadd.f32 %v1040_v21, %v503_v61  ;;  %v910_v1 = vpop.f32.mrf.mxu0  ;;  %v926_v5 = vpop.f32.mrf.mxu1 }
  0xf1   : > { %688 = vst.msk [vmem:[%s1050_s25 + $0x24] sm:$0xf] %vm678_vm3, %v853_v58  ;;  %v858_v2 = vpack.c.bf16 %v532_v59, %v532_v59  ;;  %v530_v3 = vmax.f32 %v440_v60, 0.0  ;;  %v451_v4 = vadd.f32 %v910_v1, %v1040_v21  ;;  %v874_v6 = vpack.c.bf16 %v548_v63, %v548_v63 }
  0xf2   : > { %704 = vst.msk [vmem:[%s1050_s25 + $0x64] sm:$0xf] %vm678_vm3, %v869_v62  ;;  %v546_v7 = vmax.f32 %v504_v0, 0.0  ;;  %v515_v8 = vadd.f32 %v926_v5, %v1040_v21  ;;  %v442_v9 = vpop.f32.mrf.mxu0  ;;  %v506_v13 = vpop.f32.mrf.mxu1 }
  0xf3   : > { %693 = vst.msk [vmem:[%s1050_s25 + $0x38] sm:$0xf] %vm678_vm3, %v858_v2  ;;  %v856_v10 = vpack.c.bf16 %v530_v3, %v530_v3  ;;  %v533_v11 = vmax.f32 %v451_v4, 0.0  ;;  %v443_v12 = vadd.f32 %v1040_v21, %v442_v9  ;;  %709 = vst.msk [vmem:[%s1050_s25 + $0x78] sm:$0xf] %vm678_vm3, %v874_v6  ;;  %v507_v16 = vadd.f32 %v1040_v21, %v506_v13 }
  0xf4   : > { %v872_v14 = vpack.c.bf16 %v546_v7, %v546_v7  ;;  %v549_v15 = vmax.f32 %v515_v8, 0.0 }
  0xf5   : > { %691 = vst.msk [vmem:[%s1050_s25 + $0x30] sm:$0xf] %vm678_vm3, %v856_v10  ;;  %v859_v17 = vpack.c.bf16 %v533_v11, %v533_v11  ;;  %v531_v18 = vmax.f32 %v443_v12, 0.0  ;;  %v547_v20 = vmax.f32 %v507_v16, 0.0 }
  0xf6   : > { %707 = vst.msk [vmem:[%s1050_s25 + $0x70] sm:$0xf] %vm678_vm3, %v872_v14  ;;  %v875_v19 = vpack.c.bf16 %v549_v15, %v549_v15 }
  0xf7   : > { %694 = vst.msk [vmem:[%s1050_s25 + $0x3c] sm:$0xf] %vm678_vm3, %v859_v17  ;;  %v857_v22 = vpack.c.bf16 %v531_v18, %v531_v18  ;;  %v873_v23 = vpack.c.bf16 %v547_v20, %v547_v20 }
  0xf8   : > { %710 = vst.msk [vmem:[%s1050_s25 + $0x7c] sm:$0xf] %vm678_vm3, %v875_v19 }
  0xf9   : > { %692 = vst.msk [vmem:[%s1050_s25 + $0x34] sm:$0xf] %vm678_vm3, %v857_v22  ;;  %708 = vst.msk [vmem:[%s1050_s25 + $0x74] sm:$0xf] %vm678_vm3, %v873_v23 }
  0xfa PF: > { %s13_s12 = sadd.s32 1, %s961_s12  }
  0xfb   : > { %p10_p4 = scmp.ge.s32.totalorder %s13_s12, 4  }
  0xfd   :  { %12 = sbr.rel (!%p10_p4) target bundleno = 1 (0x1), region = 62 }

// kernel: forward.9
= control target key start
LH: loop header
LB: loop body
LE: loop exit
PB: predicated region body
PF: predicated region fallthrough
CT: control target
= control target key end

     0   :  { %v793_v1 = vmov 0.0   ;;  %vm794_vm0 = vmmov 0   ;;  %vm292_vm1 = vcmask 261120   ;;  %vm556_vm2 = vcmask 519168   ;;  %s1022_s1 = inlined_call_operand.vmem [shape: bf16[288,64], index: 1, kind: input, shape index: {}]   ;;  %s1023_s0 = inlined_call_operand.vmem [shape: bf16[104,288], index: 0, kind: input, shape index: {}]   ;;  %s1024_s2 = inlined_call_operand.vmem [shape: f32[1,64], index: 2, kind: input, shape index: {}]   ;;  %s1025_s3 = inlined_call_operand.vmem [shape: bf16[104,64], index: 3, kind: output, shape index: {}]  }
   0x1   :  { %v748_v0 = vld [vmem:[%s1022_s1 + $0x78] sm:$0xff]   ;;  %714 = vmatprep.subr.bf16.mxu1 %v793_v1  ;;  %718 = vmatprep.mubr.msk.bf16.mxu1 %vm794_vm0, %v793_v1  ;;  %v750_v3 = vld [vmem:[%s1022_s1 + $0x70] sm:$0xff]   ;;  %v752_v5 = vld [vmem:[%s1022_s1 + $0x68] sm:$0xff]  }
   0x2   :  { %v749_v2 = vld [vmem:[%s1022_s1 + $0x38] sm:$0xff]   ;;  %647 = vmatprep.subr.bf16.mxu0 %v748_v0  ;;  %v751_v4 = vld [vmem:[%s1022_s1 + $0x30] sm:$0xff]   ;;  %v753_v6 = vld [vmem:[%s1022_s1 + $0x28] sm:$0xff]  }
   0x3   :  { %648 = vmatpush3.bf16.msra.mxu0 %v749_v2  ;;  %v754_v7 = vld [vmem:[%s1022_s1 + $0x60] sm:$0xff]   ;;  %v756_v9 = vld [vmem:[%s1022_s1 + $0x58] sm:$0xff]   ;;  %v762_v10 = vld [vmem:[%s1022_s1 + $0x88] sm:$0xff]  }
   0x4   :  { %649 = vmatprep.subr.bf16.mxu0 %v750_v3  ;;  %v755_v8 = vld [vmem:[%s1022_s1 + $0x20] sm:$0xff]   ;;  %v757_v11 = vld [vmem:[%s1022_s1 + $0x18] sm:$0xff]   ;;  %v758_v12 = vld [vmem:[%s1022_s1 + $0x50] sm:$0xff]   ;;  %715 = vmatpush3.bf16.msra.mxu1 %v762_v10 }
   0x5   :  { %v759_v13 = vld [vmem:[%s1022_s1 + $0x10] sm:$0xff]   ;;  %716 = vmatprep.subr.bf16.mxu1 %v793_v1  ;;  %v765_v14 = vld [vmem:[%s1022_s1 + $0x80] sm:$0xff]   ;;  %v760_v15 = vld [vmem:[%s1022_s1 + $0x48] sm:$0xff]  }
   0x6   :  { %v768_v16 = vld [vmem:[%s1023_s0 + $0x4] ss:$12 sps:$4 sm:$0xff]   ;;  %v769_v17 = vld [vmem:[%s1023_s0 + $0x8] ss:$12 sps:$4 sm:$0xff]   ;;  %v773_v21 = vld [vmem:[%s1023_s0 + $0x20] ss:$12 sps:$4 sm:$0xff]  }
   0x7   :  { %650 = vmatpush3.bf16.msra.mxu0 %v751_v4  ;;  %346 = vmatprep.mubr.bf16.mxu0 %v768_v16  ;;  %v761_v18 = vld [vmem:[%s1022_s1 + $0x8] sm:$0xff]   ;;  %v763_v19 = vld [vmem:[%s1022_s1 + $0x40] sm:$0xff]   ;;  %v781_v27 = vld [vmem:[%s1023_s0 + $0x50] ss:$12 sps:$4 sm:$0xff]  }
   0x8   :  { %651 = vmatprep.subr.bf16.mxu0 %v752_v5  ;;  %717 = vmatpush3.bf16.msra.mxu1 %v765_v14  ;;  %v764_v20 = vld [vmem:[%s1022_s1] sm:$0xff]   ;;  %v770_v23 = vld [vmem:[%s1023_s0 + $0x1c] ss:$12 sps:$4 sm:$0xff]   ;;  %v778_v29 = vld [vmem:[%s1023_s0 + $0x4c] ss:$12 sps:$4 sm:$0xff]  }
   0x9   :  { %v766_v22 = vld [vmem:[%s1023_s0] ss:$12 sps:$4 sm:$0xff]   ;;  %v777_v24 = vld [vmem:[%s1023_s0 + $0x38] ss:$12 sps:$4 sm:$0xff]   ;;  %v776_v28 = vld [vmem:[%s1023_s0 + $0x30] ss:$12 sps:$4 sm:$0xff]  }
   0xa   :  { %v772_v25 = vld [vmem:[%s1023_s0 + $0x18] ss:$12 sps:$4 sm:$0xff]   ;;  %v774_v26 = vld [vmem:[%s1023_s0 + $0x34] ss:$12 sps:$4 sm:$0xff]   ;;  %v786_v35 = vld [vmem:[%s1023_s0 + $0x7c] ss:$12 sps:$4 sm:$0xff]  }
   0xb   :  { %652 = vmatpush3.bf16.msra.mxu0 %v753_v6  ;;  %719 = vmatmul.mubr.msk.bf16.vlgmr.msra.gmra.mxu1 %vm292_vm1, %v769_v17  ;;  %v785_v30 = vld [vmem:[%s1023_s0 + $0x68] ss:$12 sps:$4 sm:$0xff]   ;;  %v782_v32 = vld [vmem:[%s1023_s0 + $0x64] ss:$12 sps:$4 sm:$0xff]   ;;  %v789_v33 = vld [vmem:[%s1023_s0 + $0x80] ss:$12 sps:$4 sm:$0xff]  }
   0xc   :  { %653 = vmatprep.subr.bf16.mxu0 %v754_v7  ;;  %722 = vmatprep.mubr.msk.bf16.mxu1 %vm794_vm0, %v793_v1  ;;  %v780_v31 = vld [vmem:[%s1023_s0 + $0x48] ss:$12 sps:$4 sm:$0xff]   ;;  %v784_v34 = vld [vmem:[%s1023_s0 + $0x60] ss:$12 sps:$4 sm:$0xff]   ;;  %v792_v36 = vld [vmem:[%s1023_s0 + $0x98] ss:$0 sps:$4 sm:$0xff]  }
   0xd   :  { %v39_v37 = vld [vmem:[%s1023_s0 + $0x90] sm:$0xff]  ;;  %v788_v38 = vld [vmem:[%s1023_s0 + $0x78] ss:$12 sps:$4 sm:$0xff]   ;;  %v955_v49 = vld [vmem:[%s1024_s2] ss:$0 sm:$0xff] }
   0xe   :  { %v594_v39 = vcombine.high %v39_v37, %v39_v37  ;;  %v593_v40 = vcombine.low %v39_v37, %v39_v37 }
   0xf   :  { %654 = vmatpush3.bf16.msra.mxu0 %v755_v8 }
  0x10   :  { %655 = vmatprep.subr.bf16.mxu0 %v756_v9 }
  0x13   :  { %656 = vmatpush3.bf16.msra.mxu0 %v757_v11  ;;  %723 = vmatmul.mubr.msk.bf16.gmra.mxu1 %vm292_vm1, %v773_v21 }
  0x14   :  { %657 = vmatprep.subr.bf16.mxu0 %v758_v12  ;;  %726 = vmatprep.mubr.msk.bf16.mxu1 %vm794_vm0, %v793_v1 }
  0x17   :  { %658 = vmatpush3.bf16.msra.mxu0 %v759_v13 }
  0x18   :  { %659 = vmatprep.subr.bf16.mxu0 %v760_v15 }
  0x1b   :  { %660 = vmatpush3.bf16.msra.mxu0 %v761_v18  ;;  %727 = vmatmul.mubr.msk.bf16.gmra.mxu1 %vm292_vm1, %v777_v24 }
  0x1c   :  { %661 = vmatprep.subr.bf16.mxu0 %v763_v19  ;;  %730 = vmatprep.mubr.msk.bf16.mxu1 %vm794_vm0, %v793_v1 }
  0x1f   :  { %662 = vmatpush3.bf16.msra.mxu0 %v764_v20 }
  0x22   :  { %347 = vmatmul.mubr.bf16.vlgmr.msra.gmra.mxu0 %v766_v22 }
  0x23   :  { %354 = vmatprep.mubr.bf16.mxu0 %v770_v23  ;;  %731 = vmatmul.mubr.msk.bf16.gmra.mxu1 %vm292_vm1, %v781_v27 }
  0x24   :  { %734 = vmatprep.mubr.msk.bf16.mxu1 %vm794_vm0, %v793_v1 }
  0x2a   :  { %355 = vmatmul.mubr.bf16.gmra.mxu0 %v772_v25 }
  0x2b   :  { %362 = vmatprep.mubr.bf16.mxu0 %v774_v26  ;;  %735 = vmatmul.mubr.msk.bf16.gmra.mxu1 %vm292_vm1, %v785_v30 }
  0x2c   :  { %738 = vmatprep.mubr.msk.bf16.mxu1 %vm794_vm0, %v793_v1 }
  0x32   :  { %363 = vmatmul.mubr.bf16.gmra.mxu0 %v776_v28 }
  0x33   :  { %370 = vmatprep.mubr.bf16.mxu0 %v778_v29  ;;  %739 = vmatmul.mubr.msk.bf16.gmra.mxu1 %vm292_vm1, %v789_v33 }
  0x34   :  { %742 = vmatprep.mubr.msk.bf16.mxu1 %vm794_vm0, %v793_v1 }
  0x3a   :  { %371 = vmatmul.mubr.bf16.gmra.mxu0 %v780_v31 }
  0x3b   :  { %378 = vmatprep.mubr.bf16.mxu0 %v782_v32  ;;  %743 = vmatmul.mubr.msk.bf16.gmra.mxu1 %vm292_vm1, %v792_v36 }
  0x42   :  { %379 = vmatmul.mubr.bf16.gmra.mxu0 %v784_v34 }
  0x43   :  { %386 = vmatprep.mubr.bf16.mxu0 %v786_v35 }
  0x4a   :  { %387 = vmatmul.mubr.bf16.gmra.mxu0 %v788_v38 }
  0x4b   :  { %394 = vmatprep.mubr.bf16.mxu0 %v594_v39 }
  0x52   :  { %395 = vmatmul.mubr.bf16.gmra.mxu0 %v593_v40 }
  0xcb   :  { %v436_v41 = vpop.f32.mrf.mxu1 }
  0xcd   :  { %v720_v42 = vpop.f32.mrf.mxu1 }
  0xcf   :  { %v439_v43 = vpop.f32.mrf.mxu1 }
  0xd1   :  { %v721_v44 = vpop.f32.mrf.mxu1 }
  0xd3   :  { %v444_v45 = vpop.f32.mrf.mxu1 }
  0xd5   :  { %v724_v46 = vpop.f32.mrf.mxu1 }
  0xd7   :  { %v447_v48 = vpop.f32.mrf.mxu1 }
  0xd9   :  { %v725_v52 = vpop.f32.mrf.mxu1 }
  0xdb   :  { %v452_v55 = vpop.f32.mrf.mxu1 }
  0xdd   :  { %v728_v59 = vpop.f32.mrf.mxu1 }
  0xdf   :  { %v455_v63 = vpop.f32.mrf.mxu1 }
  0xe1   :  { %v729_v4 = vpop.f32.mrf.mxu1 }
  0xe2   :  { %v663_v47 = vpop.f32.mrf.mxu0 }
  0xe3   :  { %v460_v8 = vpop.f32.mrf.mxu1 }
  0xe4   :  { %v664_v50 = vpop.f32.mrf.mxu0 }
  0xe5   :  { %v665_v51 = vadd.f32 %v664_v50, %v663_v47  ;;  %v732_v13 = vpop.f32.mrf.mxu1 }
  0xe6   :  { %v666_v53 = vpop.f32.mrf.mxu0 }
  0xe7   :  { %v349_v54 = vadd.f32 %v665_v51, %v955_v49  ;;  %v463_v17 = vpop.f32.mrf.mxu1 }
  0xe8   :  { %v667_v56 = vpop.f32.mrf.mxu0 }
  0xe9   :  { %v437_v57 = vadd.f32 %v436_v41, %v349_v54  ;;  %v668_v58 = vadd.f32 %v667_v56, %v666_v53  ;;  %v733_v22 = vpop.f32.mrf.mxu1 }
  0xea   :  { %v669_v60 = vpop.f32.mrf.mxu0 }
  0xeb   :  { %v490_v61 = vmax.f32 %v437_v57, 0.0  ;;  %v352_v62 = vadd.f32 %v668_v58, %v955_v49  ;;  %v468_v26 = vpop.f32.mrf.mxu1 }
  0xec   :  { %v670_v0 = vpop.f32.mrf.mxu0 }
  0xed   :  { %v634_v1 = vpack.c.bf16 %v490_v61, %v490_v61  ;;  %v440_v2 = vadd.f32 %v439_v43, %v352_v62  ;;  %v671_v3 = vadd.f32 %v670_v0, %v669_v60  ;;  %v736_v31 = vpop.f32.mrf.mxu1 }
  0xee   :  { %v672_v5 = vpop.f32.mrf.mxu0 }
  0xef   :  { %557 = vst.msk [vmem:[%s1025_s3] sm:$0xf] %vm556_vm2, %v634_v1  ;;  %v491_v6 = vmax.f32 %v440_v2, 0.0  ;;  %v357_v7 = vadd.f32 %v671_v3, %v955_v49  ;;  %v471_v35 = vpop.f32.mrf.mxu1 }
  0xf0   :  { %v673_v9 = vpop.f32.mrf.mxu0 }
  0xf1   :  { %v635_v10 = vpack.c.bf16 %v491_v6, %v491_v6  ;;  %v445_v11 = vadd.f32 %v444_v45, %v357_v7  ;;  %v674_v12 = vadd.f32 %v673_v9, %v672_v5  ;;  %v737_v40 = vpop.f32.mrf.mxu1 }
  0xf2   :  { %v675_v14 = vpop.f32.mrf.mxu0 }
  0xf3   :  { %558 = vst.msk [vmem:[%s1025_s3 + $0x4] sm:$0xf] %vm556_vm2, %v635_v10  ;;  %v492_v15 = vmax.f32 %v445_v11, 0.0  ;;  %v360_v16 = vadd.f32 %v674_v12, %v955_v49  ;;  %v476_v44 = vpop.f32.mrf.mxu1 }
  0xf4   :  { %v676_v18 = vpop.f32.mrf.mxu0 }
  0xf5   :  { %v636_v19 = vpack.c.bf16 %v492_v15, %v492_v15  ;;  %v448_v20 = vadd.f32 %v447_v48, %v360_v16  ;;  %v677_v21 = vadd.f32 %v676_v18, %v675_v14  ;;  %v740_v50 = vpop.f32.mrf.mxu1 }
  0xf6   :  { %v678_v23 = vpop.f32.mrf.mxu0 }
  0xf7   :  { %559 = vst.msk [vmem:[%s1025_s3 + $0x8] sm:$0xf] %vm556_vm2, %v636_v19  ;;  %v493_v24 = vmax.f32 %v448_v20, 0.0  ;;  %v365_v25 = vadd.f32 %v677_v21, %v955_v49  ;;  %v479_v54 = vpop.f32.mrf.mxu1 }
  0xf8   :  { %v679_v27 = vpop.f32.mrf.mxu0 }
  0xf9   :  { %v637_v28 = vpack.c.bf16 %v493_v24, %v493_v24  ;;  %v453_v29 = vadd.f32 %v452_v55, %v365_v25  ;;  %v680_v30 = vadd.f32 %v679_v27, %v678_v23  ;;  %v741_v59 = vpop.f32.mrf.mxu1 }
  0xfa   :  { %v681_v32 = vpop.f32.mrf.mxu0 }
  0xfb   :  { %560 = vst.msk [vmem:[%s1025_s3 + $0xc] sm:$0xf] %vm556_vm2, %v637_v28  ;;  %v494_v33 = vmax.f32 %v453_v29, 0.0  ;;  %v368_v34 = vadd.f32 %v680_v30, %v955_v49 }
  0xfc   :  { %v682_v36 = vpop.f32.mrf.mxu0 }
  0xfd   :  { %v638_v37 = vpack.c.bf16 %v494_v33, %v494_v33  ;;  %v456_v38 = vadd.f32 %v455_v63, %v368_v34  ;;  %v683_v39 = vadd.f32 %v682_v36, %v681_v32  ;;  %v484_v63 = vpop.f32.mrf.mxu1 }
  0xfe   :  { %v684_v41 = vpop.f32.mrf.mxu0 }
  0xff   :  { %561 = vst.msk [vmem:[%s1025_s3 + $0x10] sm:$0xf] %vm556_vm2, %v638_v37  ;;  %v495_v42 = vmax.f32 %v456_v38, 0.0  ;;  %v373_v43 = vadd.f32 %v683_v39, %v955_v49  ;;  %v744_v4 = vpop.f32.mrf.mxu1 }
 0x100   :  { %v685_v45 = vpop.f32.mrf.mxu0 }
 0x101   :  { %v639_v46 = vpack.c.bf16 %v495_v42, %v495_v42  ;;  %v461_v47 = vadd.f32 %v460_v8, %v373_v43  ;;  %v686_v48 = vadd.f32 %v685_v45, %v684_v41  ;;  %v487_v8 = vpop.f32.mrf.mxu1 }
 0x102   :  { %v687_v51 = vpop.f32.mrf.mxu0 }
 0x103   :  { %562 = vst.msk [vmem:[%s1025_s3 + $0x14] sm:$0xf] %vm556_vm2, %v639_v46  ;;  %v496_v52 = vmax.f32 %v461_v47, 0.0  ;;  %v376_v53 = vadd.f32 %v686_v48, %v955_v49  ;;  %v745_v13 = vpop.f32.mrf.mxu1 }
 0x104   :  { %v688_v55 = vpop.f32.mrf.mxu0 }
 0x105   :  { %v640_v56 = vpack.c.bf16 %v496_v52, %v496_v52  ;;  %v464_v57 = vadd.f32 %v463_v17, %v376_v53  ;;  %v689_v58 = vadd.f32 %v688_v55, %v687_v51 }
 0x106   :  { %v690_v60 = vpop.f32.mrf.mxu0 }
 0x107   :  { %563 = vst.msk [vmem:[%s1025_s3 + $0x18] sm:$0xf] %vm556_vm2, %v640_v56  ;;  %v497_v61 = vmax.f32 %v464_v57, 0.0  ;;  %v381_v62 = vadd.f32 %v689_v58, %v955_v49 }
 0x108   :  { %v691_v0 = vpop.f32.mrf.mxu0 }
 0x109   :  { %v641_v1 = vpack.c.bf16 %v497_v61, %v497_v61  ;;  %v469_v2 = vadd.f32 %v468_v26, %v381_v62  ;;  %v692_v3 = vadd.f32 %v691_v0, %v690_v60 }
 0x10a   :  { %v693_v5 = vpop.f32.mrf.mxu0 }
 0x10b   :  { %564 = vst.msk [vmem:[%s1025_s3 + $0x1c] sm:$0xf] %vm556_vm2, %v641_v1  ;;  %v498_v6 = vmax.f32 %v469_v2, 0.0  ;;  %v384_v7 = vadd.f32 %v692_v3, %v955_v49 }
 0x10c   :  { %v694_v9 = vpop.f32.mrf.mxu0 }
 0x10d   :  { %v642_v10 = vpack.c.bf16 %v498_v6, %v498_v6  ;;  %v472_v11 = vadd.f32 %v471_v35, %v384_v7  ;;  %v695_v12 = vadd.f32 %v694_v9, %v693_v5 }
 0x10e   :  { %v696_v14 = vpop.f32.mrf.mxu0 }
 0x10f   :  { %565 = vst.msk [vmem:[%s1025_s3 + $0x20] sm:$0xf] %vm556_vm2, %v642_v10  ;;  %v499_v15 = vmax.f32 %v472_v11, 0.0  ;;  %v389_v16 = vadd.f32 %v695_v12, %v955_v49 }
 0x110   :  { %v697_v17 = vpop.f32.mrf.mxu0 }
 0x111   :  { %v643_v18 = vpack.c.bf16 %v499_v15, %v499_v15  ;;  %v477_v19 = vadd.f32 %v476_v44, %v389_v16  ;;  %v698_v20 = vadd.f32 %v697_v17, %v696_v14 }
 0x112   :  { %v699_v21 = vpop.f32.mrf.mxu0 }
 0x113   :  { %566 = vst.msk [vmem:[%s1025_s3 + $0x24] sm:$0xf] %vm556_vm2, %v643_v18  ;;  %v500_v22 = vmax.f32 %v477_v19, 0.0  ;;  %v392_v23 = vadd.f32 %v698_v20, %v955_v49 }
 0x114   :  { %v700_v24 = vpop.f32.mrf.mxu0 }
 0x115   :  { %v644_v25 = vpack.c.bf16 %v500_v22, %v500_v22  ;;  %v480_v26 = vadd.f32 %v479_v54, %v392_v23  ;;  %v701_v27 = vadd.f32 %v700_v24, %v699_v21 }
 0x116   :  { %v702_v28 = vpop.f32.mrf.mxu0 }
 0x117   :  { %567 = vst.msk [vmem:[%s1025_s3 + $0x28] sm:$0xf] %vm556_vm2, %v644_v25  ;;  %v501_v29 = vmax.f32 %v480_v26, 0.0  ;;  %v397_v30 = vadd.f32 %v701_v27, %v955_v49 }
 0x118   :  { %v703_v31 = vpop.f32.mrf.mxu0 }
 0x119   :  { %v645_v32 = vpack.c.bf16 %v501_v29, %v501_v29  ;;  %v485_v33 = vadd.f32 %v484_v63, %v397_v30 }
 0x11b   :  { %568 = vst.msk [vmem:[%s1025_s3 + $0x2c] sm:$0xf] %vm556_vm2, %v645_v32  ;;  %v502_v34 = vmax.f32 %v485_v33, 0.0 }
 0x11d   :  { %v646_v35 = vpack.c.bf16 %v502_v34, %v502_v34 }
 0x11f   :  { %569 = vst.msk [vmem:[%s1025_s3 + $0x30] sm:$0xf] %vm556_vm2, %v646_v35 }

// kernel: forward.10
= control target key start
LH: loop header
LB: loop body
LE: loop exit
PB: predicated region body
PF: predicated region fallthrough
CT: control target
= control target key end

     0   :  { %vm372_vm0 = vcmask 523264   ;;  %s913_s1 = inlined_call_operand.vmem [shape: bf16[576,128], index: 1, kind: input, shape index: {}]   ;;  %s914_s0 = inlined_call_operand.vmem [shape: bf16[32,576], index: 0, kind: input, shape index: {}]   ;;  %s915_s2 = inlined_call_operand.vmem [shape: f32[1,128], index: 2, kind: input, shape index: {}]   ;;  %s916_s3 = inlined_call_operand.vmem [shape: bf16[32,128], index: 3, kind: output, shape index: {}]  }
   0x1   :  { %v696_v0 = vld [vmem:[%s913_s1 + $0x78] sm:$0xff]   ;;  %v700_v4 = vld [vmem:[%s913_s1 + $0x70] sm:$0xff]   ;;  %v704_v8 = vld [vmem:[%s913_s1 + $0x68] sm:$0xff]  }
   0x2   :  { %v697_v1 = vld [vmem:[%s913_s1 + $0xf8] sm:$0xff]   ;;  %622 = vmatprep.subr.bf16.mxu0 %v696_v0  ;;  %v701_v5 = vld [vmem:[%s913_s1 + $0xf0] sm:$0xff]   ;;  %v705_v9 = vld [vmem:[%s913_s1 + $0xe8] sm:$0xff]  }
   0x3   :  { %v698_v2 = vld [vmem:[%s913_s1 + $0x38] sm:$0xff]   ;;  %650 = vmatprep.subr.bf16.mxu1 %v697_v1  ;;  %v702_v6 = vld [vmem:[%s913_s1 + $0x30] sm:$0xff]   ;;  %v706_v10 = vld [vmem:[%s913_s1 + $0x28] sm:$0xff]  }
   0x4   :  { %v699_v3 = vld [vmem:[%s913_s1 + $0xb8] sm:$0xff]   ;;  %623 = vmatpush3.bf16.msra.mxu0 %v698_v2  ;;  %v703_v7 = vld [vmem:[%s913_s1 + $0xb0] sm:$0xff]   ;;  %v707_v11 = vld [vmem:[%s913_s1 + $0xa8] sm:$0xff]  }
   0x5   :  { %651 = vmatpush3.bf16.msra.mxu1 %v699_v3  ;;  %624 = vmatprep.subr.bf16.mxu0 %v700_v4  ;;  %v708_v12 = vld [vmem:[%s913_s1 + $0x60] sm:$0xff]   ;;  %v712_v16 = vld [vmem:[%s913_s1 + $0x58] sm:$0xff]   ;;  %v716_v20 = vld [vmem:[%s913_s1 + $0x50] sm:$0xff]  }
   0x6   :  { %652 = vmatprep.subr.bf16.mxu1 %v701_v5  ;;  %v709_v13 = vld [vmem:[%s913_s1 + $0xe0] sm:$0xff]   ;;  %v713_v17 = vld [vmem:[%s913_s1 + $0xd8] sm:$0xff]   ;;  %v717_v21 = vld [vmem:[%s913_s1 + $0xd0] sm:$0xff]  }
   0x7   :  { %v710_v14 = vld [vmem:[%s913_s1 + $0x20] sm:$0xff]   ;;  %v714_v18 = vld [vmem:[%s913_s1 + $0x18] sm:$0xff]   ;;  %v718_v22 = vld [vmem:[%s913_s1 + $0x10] sm:$0xff]  }
   0x8   :  { %625 = vmatpush3.bf16.msra.mxu0 %v702_v6  ;;  %v711_v15 = vld [vmem:[%s913_s1 + $0xa0] sm:$0xff]   ;;  %v715_v19 = vld [vmem:[%s913_s1 + $0x98] sm:$0xff]   ;;  %v719_v23 = vld [vmem:[%s913_s1 + $0x90] sm:$0xff]  }
   0x9   :  { %653 = vmatpush3.bf16.msra.mxu1 %v703_v7  ;;  %626 = vmatprep.subr.bf16.mxu0 %v704_v8  ;;  %v720_v24 = vld [vmem:[%s913_s1 + $0x48] sm:$0xff]   ;;  %v724_v28 = vld [vmem:[%s913_s1 + $0x40] sm:$0xff]   ;;  %v734_v36 = vld [vmem:[%s913_s1 + $0x118] sm:$0xff]  }
   0xa   :  { %654 = vmatprep.subr.bf16.mxu1 %v705_v9  ;;  %v721_v25 = vld [vmem:[%s913_s1 + $0xc8] sm:$0xff]   ;;  %v725_v29 = vld [vmem:[%s913_s1 + $0xc0] sm:$0xff]   ;;  %v735_v37 = vld [vmem:[%s913_s1 + $0x110] sm:$0xff]  }
   0xb   :  { %v722_v26 = vld [vmem:[%s913_s1 + $0x8] sm:$0xff]   ;;  %v726_v30 = vld [vmem:[%s913_s1] sm:$0xff]  }
   0xc   :  { %627 = vmatpush3.bf16.msra.mxu0 %v706_v10  ;;  %v723_v27 = vld [vmem:[%s913_s1 + $0x88] sm:$0xff]   ;;  %v727_v31 = vld [vmem:[%s913_s1 + $0x80] sm:$0xff]  }
   0xd   :  { %655 = vmatpush3.bf16.msra.mxu1 %v707_v11  ;;  %628 = vmatprep.subr.bf16.mxu0 %v708_v12  ;;  %v728_v32 = vld [vmem:[%s914_s0] ss:$20 sps:$4 sm:$0xff]   ;;  %v730_v33 = vld [vmem:[%s914_s0 + $0x4] ss:$20 sps:$4 sm:$0xff]   ;;  %v731_v34 = vld [vmem:[%s914_s0 + $0x8] ss:$20 sps:$4 sm:$0xff]  }
   0xe   :  { %656 = vmatprep.subr.bf16.mxu1 %v709_v13  ;;  %v733_v35 = vld [vmem:[%s914_s0 + $0xc] ss:$20 sps:$4 sm:$0xff]   ;;  %411 = vmatprep.mubr.bf16.mxu0 %v730_v33  ;;  %v738_v39 = vld [vmem:[%s914_s0 + $0x34] ss:$20 sps:$4 sm:$0xff]   ;;  %v741_v42 = vld [vmem:[%s914_s0 + $0x30] ss:$20 sps:$4 sm:$0xff]  }
   0xf   :  { %460 = vmatprep.mubr.bf16.mxu1 %v733_v35  ;;  %v736_v38 = vld [vmem:[%s914_s0 + $0x2c] ss:$20 sps:$4 sm:$0xff]   ;;  %v740_v40 = vld [vmem:[%s914_s0 + $0x28] ss:$20 sps:$4 sm:$0xff]   ;;  %v744_v43 = vld [vmem:[%s914_s0 + $0x10] ss:$20 sps:$4 sm:$0xff]  }
  0x10   :  { %629 = vmatpush3.bf16.msra.mxu0 %v710_v14  ;;  %v742_v41 = vld [vmem:[%s913_s1 + $0x108] sm:$0xff]   ;;  %v743_v44 = vld [vmem:[%s913_s1 + $0x100] sm:$0xff]  }
  0x11   :  { %657 = vmatpush3.bf16.msra.mxu1 %v711_v15  ;;  %630 = vmatprep.subr.bf16.mxu0 %v712_v16  ;;  %v745_v45 = vld [vmem:[%s914_s0 + $0x38] ss:$20 sps:$4 sm:$0xff]   ;;  %v554_v59 = vld [vmem:[%s915_s2] ss:$0 sm:$0xff] }
  0x12   :  { %658 = vmatprep.subr.bf16.mxu1 %v713_v17 }
  0x14   :  { %631 = vmatpush3.bf16.msra.mxu0 %v714_v18 }
  0x15   :  { %659 = vmatpush3.bf16.msra.mxu1 %v715_v19  ;;  %632 = vmatprep.subr.bf16.mxu0 %v716_v20 }
  0x16   :  { %660 = vmatprep.subr.bf16.mxu1 %v717_v21 }
  0x18   :  { %633 = vmatpush3.bf16.msra.mxu0 %v718_v22 }
  0x19   :  { %661 = vmatpush3.bf16.msra.mxu1 %v719_v23  ;;  %634 = vmatprep.subr.bf16.mxu0 %v720_v24 }
  0x1a   :  { %662 = vmatprep.subr.bf16.mxu1 %v721_v25 }
  0x1c   :  { %635 = vmatpush3.bf16.msra.mxu0 %v722_v26 }
  0x1d   :  { %663 = vmatpush3.bf16.msra.mxu1 %v723_v27  ;;  %636 = vmatprep.subr.bf16.mxu0 %v724_v28 }
  0x1e   :  { %664 = vmatprep.subr.bf16.mxu1 %v725_v29 }
  0x20   :  { %637 = vmatpush3.bf16.msra.mxu0 %v726_v30 }
  0x21   :  { %665 = vmatpush3.bf16.msra.mxu1 %v727_v31  ;;  %684 = vmatprep.subr.bf16.mxu0 %v734_v36 }
  0x23   :  { %412 = vmatmul.mubr.bf16.vlgmr.msra.gmra.mxu0 %v728_v32 }
  0x24   :  { %461 = vmatmul.mubr.bf16.vlgmr.msra.gmra.mxu1 %v731_v34  ;;  %685 = vmatpush3.bf16.msra.mxu0 %v734_v36 }
  0x25   :  { %686 = vmatprep.subr.bf16.mxu0 %v735_v37  ;;  %419 = vmatprep.mubr.bf16.mxu0 %v736_v38 }
  0x26   :  { %468 = vmatprep.mubr.bf16.mxu1 %v738_v39 }
  0x28   :  { %687 = vmatpush3.bf16.msra.mxu0 %v735_v37 }
  0x29   :  { %688 = vmatprep.subr.bf16.mxu0 %v742_v41 }
  0x2b   :  { %420 = vmatmul.mubr.bf16.gmra.mxu0 %v740_v40 }
  0x2c   :  { %469 = vmatmul.mubr.bf16.gmra.mxu1 %v741_v42  ;;  %692 = vmatprep.mubr.msk.bf16.mxu0 %vm372_vm0, %v744_v43 }
  0x2d   :  { %689 = vmatpush3.bf16.msra.mxu0 %v742_v41 }
  0x2e   :  { %690 = vmatprep.subr.bf16.mxu0 %v743_v44 }
  0x31   :  { %691 = vmatpush3.bf16.msra.mxu0 %v743_v44 }
  0x34   :  { %693 = vmatmul.mubr.msk.bf16.vlgmr.msra.gmra.mxu0 %vm372_vm0, %v745_v45 }
  0xe3   :  { %v638_v46 = vpop.f32.mrf.mxu0 }
  0xe4   :  { %v666_v47 = vpop.f32.mrf.mxu1 }
  0xe5   :  { %v639_v48 = vpop.f32.mrf.mxu0 }
  0xe6   :  { %v667_v49 = vpop.f32.mrf.mxu1  ;;  %v640_v60 = vadd.f32 %v639_v48, %v638_v46 }
  0xe7   :  { %v641_v50 = vpop.f32.mrf.mxu0  ;;  %v668_v6 = vadd.f32 %v667_v49, %v666_v47 }
  0xe8   :  { %v669_v51 = vpop.f32.mrf.mxu1  ;;  %v414_v5 = vadd.f32 %v640_v60, %v554_v59 }
  0xe9   :  { %v642_v52 = vpop.f32.mrf.mxu0 }
  0xea   :  { %v670_v53 = vpop.f32.mrf.mxu1  ;;  %v643_v1 = vadd.f32 %v642_v52, %v641_v50  ;;  %v463_v16 = vadd.f32 %v668_v6, %v414_v5 }
  0xeb   :  { %v644_v54 = vpop.f32.mrf.mxu0  ;;  %v671_v14 = vadd.f32 %v670_v53, %v669_v51 }
  0xec   :  { %v672_v55 = vpop.f32.mrf.mxu1  ;;  %v417_v11 = vadd.f32 %v643_v1, %v554_v59 }
  0xed   :  { %v645_v56 = vpop.f32.mrf.mxu0 }
  0xee   :  { %v646_v57 = vadd.f32 %v645_v56, %v644_v54  ;;  %v673_v58 = vpop.f32.mrf.mxu1  ;;  %v466_v20 = vadd.f32 %v671_v14, %v417_v11 }
  0xef   :  { %v674_v61 = vadd.f32 %v673_v58, %v672_v55  ;;  %v647_v62 = vpop.f32.mrf.mxu0 }
  0xf0   :  { %v422_v63 = vadd.f32 %v646_v57, %v554_v59  ;;  %v675_v0 = vpop.f32.mrf.mxu1 }
  0xf1   :  { %v648_v2 = vpop.f32.mrf.mxu0 }
  0xf2   :  { %v649_v3 = vadd.f32 %v648_v2, %v647_v62  ;;  %v676_v4 = vpop.f32.mrf.mxu1  ;;  %v471_v7 = vadd.f32 %v674_v61, %v422_v63 }
  0xf3   :  { %v677_v9 = vadd.f32 %v676_v4, %v675_v0 }
  0xf4   :  { %v425_v8 = vadd.f32 %v649_v3, %v554_v59  ;;  %v694_v10 = vpop.f32.mrf.mxu0 }
  0xf5   :  { %v520_v15 = vadd.f32 %v694_v10, %v471_v7 }
  0xf6   :  { %v511_v12 = vpop.f32.mrf.mxu0  ;;  %v474_v13 = vadd.f32 %v677_v9, %v425_v8 }
  0xf7   :  { %v512_v18 = vadd.f32 %v511_v12, %v463_v16  ;;  %v528_v22 = vmax.f32 %v520_v15, 0.0 }
  0xf8   :  { %v695_v17 = vpop.f32.mrf.mxu0 }
  0xf9   :  { %v523_v19 = vadd.f32 %v695_v17, %v474_v13  ;;  %v526_v25 = vmax.f32 %v512_v18, 0.0 }
  0xfa   :  { %v514_v21 = vpop.f32.mrf.mxu0 }
  0xfb   :  { %v529_v23 = vmax.f32 %v523_v19, 0.0  ;;  %v515_v24 = vadd.f32 %v514_v21, %v466_v20 }
  0xfd   :  { %v619_v26 = vpack.c.bf16 %v529_v23, %v528_v22  ;;  %v527_v27 = vmax.f32 %v515_v24, 0.0 }
  0xff   :  { %621 = vst [vmem:[%s916_s3 + $0x8] sm:$0xff] %v619_v26   ;;  %v614_v28 = vpack.c.bf16 %v527_v27, %v526_v25 }
 0x101   :  { %615 = vst [vmem:[%s916_s3] sm:$0xff] %v614_v28  }

// kernel: forward.12
= control target key start
LH: loop header
LB: loop body
LE: loop exit
PB: predicated region body
PF: predicated region fallthrough
CT: control target
= control target key end

     0   :  { %s1043_s1 = inlined_call_operand.vmem [shape: bf16[512,256], index: 1, kind: input, shape index: {}]   ;;  %s1044_s0 = inlined_call_operand.vmem [shape: bf16[32,512], index: 0, kind: input, shape index: {}]   ;;  %s1045_s2 = inlined_call_operand.vmem [shape: f32[1,256], index: 2, kind: input, shape index: {}]   ;;  %s1046_s3 = inlined_call_operand.vmem [shape: bf16[32,256], index: 3, kind: output, shape index: {}]  }
   0x1   :  { %v684_v0 = vld [vmem:[%s1043_s1 + $0x74] ss:$8 sps:$4 sm:$0xff]   ;;  %v688_v2 = vld [vmem:[%s1043_s1 + $0x70] ss:$8 sps:$4 sm:$0xff]   ;;  %v690_v4 = vld [vmem:[%s1043_s1 + $0x64] ss:$8 sps:$4 sm:$0xff]  }
   0x2   :  { %v686_v1 = vld [vmem:[%s1043_s1 + $0x174] ss:$8 sps:$4 sm:$0xff]   ;;  %458 = vmatprep.subr.bf16.mxu0 %v684_v0  ;;  %v689_v3 = vld [vmem:[%s1043_s1 + $0x170] ss:$8 sps:$4 sm:$0xff]   ;;  %v692_v5 = vld [vmem:[%s1043_s1 + $0x164] ss:$8 sps:$4 sm:$0xff]  }
   0x3   :  { %511 = vmatprep.subr.bf16.mxu1 %v686_v1  ;;  %459 = vmatpush1.bf16.msra.mxu0 %v688_v2  ;;  %v694_v6 = vld [vmem:[%s1043_s1 + $0x60] ss:$8 sps:$4 sm:$0xff]   ;;  %v696_v8 = vld [vmem:[%s1043_s1 + $0x54] ss:$8 sps:$4 sm:$0xff]   ;;  %v700_v10 = vld [vmem:[%s1043_s1 + $0x50] ss:$8 sps:$4 sm:$0xff]  }
   0x4   :  { %512 = vmatpush1.bf16.msra.mxu1 %v689_v3  ;;  %460 = vmatprep.subr.bf16.mxu0 %v690_v4  ;;  %v695_v7 = vld [vmem:[%s1043_s1 + $0x160] ss:$8 sps:$4 sm:$0xff]   ;;  %v698_v9 = vld [vmem:[%s1043_s1 + $0x154] ss:$8 sps:$4 sm:$0xff]   ;;  %v701_v11 = vld [vmem:[%s1043_s1 + $0x150] ss:$8 sps:$4 sm:$0xff]  }
   0x5   :  { %513 = vmatprep.subr.bf16.mxu1 %v692_v5  ;;  %v702_v12 = vld [vmem:[%s1043_s1 + $0x44] ss:$8 sps:$4 sm:$0xff]   ;;  %v706_v14 = vld [vmem:[%s1043_s1 + $0x40] ss:$8 sps:$4 sm:$0xff]   ;;  %v708_v16 = vld [vmem:[%s1043_s1 + $0x34] ss:$8 sps:$4 sm:$0xff]  }
   0x6   :  { %v704_v13 = vld [vmem:[%s1043_s1 + $0x144] ss:$8 sps:$4 sm:$0xff]   ;;  %v707_v15 = vld [vmem:[%s1043_s1 + $0x140] ss:$8 sps:$4 sm:$0xff]   ;;  %v710_v17 = vld [vmem:[%s1043_s1 + $0x134] ss:$8 sps:$4 sm:$0xff]  }
   0x7   :  { %461 = vmatpush1.bf16.msra.mxu0 %v694_v6  ;;  %v712_v18 = vld [vmem:[%s1043_s1 + $0x30] ss:$8 sps:$4 sm:$0xff]   ;;  %v714_v20 = vld [vmem:[%s1043_s1 + $0x24] ss:$8 sps:$4 sm:$0xff]   ;;  %v718_v22 = vld [vmem:[%s1043_s1 + $0x20] ss:$8 sps:$4 sm:$0xff]  }
   0x8   :  { %514 = vmatpush1.bf16.msra.mxu1 %v695_v7  ;;  %462 = vmatprep.subr.bf16.mxu0 %v696_v8  ;;  %v713_v19 = vld [vmem:[%s1043_s1 + $0x130] ss:$8 sps:$4 sm:$0xff]   ;;  %v716_v21 = vld [vmem:[%s1043_s1 + $0x124] ss:$8 sps:$4 sm:$0xff]   ;;  %v719_v23 = vld [vmem:[%s1043_s1 + $0x120] ss:$8 sps:$4 sm:$0xff]   ;;  %v88_v8 = vlaneseq }
   0x9   :  { %515 = vmatprep.subr.bf16.mxu1 %v698_v9  ;;  %v720_v24 = vld [vmem:[%s1043_s1 + $0x14] ss:$8 sps:$4 sm:$0xff]   ;;  %v724_v26 = vld [vmem:[%s1043_s1 + $0x10] ss:$8 sps:$4 sm:$0xff]   ;;  %v726_v28 = vld [vmem:[%s1043_s1 + $0x4] ss:$8 sps:$4 sm:$0xff]  }
   0xa   :  { %v722_v25 = vld [vmem:[%s1043_s1 + $0x114] ss:$8 sps:$4 sm:$0xff]   ;;  %v725_v27 = vld [vmem:[%s1043_s1 + $0x110] ss:$8 sps:$4 sm:$0xff]   ;;  %v728_v29 = vld [vmem:[%s1043_s1 + $0x104] ss:$8 sps:$4 sm:$0xff]  }
   0xb   :  { %463 = vmatpush1.bf16.msra.mxu0 %v700_v10  ;;  %v730_v30 = vld [vmem:[%s1043_s1] ss:$8 sps:$4 sm:$0xff]   ;;  %v732_v32 = vld [vmem:[%s1043_s1 + $0xf4] ss:$8 sps:$4 sm:$0xff]   ;;  %v736_v34 = vld [vmem:[%s1043_s1 + $0xf0] ss:$8 sps:$4 sm:$0xff]  }
   0xc   :  { %516 = vmatpush1.bf16.msra.mxu1 %v701_v11  ;;  %464 = vmatprep.subr.bf16.mxu0 %v702_v12  ;;  %v731_v31 = vld [vmem:[%s1043_s1 + $0x100] ss:$8 sps:$4 sm:$0xff]   ;;  %v734_v33 = vld [vmem:[%s1043_s1 + $0x1f4] ss:$8 sps:$4 sm:$0xff]   ;;  %v737_v35 = vld [vmem:[%s1043_s1 + $0x1f0] ss:$8 sps:$4 sm:$0xff]  }
   0xd   :  { %517 = vmatprep.subr.bf16.mxu1 %v704_v13  ;;  %v738_v36 = vld [vmem:[%s1043_s1 + $0xe4] ss:$8 sps:$4 sm:$0xff]   ;;  %v742_v38 = vld [vmem:[%s1043_s1 + $0xe0] ss:$8 sps:$4 sm:$0xff]   ;;  %v744_v40 = vld [vmem:[%s1043_s1 + $0xd4] ss:$8 sps:$4 sm:$0xff]  }
   0xe   :  { %v740_v37 = vld [vmem:[%s1043_s1 + $0x1e4] ss:$8 sps:$4 sm:$0xff]   ;;  %v743_v39 = vld [vmem:[%s1043_s1 + $0x1e0] ss:$8 sps:$4 sm:$0xff]   ;;  %v746_v41 = vld [vmem:[%s1043_s1 + $0x1d4] ss:$8 sps:$4 sm:$0xff]  }
   0xf   :  { %465 = vmatpush1.bf16.msra.mxu0 %v706_v14  ;;  %v748_v42 = vld [vmem:[%s1043_s1 + $0xd0] ss:$8 sps:$4 sm:$0xff]   ;;  %v750_v44 = vld [vmem:[%s1043_s1 + $0xc4] ss:$8 sps:$4 sm:$0xff]   ;;  %v754_v46 = vld [vmem:[%s1043_s1 + $0xc0] ss:$8 sps:$4 sm:$0xff]  }
  0x10   :  { %518 = vmatpush1.bf16.msra.mxu1 %v707_v15  ;;  %466 = vmatprep.subr.bf16.mxu0 %v708_v16  ;;  %v749_v43 = vld [vmem:[%s1043_s1 + $0x1d0] ss:$8 sps:$4 sm:$0xff]   ;;  %v752_v45 = vld [vmem:[%s1043_s1 + $0x1c4] ss:$8 sps:$4 sm:$0xff]   ;;  %v755_v47 = vld [vmem:[%s1043_s1 + $0x1c0] ss:$8 sps:$4 sm:$0xff]  }
  0x11   :  { %519 = vmatprep.subr.bf16.mxu1 %v710_v17  ;;  %v756_v48 = vld [vmem:[%s1043_s1 + $0xb4] ss:$8 sps:$4 sm:$0xff]   ;;  %v760_v52 = vld [vmem:[%s1043_s1 + $0xb0] ss:$8 sps:$4 sm:$0xff]   ;;  %v762_v54 = vld [vmem:[%s1043_s1 + $0xa4] ss:$8 sps:$4 sm:$0xff]  }
  0x12   :  { %v782_v49 = vld [vmem:[%s1044_s0 + $0x4] ss:$16 sps:$4 sm:$0xff]   ;;  %v785_v51 = vld [vmem:[%s1044_s0 + $0xc] ss:$16 sps:$4 sm:$0xff]   ;;  %v761_v53 = vld [vmem:[%s1043_s1 + $0x1b0] ss:$8 sps:$4 sm:$0xff]  }
  0x13   :  { %467 = vmatpush1.bf16.msra.mxu0 %v712_v18  ;;  %v758_v50 = vld [vmem:[%s1043_s1 + $0x1b4] ss:$8 sps:$4 sm:$0xff]   ;;  %490 = vmatprep.mubr.bf16.mxu0 %v782_v49  ;;  %v764_v55 = vld [vmem:[%s1043_s1 + $0x1a4] ss:$8 sps:$4 sm:$0xff]   ;;  %v766_v56 = vld [vmem:[%s1043_s1 + $0xa0] ss:$8 sps:$4 sm:$0xff]  }
  0x14   :  { %520 = vmatpush1.bf16.msra.mxu1 %v713_v19  ;;  %468 = vmatprep.subr.bf16.mxu0 %v714_v20  ;;  %v767_v57 = vld [vmem:[%s1043_s1 + $0x1a0] ss:$8 sps:$4 sm:$0xff]   ;;  %v768_v58 = vld [vmem:[%s1043_s1 + $0x94] ss:$8 sps:$4 sm:$0xff]   ;;  %v772_v60 = vld [vmem:[%s1043_s1 + $0x90] ss:$8 sps:$4 sm:$0xff]  }
  0x15   :  { %521 = vmatprep.subr.bf16.mxu1 %v716_v21  ;;  %543 = vmatprep.mubr.bf16.mxu1 %v785_v51  ;;  %v770_v59 = vld [vmem:[%s1043_s1 + $0x194] ss:$8 sps:$4 sm:$0xff]   ;;  %v773_v61 = vld [vmem:[%s1043_s1 + $0x190] ss:$8 sps:$4 sm:$0xff]   ;;  %v774_v62 = vld [vmem:[%s1043_s1 + $0x84] ss:$8 sps:$4 sm:$0xff]  }
  0x16   :  { %v776_v63 = vld [vmem:[%s1043_s1 + $0x184] ss:$8 sps:$4 sm:$0xff]   ;;  %v778_v0 = vld [vmem:[%s1043_s1 + $0x80] ss:$8 sps:$4 sm:$0xff]   ;;  %v89_v9 = vshrl.u32 %v88_v8, 7 }
  0x17   :  { %469 = vmatpush1.bf16.msra.mxu0 %v718_v22  ;;  %v779_v1 = vld [vmem:[%s1043_s1 + $0x180] ss:$8 sps:$4 sm:$0xff]   ;;  %v786_v4 = vld [vmem:[%s1044_s0 + $0x24] ss:$16 sps:$4 sm:$0xff]   ;;  %v788_v5 = vld [vmem:[%s1044_s0 + $0x2c] ss:$16 sps:$4 sm:$0xff]  }
  0x18   :  { %522 = vmatpush1.bf16.msra.mxu1 %v719_v23  ;;  %470 = vmatprep.subr.bf16.mxu0 %v720_v24  ;;  %v780_v2 = vld [vmem:[%s1044_s0] ss:$16 sps:$4 sm:$0xff]   ;;  %v783_v3 = vld [vmem:[%s1044_s0 + $0x8] ss:$16 sps:$4 sm:$0xff]   ;;  %v90_v10 = vsub.s32 0, %v89_v9  ;;  %v94_v12 = vsub.s32 1, %v89_v9 }
  0x19   :  { %523 = vmatprep.subr.bf16.mxu1 %v722_v25  ;;  %v790_v6 = vld [vmem:[%s1044_s0 + $0x20] ss:$16 sps:$4 sm:$0xff]   ;;  %v791_v7 = vld [vmem:[%s1044_s0 + $0x28] ss:$16 sps:$4 sm:$0xff]  }
  0x1a   :  { %v86_v11 = vld [vmem:[%s1045_s2] sm:$0x3] }
  0x1b   :  { %471 = vmatpush1.bf16.msra.mxu0 %v724_v26  ;;  %v91_v13 = vrot.slane %v86_v11, %v90_v10  ;;  %v95_v14 = vrot.slane %v86_v11, %v94_v12 }
  0x1c   :  { %524 = vmatpush1.bf16.msra.mxu1 %v725_v27  ;;  %472 = vmatprep.subr.bf16.mxu0 %v726_v28 }
  0x1d   :  { %525 = vmatprep.subr.bf16.mxu1 %v728_v29 }
  0x1f   :  { %473 = vmatpush1.bf16.msra.mxu0 %v730_v30 }
  0x20   :  { %526 = vmatpush1.bf16.msra.mxu1 %v731_v31  ;;  %474 = vmatprep.subr.bf16.mxu0 %v732_v32 }
  0x21   :  { %527 = vmatprep.subr.bf16.mxu1 %v734_v33 }
  0x23   :  { %475 = vmatpush2.bf16.msra.mxu0 %v736_v34 }
  0x24   :  { %528 = vmatpush2.bf16.msra.mxu1 %v737_v35  ;;  %476 = vmatprep.subr.bf16.mxu0 %v738_v36 }
  0x25   :  { %529 = vmatprep.subr.bf16.mxu1 %v740_v37 }
  0x27   :  { %477 = vmatpush2.bf16.msra.mxu0 %v742_v38 }
  0x28   :  { %530 = vmatpush2.bf16.msra.mxu1 %v743_v39  ;;  %478 = vmatprep.subr.bf16.mxu0 %v744_v40 }
  0x29   :  { %531 = vmatprep.subr.bf16.mxu1 %v746_v41 }
  0x2b   :  { %479 = vmatpush2.bf16.msra.mxu0 %v748_v42 }
  0x2c   :  { %532 = vmatpush2.bf16.msra.mxu1 %v749_v43  ;;  %480 = vmatprep.subr.bf16.mxu0 %v750_v44 }
  0x2d   :  { %533 = vmatprep.subr.bf16.mxu1 %v752_v45 }
  0x2f   :  { %481 = vmatpush2.bf16.msra.mxu0 %v754_v46 }
  0x30   :  { %534 = vmatpush2.bf16.msra.mxu1 %v755_v47  ;;  %482 = vmatprep.subr.bf16.mxu0 %v756_v48 }
  0x31   :  { %535 = vmatprep.subr.bf16.mxu1 %v758_v50 }
  0x33   :  { %483 = vmatpush2.bf16.msra.mxu0 %v760_v52 }
  0x34   :  { %536 = vmatpush2.bf16.msra.mxu1 %v761_v53  ;;  %484 = vmatprep.subr.bf16.mxu0 %v762_v54 }
  0x35   :  { %537 = vmatprep.subr.bf16.mxu1 %v764_v55 }
  0x37   :  { %485 = vmatpush2.bf16.msra.mxu0 %v766_v56 }
  0x38   :  { %538 = vmatpush2.bf16.msra.mxu1 %v767_v57  ;;  %486 = vmatprep.subr.bf16.mxu0 %v768_v58 }
  0x39   :  { %539 = vmatprep.subr.bf16.mxu1 %v770_v59 }
  0x3b   :  { %487 = vmatpush2.bf16.msra.mxu0 %v772_v60 }
  0x3c   :  { %540 = vmatpush2.bf16.msra.mxu1 %v773_v61  ;;  %488 = vmatprep.subr.bf16.mxu0 %v774_v62 }
  0x3d   :  { %541 = vmatprep.subr.bf16.mxu1 %v776_v63 }
  0x3f   :  { %489 = vmatpush2.bf16.msra.mxu0 %v778_v0 }
  0x40   :  { %542 = vmatpush2.bf16.msra.mxu1 %v779_v1 }
  0x42   :  { %491 = vmatmul.mubr.bf16.vlgmr.msra.gmra.mxu0 %v780_v2 }
  0x43   :  { %544 = vmatmul.mubr.bf16.vlgmr.msra.gmra.mxu1 %v783_v3  ;;  %500 = vmatprep.mubr.bf16.mxu0 %v786_v4 }
  0x44   :  { %553 = vmatprep.mubr.bf16.mxu1 %v788_v5 }
  0x4a   :  { %501 = vmatmul.mubr.bf16.gmra.mxu0 %v790_v6 }
  0x4b   :  { %554 = vmatmul.mubr.bf16.gmra.mxu1 %v791_v7 }
 0x102   :  { %v492_v15 = vpop.f32.mrf.mxu0 }
 0x103   :  { %v545_v16 = vpop.f32.mrf.mxu1  ;;  %v493_v17 = vadd.f32 %v492_v15, %v91_v13 }
 0x104   :  { %v494_v18 = vpop.f32.mrf.mxu0 }
 0x105   :  { %v547_v19 = vpop.f32.mrf.mxu1  ;;  %v546_v20 = vadd.f32 %v545_v16, %v493_v17  ;;  %v495_v21 = vadd.f32 %v494_v18, %v95_v14 }
 0x106   :  { %v496_v22 = vpop.f32.mrf.mxu0 }
 0x107   :  { %v549_v23 = vpop.f32.mrf.mxu1  ;;  %v548_v24 = vadd.f32 %v547_v19, %v495_v21  ;;  %v497_v25 = vadd.f32 %v496_v22, %v91_v13  ;;  %v564_v28 = vmax.f32 %v546_v20, 0.0 }
 0x108   :  { %v498_v26 = vpop.f32.mrf.mxu0 }
 0x109   :  { %v551_v27 = vpop.f32.mrf.mxu1  ;;  %v565_v29 = vmax.f32 %v548_v24, 0.0  ;;  %v550_v30 = vadd.f32 %v549_v23, %v497_v25  ;;  %v499_v31 = vadd.f32 %v498_v26, %v95_v14 }
 0x10a   :  { %v502_v32 = vpop.f32.mrf.mxu0 }
 0x10b   :  { %v555_v33 = vpop.f32.mrf.mxu1  ;;  %v680_v34 = vpack.c.bf16 %v565_v29, %v564_v28  ;;  %v552_v35 = vadd.f32 %v551_v27, %v499_v31  ;;  %v503_v36 = vadd.f32 %v502_v32, %v91_v13  ;;  %v566_v39 = vmax.f32 %v550_v30, 0.0 }
 0x10c   :  { %v504_v37 = vpop.f32.mrf.mxu0 }
 0x10d   :  { %v557_v38 = vpop.f32.mrf.mxu1  ;;  %596 = vst [vmem:[%s1046_s3] sm:$0xff] %v680_v34  ;;  %v567_v40 = vmax.f32 %v552_v35, 0.0  ;;  %v556_v41 = vadd.f32 %v555_v33, %v503_v36  ;;  %v505_v42 = vadd.f32 %v504_v37, %v95_v14 }
 0x10e   :  { %v506_v43 = vpop.f32.mrf.mxu0 }
 0x10f   :  { %v559_v44 = vpop.f32.mrf.mxu1  ;;  %v681_v45 = vpack.c.bf16 %v567_v40, %v566_v39  ;;  %v558_v46 = vadd.f32 %v557_v38, %v505_v42  ;;  %v507_v47 = vadd.f32 %v506_v43, %v91_v13  ;;  %v568_v49 = vmax.f32 %v556_v41, 0.0 }
 0x110   :  { %v508_v48 = vpop.f32.mrf.mxu0 }
 0x111   :  { %597 = vst [vmem:[%s1046_s3 + $0x8] sm:$0xff] %v681_v45  ;;  %v569_v50 = vmax.f32 %v558_v46, 0.0  ;;  %v560_v51 = vadd.f32 %v559_v44, %v507_v47  ;;  %v509_v52 = vadd.f32 %v508_v48, %v95_v14  ;;  %v561_v53 = vpop.f32.mrf.mxu1 }
 0x113   :  { %v682_v54 = vpack.c.bf16 %v569_v50, %v568_v49  ;;  %v562_v55 = vadd.f32 %v561_v53, %v509_v52  ;;  %v570_v56 = vmax.f32 %v560_v51, 0.0 }
 0x115   :  { %598 = vst [vmem:[%s1046_s3 + $0x10] sm:$0xff] %v682_v54  ;;  %v571_v57 = vmax.f32 %v562_v55, 0.0 }
 0x117   :  { %v683_v58 = vpack.c.bf16 %v571_v57, %v570_v56 }
 0x119   :  { %599 = vst [vmem:[%s1046_s3 + $0x18] sm:$0xff] %v683_v58 }

// kernel: forward.11
= control target key start
LH: loop header
LB: loop body
LE: loop exit
PB: predicated region body
PF: predicated region fallthrough
CT: control target
= control target key end

     0   :  { %vm1607_vm0 = vcmask 1041408   ;;  %vm1603_vm1 = vcmask 31744   ;;  %s3135_s1 = inlined_call_operand.vmem [shape: bf16[2048,4], index: 1, kind: input, shape index: {}]   ;;  %s3136_s0 = inlined_call_operand.vmem [shape: bf16[8,2048], index: 0, kind: input, shape index: {}]   ;;  %s3137_s2 = inlined_call_operand.vmem [shape: f32[1,4], index: 2, kind: input, shape index: {}]   ;;  %s3138_s3 = inlined_call_operand.vmem [shape: bf16[4,2048], index: 3, kind: input, shape index: {}]   ;;  %s3139_s4 = inlined_call_operand.vmem [shape: f32[1,2048], index: 4, kind: input, shape index: {}]   ;;  %s3140_s5 = inlined_call_operand.vmem [shape: bf16[8,2048], index: 5, kind: output, shape index: {}]  }
   0x1   :  { %v2432_v0 = vld [vmem:[%s3135_s1 + $0x78] sm:$0xff]   ;;  %v2436_v4 = vld [vmem:[%s3135_s1 + $0x70] sm:$0xff]   ;;  %v2440_v8 = vld [vmem:[%s3135_s1 + $0x68] sm:$0xff]  }
   0x2   :  { %v2433_v1 = vld [vmem:[%s3135_s1 + $0xf8] sm:$0xff]   ;;  %2254 = vmatprep.subr.bf16.mxu0 %v2432_v0  ;;  %v2437_v5 = vld [vmem:[%s3135_s1 + $0xf0] sm:$0xff]   ;;  %v2441_v9 = vld [vmem:[%s3135_s1 + $0xe8] sm:$0xff]  }
   0x3   :  { %v2434_v2 = vld [vmem:[%s3135_s1 + $0x38] sm:$0xff]   ;;  %2276 = vmatprep.subr.bf16.mxu1 %v2433_v1  ;;  %v2438_v6 = vld [vmem:[%s3135_s1 + $0x30] sm:$0xff]   ;;  %v2442_v10 = vld [vmem:[%s3135_s1 + $0x28] sm:$0xff]  }
   0x4   :  { %v2435_v3 = vld [vmem:[%s3135_s1 + $0xb8] sm:$0xff]   ;;  %2255 = vmatpush3.bf16.msra.mxu0 %v2434_v2  ;;  %v2439_v7 = vld [vmem:[%s3135_s1 + $0xb0] sm:$0xff]   ;;  %v2443_v11 = vld [vmem:[%s3135_s1 + $0xa8] sm:$0xff]  }
   0x5   :  { %2277 = vmatpush3.bf16.msra.mxu1 %v2435_v3  ;;  %2256 = vmatprep.subr.bf16.mxu0 %v2436_v4  ;;  %v2444_v12 = vld [vmem:[%s3135_s1 + $0x60] sm:$0xff]   ;;  %v2448_v16 = vld [vmem:[%s3135_s1 + $0x58] sm:$0xff]   ;;  %v2452_v20 = vld [vmem:[%s3135_s1 + $0x50] sm:$0xff]  }
   0x6   :  { %2278 = vmatprep.subr.bf16.mxu1 %v2437_v5  ;;  %v2445_v13 = vld [vmem:[%s3135_s1 + $0xe0] sm:$0xff]   ;;  %v2449_v17 = vld [vmem:[%s3135_s1 + $0xd8] sm:$0xff]   ;;  %v2453_v21 = vld [vmem:[%s3135_s1 + $0xd0] sm:$0xff]  }
   0x7   :  { %v2446_v14 = vld [vmem:[%s3135_s1 + $0x20] sm:$0xff]   ;;  %v2450_v18 = vld [vmem:[%s3135_s1 + $0x18] sm:$0xff]   ;;  %v2454_v22 = vld [vmem:[%s3135_s1 + $0x10] sm:$0xff]  }
   0x8   :  { %2257 = vmatpush3.bf16.msra.mxu0 %v2438_v6  ;;  %v2447_v15 = vld [vmem:[%s3135_s1 + $0xa0] sm:$0xff]   ;;  %v2451_v19 = vld [vmem:[%s3135_s1 + $0x98] sm:$0xff]   ;;  %v2455_v23 = vld [vmem:[%s3135_s1 + $0x90] sm:$0xff]  }
   0x9   :  { %2279 = vmatpush3.bf16.msra.mxu1 %v2439_v7  ;;  %2258 = vmatprep.subr.bf16.mxu0 %v2440_v8  ;;  %v2456_v24 = vld [vmem:[%s3135_s1 + $0x48] sm:$0xff]   ;;  %v2460_v28 = vld [vmem:[%s3135_s1 + $0x40] sm:$0xff]   ;;  %v2468_v38 = vld [vmem:[%s3135_s1 + $0x178] sm:$0xff]  }
   0xa   :  { %2280 = vmatprep.subr.bf16.mxu1 %v2441_v9  ;;  %v2457_v25 = vld [vmem:[%s3135_s1 + $0xc8] sm:$0xff]   ;;  %v2461_v29 = vld [vmem:[%s3135_s1 + $0xc0] sm:$0xff]   ;;  %v2469_v39 = vld [vmem:[%s3135_s1 + $0x1f8] sm:$0xff]  }
   0xb   :  { %v2458_v26 = vld [vmem:[%s3135_s1 + $0x8] sm:$0xff]   ;;  %v2462_v30 = vld [vmem:[%s3135_s1] sm:$0xff]   ;;  %v2470_v40 = vld [vmem:[%s3135_s1 + $0x138] sm:$0xff]  }
   0xc   :  { %2259 = vmatpush3.bf16.msra.mxu0 %v2442_v10  ;;  %v2459_v27 = vld [vmem:[%s3135_s1 + $0x88] sm:$0xff]   ;;  %v2463_v31 = vld [vmem:[%s3135_s1 + $0x80] sm:$0xff]   ;;  %v2471_v41 = vld [vmem:[%s3135_s1 + $0x1b8] sm:$0xff]  }
   0xd   :  { %2281 = vmatpush3.bf16.msra.mxu1 %v2443_v11  ;;  %2260 = vmatprep.subr.bf16.mxu0 %v2444_v12  ;;  %v21_v32 = vld [vmem:[%s3136_s0] sm:$0xff]  ;;  %v22_v33 = vld [vmem:[%s3136_s0 + $0x8] sm:$0xff]  ;;  %v2472_v42 = vld [vmem:[%s3135_s1 + $0x170] sm:$0xff]  }
   0xe   :  { %2282 = vmatprep.subr.bf16.mxu1 %v2445_v13  ;;  %v2077_v34 = vcombine.low %v21_v32, %v21_v32  ;;  %v2078_v35 = vcombine.high %v21_v32, %v21_v32  ;;  %v2079_v36 = vcombine.low %v22_v33, %v22_v33  ;;  %v2080_v37 = vcombine.high %v22_v33, %v22_v33  ;;  %v2473_v43 = vld [vmem:[%s3135_s1 + $0x1f0] sm:$0xff]   ;;  %v2476_v46 = vld [vmem:[%s3135_s1 + $0x168] sm:$0xff]   ;;  %v2480_v50 = vld [vmem:[%s3135_s1 + $0x160] sm:$0xff]  }
   0xf   :  { %v2474_v44 = vld [vmem:[%s3135_s1 + $0x130] sm:$0xff]   ;;  %v2477_v47 = vld [vmem:[%s3135_s1 + $0x1e8] sm:$0xff]   ;;  %v2481_v51 = vld [vmem:[%s3135_s1 + $0x1e0] sm:$0xff]  }
  0x10   :  { %2261 = vmatpush3.bf16.msra.mxu0 %v2446_v14  ;;  %1148 = vmatprep.mubr.bf16.mxu0 %v2078_v35  ;;  %v2475_v45 = vld [vmem:[%s3135_s1 + $0x1b0] sm:$0xff]   ;;  %v2478_v48 = vld [vmem:[%s3135_s1 + $0x128] sm:$0xff]   ;;  %v2482_v52 = vld [vmem:[%s3135_s1 + $0x120] sm:$0xff]  }
  0x11   :  { %2283 = vmatpush3.bf16.msra.mxu1 %v2447_v15  ;;  %2262 = vmatprep.subr.bf16.mxu0 %v2448_v16  ;;  %v2479_v49 = vld [vmem:[%s3135_s1 + $0x1a8] sm:$0xff]   ;;  %v2483_v53 = vld [vmem:[%s3135_s1 + $0x1a0] sm:$0xff]   ;;  %v2484_v54 = vld [vmem:[%s3135_s1 + $0x158] sm:$0xff]  }
  0x12   :  { %2284 = vmatprep.subr.bf16.mxu1 %v2449_v17  ;;  %1188 = vmatprep.mubr.bf16.mxu1 %v2080_v37  ;;  %v2485_v55 = vld [vmem:[%s3135_s1 + $0x1d8] sm:$0xff]   ;;  %v2488_v58 = vld [vmem:[%s3135_s1 + $0x150] sm:$0xff]   ;;  %v2492_v62 = vld [vmem:[%s3135_s1 + $0x148] sm:$0xff]  }
  0x13   :  { %v2486_v56 = vld [vmem:[%s3135_s1 + $0x118] sm:$0xff]   ;;  %v2489_v59 = vld [vmem:[%s3135_s1 + $0x1d0] sm:$0xff]   ;;  %v2493_v63 = vld [vmem:[%s3135_s1 + $0x1c8] sm:$0xff]  }
  0x14   :  { %2263 = vmatpush3.bf16.msra.mxu0 %v2450_v18  ;;  %v2487_v57 = vld [vmem:[%s3135_s1 + $0x198] sm:$0xff]   ;;  %v2490_v60 = vld [vmem:[%s3135_s1 + $0x110] sm:$0xff]   ;;  %v2494_v0 = vld [vmem:[%s3135_s1 + $0x108] sm:$0xff]  }
  0x15   :  { %2285 = vmatpush3.bf16.msra.mxu1 %v2451_v19  ;;  %2264 = vmatprep.subr.bf16.mxu0 %v2452_v20  ;;  %v2491_v61 = vld [vmem:[%s3135_s1 + $0x190] sm:$0xff]   ;;  %v2495_v1 = vld [vmem:[%s3135_s1 + $0x188] sm:$0xff]   ;;  %v2496_v2 = vld [vmem:[%s3135_s1 + $0x140] sm:$0xff]  }
  0x16   :  { %2286 = vmatprep.subr.bf16.mxu1 %v2453_v21  ;;  %v2497_v3 = vld [vmem:[%s3135_s1 + $0x1c0] sm:$0xff]   ;;  %v23_v6 = vld [vmem:[%s3136_s0 + $0x10] sm:$0xff]  ;;  %v24_v9 = vld [vmem:[%s3136_s0 + $0x18] sm:$0xff] }
  0x17   :  { %v2498_v4 = vld [vmem:[%s3135_s1 + $0x100] sm:$0xff]   ;;  %v2081_v7 = vcombine.low %v23_v6, %v23_v6  ;;  %v2082_v8 = vcombine.high %v23_v6, %v23_v6  ;;  %v2083_v10 = vcombine.low %v24_v9, %v24_v9  ;;  %v2084_v11 = vcombine.high %v24_v9, %v24_v9  ;;  %v2504_v12 = vld [vmem:[%s3135_s1 + $0x278] sm:$0xff]   ;;  %v2508_v16 = vld [vmem:[%s3135_s1 + $0x270] sm:$0xff]  }
  0x18   :  { %2265 = vmatpush3.bf16.msra.mxu0 %v2454_v22  ;;  %v2499_v5 = vld [vmem:[%s3135_s1 + $0x180] sm:$0xff]   ;;  %v2505_v13 = vld [vmem:[%s3135_s1 + $0x2f8] sm:$0xff]   ;;  %v2509_v17 = vld [vmem:[%s3135_s1 + $0x2f0] sm:$0xff]  }
  0x19   :  { %2287 = vmatpush3.bf16.msra.mxu1 %v2455_v23  ;;  %2266 = vmatprep.subr.bf16.mxu0 %v2456_v24  ;;  %v2506_v14 = vld [vmem:[%s3135_s1 + $0x238] sm:$0xff]   ;;  %v2510_v18 = vld [vmem:[%s3135_s1 + $0x230] sm:$0xff]   ;;  %v2512_v20 = vld [vmem:[%s3135_s1 + $0x268] sm:$0xff]  }
  0x1a   :  { %2288 = vmatprep.subr.bf16.mxu1 %v2457_v25  ;;  %v2507_v15 = vld [vmem:[%s3135_s1 + $0x2b8] sm:$0xff]   ;;  %v2511_v19 = vld [vmem:[%s3135_s1 + $0x2b0] sm:$0xff]   ;;  %v2513_v21 = vld [vmem:[%s3135_s1 + $0x2e8] sm:$0xff]  }
  0x1b   :  { %v2514_v22 = vld [vmem:[%s3135_s1 + $0x228] sm:$0xff]   ;;  %v2516_v24 = vld [vmem:[%s3135_s1 + $0x260] sm:$0xff]   ;;  %v2524_v32 = vld [vmem:[%s3135_s1 + $0x250] sm:$0xff]  }
  0x1c   :  { %2267 = vmatpush3.bf16.msra.mxu0 %v2458_v26  ;;  %v2515_v23 = vld [vmem:[%s3135_s1 + $0x2a8] sm:$0xff]   ;;  %v2517_v25 = vld [vmem:[%s3135_s1 + $0x2e0] sm:$0xff]   ;;  %v2525_v33 = vld [vmem:[%s3135_s1 + $0x2d0] sm:$0xff]  }
  0x1d   :  { %2289 = vmatpush3.bf16.msra.mxu1 %v2459_v27  ;;  %2268 = vmatprep.subr.bf16.mxu0 %v2460_v28  ;;  %v2518_v26 = vld [vmem:[%s3135_s1 + $0x220] sm:$0xff]   ;;  %v2520_v28 = vld [vmem:[%s3135_s1 + $0x258] sm:$0xff]   ;;  %v2527_v35 = vld [vmem:[%s3135_s1 + $0x290] sm:$0xff]  }
  0x1e   :  { %2290 = vmatprep.subr.bf16.mxu1 %v2461_v29  ;;  %v2519_v27 = vld [vmem:[%s3135_s1 + $0x2a0] sm:$0xff]   ;;  %v2521_v29 = vld [vmem:[%s3135_s1 + $0x2d8] sm:$0xff]   ;;  %v2529_v37 = vld [vmem:[%s3135_s1 + $0x2c8] sm:$0xff]  }
  0x1f   :  { %v2560_v6 = vld [vmem:[%s3135_s1 + $0x350] sm:$0xff]  }
  0x20   :  { %2269 = vmatpush3.bf16.msra.mxu0 %v2462_v30  ;;  %v2522_v30 = vld [vmem:[%s3135_s1 + $0x218] sm:$0xff]   ;;  %v2563_v9 = vld [vmem:[%s3135_s1 + $0x390] sm:$0xff]  }
  0x21   :  { %2291 = vmatpush3.bf16.msra.mxu1 %v2463_v31  ;;  %2298 = vmatprep.subr.bf16.mxu0 %v2468_v38  ;;  %v2523_v31 = vld [vmem:[%s3135_s1 + $0x298] sm:$0xff]   ;;  %v2530_v38 = vld [vmem:[%s3135_s1 + $0x208] sm:$0xff]  }
  0x22   :  { %2320 = vmatprep.subr.bf16.mxu1 %v2469_v39  ;;  %v2531_v39 = vld [vmem:[%s3135_s1 + $0x288] sm:$0xff]  }
  0x23   :  { %1149 = vmatmul.mubr.bf16.vlgmr.msra.gmra.mxu0 %v2077_v34  ;;  %v2526_v34 = vld [vmem:[%s3135_s1 + $0x210] sm:$0xff]  }
  0x24   :  { %1189 = vmatmul.mubr.bf16.vlgmr.msra.gmra.mxu1 %v2079_v36  ;;  %2299 = vmatpush3.bf16.msra.mxu0 %v2470_v40  ;;  %v2528_v36 = vld [vmem:[%s3135_s1 + $0x248] sm:$0xff]   ;;  %v2532_v40 = vld [vmem:[%s3135_s1 + $0x240] sm:$0xff]  }
  0x25   :  { %2321 = vmatpush3.bf16.msra.mxu1 %v2471_v41  ;;  %2300 = vmatprep.subr.bf16.mxu0 %v2472_v42  ;;  %v2533_v41 = vld [vmem:[%s3135_s1 + $0x2c0] sm:$0xff]  }
  0x26   :  { %2322 = vmatprep.subr.bf16.mxu1 %v2473_v43  ;;  %1228 = vmatprep.mubr.bf16.mxu0 %v2082_v8  ;;  %v2534_v42 = vld [vmem:[%s3135_s1 + $0x200] sm:$0xff]   ;;  %v2562_v8 = vld [vmem:[%s3135_s1 + $0x310] sm:$0xff]  }
  0x27   :  { %1268 = vmatprep.mubr.bf16.mxu1 %v2084_v11  ;;  %v2535_v43 = vld [vmem:[%s3135_s1 + $0x280] sm:$0xff]   ;;  %v2565_v11 = vld [vmem:[%s3135_s1 + $0x3c8] sm:$0xff]  }
  0x28   :  { %2301 = vmatpush3.bf16.msra.mxu0 %v2474_v44  ;;  %v25_v44 = vld [vmem:[%s3136_s0 + $0x20] sm:$0xff] }
  0x29   :  { %2323 = vmatpush3.bf16.msra.mxu1 %v2475_v45  ;;  %2302 = vmatprep.subr.bf16.mxu0 %v2476_v46  ;;  %v26_v45 = vld [vmem:[%s3136_s0 + $0x28] sm:$0xff]  ;;  %v2085_v46 = vcombine.low %v25_v44, %v25_v44 }
  0x2a   :  { %2324 = vmatprep.subr.bf16.mxu1 %v2477_v47  ;;  %v2086_v47 = vcombine.high %v25_v44, %v25_v44 }
  0x2c   :  { %2303 = vmatpush3.bf16.msra.mxu0 %v2478_v48  ;;  %v2087_v48 = vcombine.low %v26_v45, %v26_v45 }
  0x2d   :  { %2325 = vmatpush3.bf16.msra.mxu1 %v2479_v49  ;;  %2304 = vmatprep.subr.bf16.mxu0 %v2480_v50  ;;  %v2088_v49 = vcombine.high %v26_v45, %v26_v45  ;;  %v2540_v50 = vld [vmem:[%s3135_s1 + $0x378] sm:$0xff]  }
  0x2e   :  { %2326 = vmatprep.subr.bf16.mxu1 %v2481_v51  ;;  %v2541_v51 = vld [vmem:[%s3135_s1 + $0x3f8] sm:$0xff]  }
  0x30   :  { %2305 = vmatpush3.bf16.msra.mxu0 %v2482_v52  ;;  %v2542_v52 = vld [vmem:[%s3135_s1 + $0x338] sm:$0xff]  }
  0x31   :  { %2327 = vmatpush3.bf16.msra.mxu1 %v2483_v53  ;;  %2306 = vmatprep.subr.bf16.mxu0 %v2484_v54  ;;  %v2543_v53 = vld [vmem:[%s3135_s1 + $0x3b8] sm:$0xff]   ;;  %v2544_v54 = vld [vmem:[%s3135_s1 + $0x370] sm:$0xff]  }
  0x32   :  { %2328 = vmatprep.subr.bf16.mxu1 %v2485_v55  ;;  %v2545_v55 = vld [vmem:[%s3135_s1 + $0x3f0] sm:$0xff]  }
  0x34   :  { %2307 = vmatpush3.bf16.msra.mxu0 %v2486_v56  ;;  %v2546_v56 = vld [vmem:[%s3135_s1 + $0x330] sm:$0xff]  }
  0x35   :  { %2329 = vmatpush3.bf16.msra.mxu1 %v2487_v57  ;;  %2308 = vmatprep.subr.bf16.mxu0 %v2488_v58  ;;  %v2547_v57 = vld [vmem:[%s3135_s1 + $0x3b0] sm:$0xff]   ;;  %v2548_v58 = vld [vmem:[%s3135_s1 + $0x368] sm:$0xff]  }
  0x36   :  { %2330 = vmatprep.subr.bf16.mxu1 %v2489_v59  ;;  %v2549_v59 = vld [vmem:[%s3135_s1 + $0x3e8] sm:$0xff]  }
  0x38   :  { %2309 = vmatpush3.bf16.msra.mxu0 %v2490_v60  ;;  %v2550_v60 = vld [vmem:[%s3135_s1 + $0x328] sm:$0xff]  }
  0x39   :  { %2331 = vmatpush3.bf16.msra.mxu1 %v2491_v61  ;;  %2310 = vmatprep.subr.bf16.mxu0 %v2492_v62  ;;  %v2551_v61 = vld [vmem:[%s3135_s1 + $0x3a8] sm:$0xff]   ;;  %v2552_v62 = vld [vmem:[%s3135_s1 + $0x360] sm:$0xff]  }
  0x3a   :  { %2332 = vmatprep.subr.bf16.mxu1 %v2493_v63  ;;  %v2553_v63 = vld [vmem:[%s3135_s1 + $0x3e0] sm:$0xff]  }
  0x3c   :  { %2311 = vmatpush3.bf16.msra.mxu0 %v2494_v0  ;;  %v2554_v0 = vld [vmem:[%s3135_s1 + $0x320] sm:$0xff]  }
  0x3d   :  { %2333 = vmatpush3.bf16.msra.mxu1 %v2495_v1  ;;  %2312 = vmatprep.subr.bf16.mxu0 %v2496_v2  ;;  %v2555_v1 = vld [vmem:[%s3135_s1 + $0x3a0] sm:$0xff]   ;;  %v2556_v2 = vld [vmem:[%s3135_s1 + $0x358] sm:$0xff]  }
  0x3e   :  { %2334 = vmatprep.subr.bf16.mxu1 %v2497_v3  ;;  %v2557_v3 = vld [vmem:[%s3135_s1 + $0x3d8] sm:$0xff]  }
  0x40   :  { %2313 = vmatpush3.bf16.msra.mxu0 %v2498_v4  ;;  %v2558_v4 = vld [vmem:[%s3135_s1 + $0x318] sm:$0xff]  }
  0x41   :  { %2335 = vmatpush3.bf16.msra.mxu1 %v2499_v5  ;;  %2342 = vmatprep.subr.bf16.mxu0 %v2504_v12  ;;  %v2559_v5 = vld [vmem:[%s3135_s1 + $0x398] sm:$0xff]   ;;  %v2566_v12 = vld [vmem:[%s3135_s1 + $0x308] sm:$0xff]  }
  0x42   :  { %2364 = vmatprep.subr.bf16.mxu1 %v2505_v13  ;;  %v2567_v13 = vld [vmem:[%s3135_s1 + $0x388] sm:$0xff]  }
  0x43   :  { %1229 = vmatmul.mubr.bf16.vlgmr.msra.gmra.mxu0 %v2081_v7  ;;  %v2561_v7 = vld [vmem:[%s3135_s1 + $0x3d0] sm:$0xff]  }
  0x44   :  { %1269 = vmatmul.mubr.bf16.vlgmr.msra.gmra.mxu1 %v2083_v10  ;;  %2343 = vmatpush3.bf16.msra.mxu0 %v2506_v14  ;;  %v2564_v10 = vld [vmem:[%s3135_s1 + $0x348] sm:$0xff]   ;;  %v2568_v14 = vld [vmem:[%s3135_s1 + $0x340] sm:$0xff]  }
  0x45   :  { %2365 = vmatpush3.bf16.msra.mxu1 %v2507_v15  ;;  %2344 = vmatprep.subr.bf16.mxu0 %v2508_v16  ;;  %v2569_v15 = vld [vmem:[%s3135_s1 + $0x3c0] sm:$0xff]  }
  0x46   :  { %2366 = vmatprep.subr.bf16.mxu1 %v2509_v17  ;;  %1308 = vmatprep.mubr.bf16.mxu0 %v2086_v47  ;;  %v2570_v16 = vld [vmem:[%s3135_s1 + $0x300] sm:$0xff]  }
  0x47   :  { %1348 = vmatprep.mubr.bf16.mxu1 %v2088_v49  ;;  %v2571_v17 = vld [vmem:[%s3135_s1 + $0x380] sm:$0xff]  }
  0x48   :  { %2345 = vmatpush3.bf16.msra.mxu0 %v2510_v18  ;;  %v27_v18 = vld [vmem:[%s3136_s0 + $0x30] sm:$0xff] }
  0x49   :  { %2367 = vmatpush3.bf16.msra.mxu1 %v2511_v19  ;;  %2346 = vmatprep.subr.bf16.mxu0 %v2512_v20  ;;  %v28_v19 = vld [vmem:[%s3136_s0 + $0x38] sm:$0xff]  ;;  %v2089_v20 = vcombine.low %v27_v18, %v27_v18 }
  0x4a   :  { %2368 = vmatprep.subr.bf16.mxu1 %v2513_v21  ;;  %v2090_v21 = vcombine.high %v27_v18, %v27_v18 }
  0x4c   :  { %2347 = vmatpush3.bf16.msra.mxu0 %v2514_v22  ;;  %v2091_v22 = vcombine.low %v28_v19, %v28_v19 }
  0x4d   :  { %2369 = vmatpush3.bf16.msra.mxu1 %v2515_v23  ;;  %2348 = vmatprep.subr.bf16.mxu0 %v2516_v24  ;;  %v2092_v23 = vcombine.high %v28_v19, %v28_v19 }
  0x4e   :  { %2370 = vmatprep.subr.bf16.mxu1 %v2517_v25 }
  0x50   :  { %2349 = vmatpush3.bf16.msra.mxu0 %v2518_v26  ;;  %v1451_v26 = vlaneseq }
  0x51   :  { %2371 = vmatpush3.bf16.msra.mxu1 %v2519_v27  ;;  %2350 = vmatprep.subr.bf16.mxu0 %v2520_v28  ;;  %v2584_v27 = vmov 1983009808  }
  0x52   :  { %2372 = vmatprep.subr.bf16.mxu1 %v2521_v29  ;;  %v1537_v28 = vunpack.c.l.s4 %v2584_v27  ;;  %v2076_v29 = vld [vmem:[%s3137_s2] ss:$0 sm:$0xff] }
  0x54   :  { %2351 = vmatpush3.bf16.msra.mxu0 %v2522_v30 }
  0x55   :  { %2373 = vmatpush3.bf16.msra.mxu1 %v2523_v31  ;;  %2352 = vmatprep.subr.bf16.mxu0 %v2524_v32  ;;  %v3027_v32 = vshrl.u32 %v1451_v26, 7 }
  0x56   :  { %2374 = vmatprep.subr.bf16.mxu1 %v2525_v33  ;;  %v1538_v33 = vunpack.c.0.s8 %v1537_v28 }
  0x58   :  { %2353 = vmatpush3.bf16.msra.mxu0 %v2526_v34 }
  0x59   :  { %2375 = vmatpush3.bf16.msra.mxu1 %v2527_v35  ;;  %2354 = vmatprep.subr.bf16.mxu0 %v2528_v36  ;;  %v1443_v36 = vld [vmem:[%s3138_s3] sm:$0xff] }
  0x5a   :  { %2376 = vmatprep.subr.bf16.mxu1 %v2529_v37 }
  0x5c   :  { %2355 = vmatpush3.bf16.msra.mxu0 %v2530_v38 }
  0x5d   :  { %2377 = vmatpush3.bf16.msra.mxu1 %v2531_v39  ;;  %2356 = vmatprep.subr.bf16.mxu0 %v2532_v40  ;;  %v1541_v39 = vsub.s32 %v1538_v33, %v3027_v32  ;;  %v1535_v40 = vcombine.high %v1443_v36, %v1443_v36 }
  0x5e   :  { %2378 = vmatprep.subr.bf16.mxu1 %v2533_v41 }
  0x5f   :  { %v1542_v44 = vrot.slane %v1443_v36, %v1541_v39  ;;  %v1549_v45 = vrot.slane %v1535_v40, %v1541_v39 }
  0x60   :  { %2357 = vmatpush3.bf16.msra.mxu0 %v2534_v42 }
  0x61   :  { %2379 = vmatpush3.bf16.msra.mxu1 %v2535_v43  ;;  %2386 = vmatprep.subr.bf16.mxu0 %v2540_v50  ;;  %v1550_v47 = vcombine.high %v1542_v44, %v1542_v44  ;;  %v1609_v49 = vsel %vm1607_vm0, %v1542_v44, 0  ;;  %v1615_v50 = vsel %vm1607_vm0, %v1549_v45, 0 }
  0x62   :  { %2408 = vmatprep.subr.bf16.mxu1 %v2541_v51  ;;  %v1444_v51 = vld [vmem:[%s3138_s3 + $0x8] sm:$0xff] }
  0x63   :  { %1309 = vmatmul.mubr.bf16.vlgmr.msra.gmra.mxu0 %v2085_v46 }
  0x64   :  { %1349 = vmatmul.mubr.bf16.vlgmr.msra.gmra.mxu1 %v2087_v48  ;;  %2387 = vmatpush3.bf16.msra.mxu0 %v2542_v52  ;;  %v1551_v48 = vcombine.high %v1549_v45, %v1549_v45  ;;  %v2585_v52 = vmov 0  }
  0x65   :  { %2409 = vmatpush3.bf16.msra.mxu1 %v2543_v53  ;;  %2388 = vmatprep.subr.bf16.mxu0 %v2544_v54  ;;  %v1559_v53 = vrot.slane %v1444_v51, %v1541_v39  ;;  %v1552_v54 = vcombine.high %v1444_v51, %v1444_v51 }
  0x66   :  { %2410 = vmatprep.subr.bf16.mxu1 %v2545_v55  ;;  %1388 = vmatprep.mubr.bf16.mxu0 %v2090_v21 }
  0x67   :  { %1428 = vmatprep.mubr.bf16.mxu1 %v2092_v23  ;;  %v1567_v55 = vcombine.high %v1559_v53, %v1559_v53  ;;  %v1621_v44 = vsel %vm1607_vm0, %v1559_v53, 0 }
  0x68   :  { %2389 = vmatpush3.bf16.msra.mxu0 %v2546_v56  ;;  %v1566_v56 = vrot.slane %v1552_v54, %v1541_v39 }
  0x69   :  { %2411 = vmatpush3.bf16.msra.mxu1 %v2547_v57  ;;  %2390 = vmatprep.subr.bf16.mxu0 %v2548_v58  ;;  %v1445_v57 = vld [vmem:[%s3138_s3 + $0x10] sm:$0xff] }
  0x6a   :  { %2412 = vmatprep.subr.bf16.mxu1 %v2549_v59  ;;  %v1568_v58 = vcombine.high %v1566_v56, %v1566_v56  ;;  %v3046_v59 = vrot.slane %v1445_v57, %v1541_v39  ;;  %v1627_v45 = vsel %vm1607_vm0, %v1566_v56, 0  ;;  %v1461_v56 = vsub.s32 2, %v3027_v32 }
  0x6c   :  { %2391 = vmatpush3.bf16.msra.mxu0 %v2550_v60  ;;  %v1569_v60 = vcombine.high %v1445_v57, %v1445_v57  ;;  %v1447_v57 = vld [vmem:[%s3139_s4] sm:$0xff] }
  0x6d   :  { %2413 = vmatpush3.bf16.msra.mxu1 %v2551_v61  ;;  %2392 = vmatprep.subr.bf16.mxu0 %v2552_v62  ;;  %v1446_v62 = vld [vmem:[%s3138_s3 + $0x18] sm:$0xff] }
  0x6e   :  { %2414 = vmatprep.subr.bf16.mxu1 %v2553_v63  ;;  %v1583_v61 = vrot.slane %v1569_v60, %v1541_v39  ;;  %v3052_v63 = vrot.slane %v1446_v62, %v1541_v39 }
  0x70   :  { %2393 = vmatpush3.bf16.msra.mxu0 %v2554_v0  ;;  %v1586_v0 = vcombine.high %v1446_v62, %v1446_v62  ;;  %v1645_v53 = vsel %vm1607_vm0, %v3052_v63, 0 }
  0x71   :  { %2415 = vmatpush3.bf16.msra.mxu1 %v2555_v1  ;;  %2394 = vmatprep.subr.bf16.mxu0 %v2556_v2 }
  0x72   :  { %2416 = vmatprep.subr.bf16.mxu1 %v2557_v3  ;;  %v3054_v1 = vrot.slane %v1586_v0, %v1541_v39 }
  0x74   :  { %2395 = vmatpush3.bf16.msra.mxu0 %v2558_v4  ;;  %v1602_v51 = vcombine.high %v3054_v1, %v3054_v1  ;;  %v1651_v54 = vsel %vm1607_vm0, %v3054_v1, 0  ;;  %v1469_v1 = vsub.s32 4, %v3027_v32 }
  0x75   :  { %2417 = vmatpush3.bf16.msra.mxu1 %v2559_v5  ;;  %2396 = vmatprep.subr.bf16.mxu0 %v2560_v6 }
  0x76   :  { %2418 = vmatprep.subr.bf16.mxu1 %v2561_v7 }
  0x78   :  { %2397 = vmatpush3.bf16.msra.mxu0 %v2562_v8 }
  0x79   :  { %2419 = vmatpush3.bf16.msra.mxu1 %v2563_v9  ;;  %2398 = vmatprep.subr.bf16.mxu0 %v2564_v10 }
  0x7a   :  { %2420 = vmatprep.subr.bf16.mxu1 %v2565_v11 }
  0x7c   :  { %2399 = vmatpush3.bf16.msra.mxu0 %v2566_v12 }
  0x7d   :  { %2421 = vmatpush3.bf16.msra.mxu1 %v2567_v13  ;;  %2400 = vmatprep.subr.bf16.mxu0 %v2568_v14 }
  0x7e   :  { %2422 = vmatprep.subr.bf16.mxu1 %v2569_v15 }
  0x80   :  { %2401 = vmatpush3.bf16.msra.mxu0 %v2570_v16 }
  0x81   :  { %2423 = vmatpush3.bf16.msra.mxu1 %v2571_v17  ;;  %2222 = vmatprep.subr.msk.bf16.mxu0 %vm1607_vm0, %v1550_v47  ;;  %v1585_v47 = vcombine.high %v1583_v61, %v1583_v61 }
  0x82   :  { %2224 = vmatprep.subr.msk.bf16.mxu1 %vm1607_vm0, %v1551_v48  ;;  %v1633_v48 = vsel %vm1607_vm0, %v3046_v59, 0 }
  0x83   :  { %1389 = vmatmul.mubr.bf16.vlgmr.msra.gmra.mxu0 %v2089_v20 }
  0x84   :  { %1429 = vmatmul.mubr.bf16.vlgmr.msra.gmra.mxu1 %v2091_v22  ;;  %1671 = vmatpush1.bf16.msra.mxu0 %v1609_v49  ;;  %v1639_v49 = vsel %vm1607_vm0, %v1583_v61, 0  ;;  %v1462_v61 = vrot.slane %v1447_v57, %v1461_v56 }
  0x85   :  { %1712 = vmatpush1.bf16.msra.mxu1 %v1615_v50  ;;  %1688 = vmatprep.mubr.bf16.mxu0 %v2585_v52  ;;  %v1601_v50 = vcombine.high %v3052_v63, %v3052_v63 }
  0x86   :  { %1729 = vmatprep.mubr.bf16.mxu1 %v2585_v52  ;;  %2226 = vmatprep.subr.msk.bf16.mxu0 %vm1607_vm0, %v1567_v55  ;;  %v1453_v55 = vsub.s32 0, %v3027_v32 }
  0x87   :  { %2228 = vmatprep.subr.msk.bf16.mxu1 %vm1607_vm0, %v1568_v58  ;;  %v1457_v58 = vsub.s32 1, %v3027_v32 }
  0x88   :  { %v1454_v60 = vrot.slane %v1447_v57, %v1453_v55 }
  0x89   :  { %v1458_v62 = vrot.slane %v1447_v57, %v1457_v58 }
  0xe3   :  { %v2270_v24 = vpop.f32.mrf.mxu0 }
  0xe4   :  { %v2292_v25 = vpop.f32.mrf.mxu1 }
  0xe5   :  { %v2271_v30 = vpop.f32.mrf.mxu0 }
  0xe6   :  { %v2293_v31 = vpop.f32.mrf.mxu1  ;;  %v2272_v34 = vadd.f32 %v2271_v30, %v2270_v24 }
  0xe7   :  { %v2294_v35 = vadd.f32 %v2293_v31, %v2292_v25  ;;  %v2273_v37 = vpop.f32.mrf.mxu0 }
  0xe8   :  { %v2295_v38 = vpop.f32.mrf.mxu1  ;;  %v1151_v41 = vadd.f32 %v2272_v34, %v2076_v29 }
  0xe9   :  { %v2274_v42 = vpop.f32.mrf.mxu0 }
  0xea   :  { %v2296_v43 = vpop.f32.mrf.mxu1  ;;  %v1191_v46 = vadd.f32 %v2294_v35, %v1151_v41 }
 0x103   :  { %v2314_v2 = vpop.f32.mrf.mxu0 }
 0x104   :  { %v2336_v3 = vpop.f32.mrf.mxu1 }
 0x105   :  { %v2315_v4 = vpop.f32.mrf.mxu0 }
 0x106   :  { %v2337_v5 = vpop.f32.mrf.mxu1  ;;  %v2316_v18 = vadd.f32 %v2315_v4, %v2314_v2  ;;  %v1477_v2 = vsub.s32 6, %v3027_v32 }
 0x107   :  { %v2317_v6 = vpop.f32.mrf.mxu0  ;;  %v2338_v20 = vadd.f32 %v2337_v5, %v2336_v3 }
 0x108   :  { %v2339_v7 = vpop.f32.mrf.mxu1  ;;  %v1231_v19 = vadd.f32 %v2316_v18, %v1191_v46  ;;  %v1584_v46 = vcombine.high %v3046_v59, %v3046_v59  ;;  %v1465_v59 = vsub.s32 3, %v3027_v32 }
 0x109   :  { %v2318_v8 = vpop.f32.mrf.mxu0 }
 0x10a   :  { %v2340_v9 = vpop.f32.mrf.mxu1  ;;  %v1271_v22 = vadd.f32 %v2338_v20, %v1231_v19 }
 0x10b   :  { %v1473_v9 = vsub.s32 5, %v3027_v32 }
 0x123   :  { %v2358_v10 = vpop.f32.mrf.mxu0 }
 0x124   :  { %v2380_v11 = vpop.f32.mrf.mxu1 }
 0x125   :  { %v2359_v12 = vpop.f32.mrf.mxu0 }
 0x126   :  { %v2381_v13 = vpop.f32.mrf.mxu1  ;;  %v2360_v21 = vadd.f32 %v2359_v12, %v2358_v10  ;;  %v1481_v10 = vsub.s32 7, %v3027_v32 }
 0x127   :  { %v2361_v14 = vpop.f32.mrf.mxu0  ;;  %v2382_v24 = vadd.f32 %v2381_v13, %v2380_v11  ;;  %v1470_v13 = vrot.slane %v1447_v57, %v1469_v1 }
 0x128   :  { %v2383_v15 = vpop.f32.mrf.mxu1  ;;  %v1311_v23 = vadd.f32 %v2360_v21, %v1271_v22  ;;  %v1478_v14 = vrot.slane %v1447_v57, %v1477_v2 }
 0x129   :  { %v2362_v16 = vpop.f32.mrf.mxu0 }
 0x12a   :  { %v2384_v17 = vpop.f32.mrf.mxu1  ;;  %v1351_v28 = vadd.f32 %v2382_v24, %v1311_v23  ;;  %v1474_v23 = vrot.slane %v1447_v57, %v1473_v9  ;;  %v1482_v24 = vrot.slane %v1447_v57, %v1481_v10 }
 0x143   :  { %v2402_v25 = vpop.f32.mrf.mxu0 }
 0x144   :  { %v2424_v26 = vpop.f32.mrf.mxu1 }
 0x145   :  { %v2403_v27 = vpop.f32.mrf.mxu0 }
 0x146   :  { %v2404_v29 = vadd.f32 %v2403_v27, %v2402_v25  ;;  %v2425_v30 = vpop.f32.mrf.mxu1 }
 0x147   :  { %v2405_v31 = vpop.f32.mrf.mxu0  ;;  %v2426_v34 = vadd.f32 %v2425_v30, %v2424_v26 }
 0x148   :  { %v1391_v33 = vadd.f32 %v2404_v29, %v1351_v28  ;;  %v2427_v35 = vpop.f32.mrf.mxu1  ;;  %v1448_v29 = vld [vmem:[%s3139_s4 + $0x8] sm:$0xff] }
 0x149   :  { %v2406_v36 = vpop.f32.mrf.mxu0 }
 0x14a   :  { %v1431_v37 = vadd.f32 %v2426_v34, %v1391_v33  ;;  %v2428_v38 = vpop.f32.mrf.mxu1 }
 0x14b   :  { %v1494_v38 = vrot.slane %v1448_v29, %v1461_v56 }
 0x14c   :  { %v2221_v39 = vmul.f32 -1.442695, %v1431_v37  ;;  %v1486_v37 = vrot.slane %v1448_v29, %v1453_v55 }
 0x14e   :  { %2580 = vpow2.f32 %v2221_v39 }
 0x15b   :  { %v2581_v40 = vpop.eup %2580 }
 0x15c   :  { %v1439_v41 = vadd.f32 1.0, %v2581_v40 }
 0x15e   :  { %2582 = vrcp.f32 %v1439_v41 }
 0x16b   :  { %v2583_v42 = vpop.eup %2582 }
 0x16c   :  { %v1442_v43 = vpack.c.bf16 %v2583_v42, %v2583_v42 }
 0x16e   :  { %2223 = vmatmul.mubr.msk.bf16.vlgmr.msra.gmra.mxu0 %vm1603_vm1, %v1442_v43  ;;  %2225 = vmatmul.mubr.msk.bf16.vlgmr.msra.gmra.mxu1 %vm1603_vm1, %v1442_v43 }
 0x16f   :  { %1753 = vmatpush1.bf16.msra.mxu0 %v1621_v44  ;;  %1794 = vmatpush1.bf16.msra.mxu1 %v1627_v45 }
 0x170   :  { %1770 = vmatprep.mubr.bf16.mxu0 %v2585_v52  ;;  %1811 = vmatprep.mubr.bf16.mxu1 %v2585_v52 }
 0x171   :  { %2230 = vmatprep.subr.msk.bf16.mxu0 %vm1607_vm0, %v1584_v46  ;;  %2232 = vmatprep.subr.msk.bf16.mxu1 %vm1607_vm0, %v1585_v47  ;;  %v1490_v47 = vrot.slane %v1448_v29, %v1457_v58  ;;  %v1502_v58 = vrot.slane %v1448_v29, %v1469_v1 }
 0x176   :  { %2227 = vmatmul.mubr.msk.bf16.vlgmr.msra.gmra.mxu0 %vm1603_vm1, %v1442_v43  ;;  %2229 = vmatmul.mubr.msk.bf16.vlgmr.msra.gmra.mxu1 %vm1603_vm1, %v1442_v43 }
 0x177   :  { %1835 = vmatpush1.bf16.msra.mxu0 %v1633_v48  ;;  %1876 = vmatpush1.bf16.msra.mxu1 %v1639_v49  ;;  %v1498_v48 = vrot.slane %v1448_v29, %v1465_v59 }
 0x178   :  { %1852 = vmatprep.mubr.bf16.mxu0 %v2585_v52  ;;  %1893 = vmatprep.mubr.bf16.mxu1 %v2585_v52 }
 0x179   :  { %2234 = vmatprep.subr.msk.bf16.mxu0 %vm1607_vm0, %v1601_v50  ;;  %2236 = vmatprep.subr.msk.bf16.mxu1 %vm1607_vm0, %v1602_v51 }
 0x17e   :  { %2231 = vmatmul.mubr.msk.bf16.vlgmr.msra.gmra.mxu0 %vm1603_vm1, %v1442_v43  ;;  %2233 = vmatmul.mubr.msk.bf16.vlgmr.msra.gmra.mxu1 %vm1603_vm1, %v1442_v43 }
 0x17f   :  { %1917 = vmatpush1.bf16.msra.mxu0 %v1645_v53  ;;  %1958 = vmatpush1.bf16.msra.mxu1 %v1651_v54 }
 0x180   :  { %1934 = vmatprep.mubr.bf16.mxu0 %v2585_v52  ;;  %1975 = vmatprep.mubr.bf16.mxu1 %v2585_v52  ;;  %v1466_v52 = vrot.slane %v1447_v57, %v1465_v59  ;;  %v1510_v59 = vrot.slane %v1448_v29, %v1477_v2 }
 0x186   :  { %2235 = vmatmul.mubr.msk.bf16.vlgmr.msra.gmra.mxu0 %vm1603_vm1, %v1442_v43  ;;  %2237 = vmatmul.mubr.msk.bf16.vlgmr.msra.gmra.mxu1 %vm1603_vm1, %v1442_v43 }
 0x22e   :  { %v1690_v63 = vpop.f32.mrf.mxu0  ;;  %v1731_v0 = vpop.f32.mrf.mxu1 }
 0x22f   :  { %v1691_v3 = vadd.f32 %v1690_v63, %v1454_v60  ;;  %v1732_v4 = vadd.f32 %v1731_v0, %v1462_v61 }
 0x230   :  { %v1692_v5 = vpop.f32.mrf.mxu0  ;;  %v1733_v6 = vpop.f32.mrf.mxu1 }
 0x231   :  { %v1693_v7 = vadd.f32 %v1692_v5, %v1458_v62  ;;  %v1734_v8 = vadd.f32 %v1733_v6, %v1466_v52  ;;  %v1984_v15 = vmax.f32 %v1691_v3, 0.0  ;;  %v1986_v16 = vmax.f32 %v1732_v4, 0.0 }
 0x232   :  { %v1694_v11 = vpop.f32.mrf.mxu0  ;;  %v1735_v12 = vpop.f32.mrf.mxu1 }
 0x233   :  { %v1985_v17 = vmax.f32 %v1693_v7, 0.0  ;;  %v1987_v18 = vmax.f32 %v1734_v8, 0.0  ;;  %v1506_v7 = vrot.slane %v1448_v29, %v1473_v9  ;;  %v1514_v8 = vrot.slane %v1448_v29, %v1481_v10 }
 0x234   :  { %v1695_v19 = vpop.f32.mrf.mxu0  ;;  %v1736_v20 = vpop.f32.mrf.mxu1 }
 0x235   :  { %v2246_v21 = vpack.c.bf16 %v1985_v17, %v1984_v15  ;;  %v2247_v22 = vpack.c.bf16 %v1987_v18, %v1986_v16 }
 0x236   :  { %v1772_v25 = vpop.f32.mrf.mxu0  ;;  %v1813_v26 = vpop.f32.mrf.mxu1 }
 0x237   :  { %2064 = vst [vmem:[%s3140_s5] sm:$0xff] %v2246_v21  ;;  %2065 = vst [vmem:[%s3140_s5 + $0x8] sm:$0xff] %v2247_v22  ;;  %v1773_v27 = vadd.f32 %v1772_v25, %v1470_v13  ;;  %v1814_v28 = vadd.f32 %v1813_v26, %v1478_v14 }
 0x238   :  { %v1774_v30 = vpop.f32.mrf.mxu0  ;;  %v1815_v31 = vpop.f32.mrf.mxu1 }
 0x239   :  { %v1775_v33 = vadd.f32 %v1774_v30, %v1474_v23  ;;  %v1816_v34 = vadd.f32 %v1815_v31, %v1482_v24  ;;  %v1988_v39 = vmax.f32 %v1773_v27, 0.0  ;;  %v1990_v40 = vmax.f32 %v1814_v28, 0.0 }
 0x23a   :  { %v1776_v35 = vpop.f32.mrf.mxu0  ;;  %v1817_v36 = vpop.f32.mrf.mxu1 }
 0x23b   :  { %v1989_v41 = vmax.f32 %v1775_v33, 0.0  ;;  %v1991_v42 = vmax.f32 %v1816_v34, 0.0 }
 0x23c   :  { %v1777_v43 = vpop.f32.mrf.mxu0  ;;  %v1818_v44 = vpop.f32.mrf.mxu1 }
 0x23d   :  { %v2248_v45 = vpack.c.bf16 %v1989_v41, %v1988_v39  ;;  %v2249_v46 = vpack.c.bf16 %v1991_v42, %v1990_v40 }
 0x23e   :  { %v1854_v49 = vpop.f32.mrf.mxu0  ;;  %v1895_v50 = vpop.f32.mrf.mxu1 }
 0x23f   :  { %2066 = vst [vmem:[%s3140_s5 + $0x10] sm:$0xff] %v2248_v45  ;;  %2067 = vst [vmem:[%s3140_s5 + $0x18] sm:$0xff] %v2249_v46  ;;  %v1855_v51 = vadd.f32 %v1854_v49, %v1486_v37  ;;  %v1896_v53 = vadd.f32 %v1895_v50, %v1494_v38 }
 0x240   :  { %v1856_v54 = vpop.f32.mrf.mxu0  ;;  %v1897_v55 = vpop.f32.mrf.mxu1 }
 0x241   :  { %v1857_v56 = vadd.f32 %v1856_v54, %v1490_v47  ;;  %v1898_v57 = vadd.f32 %v1897_v55, %v1498_v48  ;;  %v1992_v62 = vmax.f32 %v1855_v51, 0.0  ;;  %v1994_v52 = vmax.f32 %v1896_v53, 0.0 }
 0x242   :  { %v1858_v60 = vpop.f32.mrf.mxu0  ;;  %v1899_v61 = vpop.f32.mrf.mxu1 }
 0x243   :  { %v1993_v63 = vmax.f32 %v1857_v56, 0.0  ;;  %v1995_v0 = vmax.f32 %v1898_v57, 0.0 }
 0x244   :  { %v1859_v3 = vpop.f32.mrf.mxu0  ;;  %v1900_v4 = vpop.f32.mrf.mxu1 }
 0x245   :  { %v2250_v5 = vpack.c.bf16 %v1993_v63, %v1992_v62  ;;  %v2251_v6 = vpack.c.bf16 %v1995_v0, %v1994_v52 }
 0x246   :  { %v1936_v11 = vpop.f32.mrf.mxu0  ;;  %v1977_v12 = vpop.f32.mrf.mxu1 }
 0x247   :  { %2068 = vst [vmem:[%s3140_s5 + $0x20] sm:$0xff] %v2250_v5  ;;  %2069 = vst [vmem:[%s3140_s5 + $0x28] sm:$0xff] %v2251_v6  ;;  %v1937_v1 = vadd.f32 %v1936_v11, %v1502_v58  ;;  %v1978_v2 = vadd.f32 %v1977_v12, %v1510_v59 }
 0x248   :  { %v1938_v13 = vpop.f32.mrf.mxu0  ;;  %v1979_v14 = vpop.f32.mrf.mxu1 }
 0x249   :  { %v1939_v15 = vadd.f32 %v1938_v13, %v1506_v7  ;;  %v1980_v16 = vadd.f32 %v1979_v14, %v1514_v8  ;;  %v1996_v32 = vmax.f32 %v1937_v1, 0.0  ;;  %v1998_v10 = vmax.f32 %v1978_v2, 0.0 }
 0x24a   :  { %v1940_v9 = vpop.f32.mrf.mxu0  ;;  %v1981_v17 = vpop.f32.mrf.mxu1 }
 0x24b   :  { %v1997_v18 = vmax.f32 %v1939_v15, 0.0  ;;  %v1999_v19 = vmax.f32 %v1980_v16, 0.0 }
 0x24c   :  { %v1941_v20 = vpop.f32.mrf.mxu0  ;;  %v1982_v21 = vpop.f32.mrf.mxu1 }
 0x24d   :  { %v2252_v22 = vpack.c.bf16 %v1997_v18, %v1996_v32  ;;  %v2253_v23 = vpack.c.bf16 %v1999_v19, %v1998_v10 }
 0x24f   :  { %2070 = vst [vmem:[%s3140_s5 + $0x30] sm:$0xff] %v2252_v22  ;;  %2071 = vst [vmem:[%s3140_s5 + $0x38] sm:$0xff] %v2253_v23 }

// kernel: forward.13
= control target key start
LH: loop header
LB: loop body
LE: loop exit
PB: predicated region body
PF: predicated region fallthrough
CT: control target
= control target key end

     0   :  { %s836_s1 = inlined_call_operand.vmem [shape: bf16[256,128], index: 1, kind: input, shape index: {}]   ;;  %s837_s0 = inlined_call_operand.vmem [shape: bf16[128,256], index: 0, kind: input, shape index: {}]   ;;  %s838_s2 = inlined_call_operand.vmem [shape: f32[1,128], index: 2, kind: input, shape index: {}]   ;;  %s839_s3 = inlined_call_operand.vmem [shape: bf16[128,128], index: 3, kind: output, shape index: {}]  }
   0x1   :  { %v635_v0 = vld [vmem:[%s836_s1 + $0x78] sm:$0xff]   ;;  %v637_v2 = vld [vmem:[%s836_s1 + $0x70] sm:$0xff]   ;;  %v639_v4 = vld [vmem:[%s836_s1 + $0x68] sm:$0xff]  }
   0x2   :  { %v636_v1 = vld [vmem:[%s836_s1 + $0x38] sm:$0xff]   ;;  %555 = vmatprep.subr.bf16.mxu0 %v635_v0  ;;  %619 = vmatprep.subr.bf16.mxu1 %v635_v0  ;;  %v638_v3 = vld [vmem:[%s836_s1 + $0x30] sm:$0xff]   ;;  %v640_v5 = vld [vmem:[%s836_s1 + $0x28] sm:$0xff]  }
   0x3   :  { %556 = vmatpush3.bf16.msra.mxu0 %v636_v1  ;;  %627 = vmatpush3.bf16.msra.mxu1 %v636_v1  ;;  %v641_v6 = vld [vmem:[%s836_s1 + $0x60] sm:$0xff]   ;;  %v643_v8 = vld [vmem:[%s836_s1 + $0x58] sm:$0xff]   ;;  %v645_v10 = vld [vmem:[%s836_s1 + $0x50] sm:$0xff]  }
   0x4   :  { %557 = vmatprep.subr.bf16.mxu0 %v637_v2  ;;  %620 = vmatprep.subr.bf16.mxu1 %v637_v2  ;;  %v642_v7 = vld [vmem:[%s836_s1 + $0x20] sm:$0xff]   ;;  %v644_v9 = vld [vmem:[%s836_s1 + $0x18] sm:$0xff]   ;;  %v646_v13 = vld [vmem:[%s836_s1 + $0x10] sm:$0xff]  }
   0x5   :  { %v653_v11 = vld [vmem:[%s837_s0 + $0x4] ss:$8 sps:$4 sm:$0xff]   ;;  %v651_v18 = vld [vmem:[%s837_s0] ss:$8 sps:$4 sm:$0xff]   ;;  %v657_v20 = vld [vmem:[%s837_s0 + $0x14] ss:$8 sps:$4 sm:$0xff]  }
   0x6   :  { %v656_v12 = vld [vmem:[%s837_s0 + $0x44] ss:$8 sps:$4 sm:$0xff]   ;;  %278 = vmatprep.mubr.bf16.mxu0 %v653_v11  ;;  %v654_v19 = vld [vmem:[%s837_s0 + $0x40] ss:$8 sps:$4 sm:$0xff]   ;;  %v659_v21 = vld [vmem:[%s837_s0 + $0x54] ss:$8 sps:$4 sm:$0xff]  }
   0x7   :  { %558 = vmatpush3.bf16.msra.mxu0 %v638_v3  ;;  %628 = vmatpush3.bf16.msra.mxu1 %v638_v3  ;;  %v647_v14 = vld [vmem:[%s836_s1 + $0x48] sm:$0xff]   ;;  %v649_v16 = vld [vmem:[%s836_s1 + $0x40] sm:$0xff]   ;;  %v661_v22 = vld [vmem:[%s837_s0 + $0x10] ss:$8 sps:$4 sm:$0xff]  }
   0x8   :  { %559 = vmatprep.subr.bf16.mxu0 %v639_v4  ;;  %621 = vmatprep.subr.bf16.mxu1 %v639_v4  ;;  %v648_v15 = vld [vmem:[%s836_s1 + $0x8] sm:$0xff]   ;;  %v650_v17 = vld [vmem:[%s836_s1] sm:$0xff]   ;;  %v662_v23 = vld [vmem:[%s837_s0 + $0x50] ss:$8 sps:$4 sm:$0xff]  }
   0x9   :  { %310 = vmatprep.mubr.bf16.mxu1 %v656_v12  ;;  %v663_v24 = vld [vmem:[%s837_s0 + $0x24] ss:$8 sps:$4 sm:$0xff]   ;;  %v667_v26 = vld [vmem:[%s837_s0 + $0x20] ss:$8 sps:$4 sm:$0xff]   ;;  %v669_v28 = vld [vmem:[%s837_s0 + $0x34] ss:$8 sps:$4 sm:$0xff]  }
   0xa   :  { %v665_v25 = vld [vmem:[%s837_s0 + $0x64] ss:$8 sps:$4 sm:$0xff]   ;;  %v668_v27 = vld [vmem:[%s837_s0 + $0x60] ss:$8 sps:$4 sm:$0xff]   ;;  %v671_v29 = vld [vmem:[%s837_s0 + $0x74] ss:$8 sps:$4 sm:$0xff]  }
   0xb   :  { %560 = vmatpush3.bf16.msra.mxu0 %v640_v5  ;;  %629 = vmatpush3.bf16.msra.mxu1 %v640_v5  ;;  %v673_v30 = vld [vmem:[%s837_s0 + $0x30] ss:$8 sps:$4 sm:$0xff]   ;;  %v794_v36 = vld [vmem:[%s838_s2] ss:$0 sm:$0xff] }
   0xc   :  { %561 = vmatprep.subr.bf16.mxu0 %v641_v6  ;;  %622 = vmatprep.subr.bf16.mxu1 %v641_v6  ;;  %v674_v31 = vld [vmem:[%s837_s0 + $0x70] ss:$8 sps:$4 sm:$0xff]  }
   0xf   :  { %562 = vmatpush3.bf16.msra.mxu0 %v642_v7  ;;  %630 = vmatpush3.bf16.msra.mxu1 %v642_v7 }
  0x10   :  { %563 = vmatprep.subr.bf16.mxu0 %v643_v8  ;;  %623 = vmatprep.subr.bf16.mxu1 %v643_v8 }
  0x13   :  { %564 = vmatpush3.bf16.msra.mxu0 %v644_v9  ;;  %631 = vmatpush3.bf16.msra.mxu1 %v644_v9 }
  0x14   :  { %565 = vmatprep.subr.bf16.mxu0 %v645_v10  ;;  %624 = vmatprep.subr.bf16.mxu1 %v645_v10 }
  0x17   :  { %566 = vmatpush3.bf16.msra.mxu0 %v646_v13  ;;  %632 = vmatpush3.bf16.msra.mxu1 %v646_v13 }
  0x18   :  { %567 = vmatprep.subr.bf16.mxu0 %v647_v14  ;;  %625 = vmatprep.subr.bf16.mxu1 %v647_v14 }
  0x1b   :  { %568 = vmatpush3.bf16.msra.mxu0 %v648_v15  ;;  %633 = vmatpush3.bf16.msra.mxu1 %v648_v15 }
  0x1c   :  { %569 = vmatprep.subr.bf16.mxu0 %v649_v16  ;;  %626 = vmatprep.subr.bf16.mxu1 %v649_v16 }
  0x1f   :  { %570 = vmatpush3.bf16.msra.mxu0 %v650_v17  ;;  %634 = vmatpush3.bf16.msra.mxu1 %v650_v17 }
  0x22   :  { %279 = vmatmul.mubr.bf16.vlgmr.msra.gmra.mxu0 %v651_v18  ;;  %311 = vmatmul.mubr.bf16.vlgmr.msra.gmra.mxu1 %v654_v19 }
  0x23   :  { %286 = vmatprep.mubr.bf16.mxu0 %v657_v20  ;;  %318 = vmatprep.mubr.bf16.mxu1 %v659_v21 }
  0x2a   :  { %287 = vmatmul.mubr.bf16.gmra.mxu0 %v661_v22  ;;  %319 = vmatmul.mubr.bf16.gmra.mxu1 %v662_v23 }
  0x2b   :  { %294 = vmatprep.mubr.bf16.mxu0 %v663_v24  ;;  %326 = vmatprep.mubr.bf16.mxu1 %v665_v25 }
  0x32   :  { %295 = vmatmul.mubr.bf16.gmra.mxu0 %v667_v26  ;;  %327 = vmatmul.mubr.bf16.gmra.mxu1 %v668_v27 }
  0x33   :  { %302 = vmatprep.mubr.bf16.mxu0 %v669_v28  ;;  %334 = vmatprep.mubr.bf16.mxu1 %v671_v29 }
  0x3a   :  { %303 = vmatmul.mubr.bf16.gmra.mxu0 %v673_v30  ;;  %335 = vmatmul.mubr.bf16.gmra.mxu1 %v674_v31 }
  0xe2   :  { %v571_v32 = vpop.f32.mrf.mxu0  ;;  %v595_v33 = vpop.f32.mrf.mxu1 }
  0xe4   :  { %v572_v34 = vpop.f32.mrf.mxu0  ;;  %v596_v35 = vpop.f32.mrf.mxu1 }
  0xe5   :  { %v573_v37 = vadd.f32 %v572_v34, %v571_v32  ;;  %v597_v38 = vadd.f32 %v596_v35, %v595_v33 }
  0xe6   :  { %v574_v39 = vpop.f32.mrf.mxu0  ;;  %v598_v40 = vpop.f32.mrf.mxu1 }
  0xe7   :  { %v281_v41 = vadd.f32 %v573_v37, %v794_v36  ;;  %v313_v42 = vadd.f32 %v597_v38, %v794_v36 }
  0xe8   :  { %v575_v43 = vpop.f32.mrf.mxu0  ;;  %v599_v44 = vpop.f32.mrf.mxu1 }
  0xe9   :  { %v576_v45 = vadd.f32 %v575_v43, %v574_v39  ;;  %v600_v46 = vadd.f32 %v599_v44, %v598_v40  ;;  %v343_v51 = vmax.f32 %v281_v41, 0.0  ;;  %v351_v52 = vmax.f32 %v313_v42, 0.0 }
  0xea   :  { %v577_v47 = vpop.f32.mrf.mxu0  ;;  %v601_v48 = vpop.f32.mrf.mxu1 }
  0xeb   :  { %v284_v49 = vadd.f32 %v576_v45, %v794_v36  ;;  %v316_v50 = vadd.f32 %v600_v46, %v794_v36 }
  0xec   :  { %v578_v53 = vpop.f32.mrf.mxu0  ;;  %v602_v54 = vpop.f32.mrf.mxu1 }
  0xed   :  { %v344_v55 = vmax.f32 %v284_v49, 0.0  ;;  %v352_v56 = vmax.f32 %v316_v50, 0.0  ;;  %v579_v57 = vadd.f32 %v578_v53, %v577_v47  ;;  %v603_v58 = vadd.f32 %v602_v54, %v601_v48 }
  0xee   :  { %v580_v59 = vpop.f32.mrf.mxu0  ;;  %v604_v60 = vpop.f32.mrf.mxu1 }
  0xef   :  { %v511_v61 = vpack.c.bf16 %v344_v55, %v343_v51  ;;  %v531_v62 = vpack.c.bf16 %v352_v56, %v351_v52  ;;  %v289_v63 = vadd.f32 %v579_v57, %v794_v36  ;;  %v321_v0 = vadd.f32 %v603_v58, %v794_v36 }
  0xf0   :  { %v581_v1 = vpop.f32.mrf.mxu0  ;;  %v605_v2 = vpop.f32.mrf.mxu1 }
  0xf1   :  { %512 = vst [vmem:[%s839_s3] sm:$0xff] %v511_v61   ;;  %551 = vst [vmem:[%s839_s3 + $0x20] sm:$0xff] %v531_v62   ;;  %v582_v3 = vadd.f32 %v581_v1, %v580_v59  ;;  %v606_v4 = vadd.f32 %v605_v2, %v604_v60  ;;  %v345_v9 = vmax.f32 %v289_v63, 0.0  ;;  %v353_v10 = vmax.f32 %v321_v0, 0.0 }
  0xf2   :  { %v583_v5 = vpop.f32.mrf.mxu0  ;;  %v607_v6 = vpop.f32.mrf.mxu1 }
  0xf3   :  { %v292_v7 = vadd.f32 %v582_v3, %v794_v36  ;;  %v324_v8 = vadd.f32 %v606_v4, %v794_v36 }
  0xf4   :  { %v584_v11 = vpop.f32.mrf.mxu0  ;;  %v608_v12 = vpop.f32.mrf.mxu1 }
  0xf5   :  { %v346_v13 = vmax.f32 %v292_v7, 0.0  ;;  %v354_v14 = vmax.f32 %v324_v8, 0.0  ;;  %v585_v15 = vadd.f32 %v584_v11, %v583_v5  ;;  %v609_v16 = vadd.f32 %v608_v12, %v607_v6 }
  0xf6   :  { %v586_v17 = vpop.f32.mrf.mxu0  ;;  %v610_v18 = vpop.f32.mrf.mxu1 }
  0xf7   :  { %v516_v19 = vpack.c.bf16 %v346_v13, %v345_v9  ;;  %v536_v20 = vpack.c.bf16 %v354_v14, %v353_v10  ;;  %v297_v21 = vadd.f32 %v585_v15, %v794_v36  ;;  %v329_v22 = vadd.f32 %v609_v16, %v794_v36 }
  0xf8   :  { %v587_v23 = vpop.f32.mrf.mxu0  ;;  %v611_v24 = vpop.f32.mrf.mxu1 }
  0xf9   :  { %548 = vst [vmem:[%s839_s3 + $0x8] sm:$0xff] %v516_v19   ;;  %552 = vst [vmem:[%s839_s3 + $0x28] sm:$0xff] %v536_v20   ;;  %v588_v25 = vadd.f32 %v587_v23, %v586_v17  ;;  %v612_v26 = vadd.f32 %v611_v24, %v610_v18  ;;  %v347_v31 = vmax.f32 %v297_v21, 0.0  ;;  %v355_v32 = vmax.f32 %v329_v22, 0.0 }
  0xfa   :  { %v589_v27 = vpop.f32.mrf.mxu0  ;;  %v613_v28 = vpop.f32.mrf.mxu1 }
  0xfb   :  { %v300_v29 = vadd.f32 %v588_v25, %v794_v36  ;;  %v332_v30 = vadd.f32 %v612_v26, %v794_v36 }
  0xfc   :  { %v590_v33 = vpop.f32.mrf.mxu0  ;;  %v614_v34 = vpop.f32.mrf.mxu1 }
  0xfd   :  { %v348_v35 = vmax.f32 %v300_v29, 0.0  ;;  %v356_v37 = vmax.f32 %v332_v30, 0.0  ;;  %v591_v38 = vadd.f32 %v590_v33, %v589_v27  ;;  %v615_v39 = vadd.f32 %v614_v34, %v613_v28 }
  0xfe   :  { %v592_v40 = vpop.f32.mrf.mxu0  ;;  %v616_v41 = vpop.f32.mrf.mxu1 }
  0xff   :  { %v521_v42 = vpack.c.bf16 %v348_v35, %v347_v31  ;;  %v541_v43 = vpack.c.bf16 %v356_v37, %v355_v32  ;;  %v305_v46 = vadd.f32 %v591_v38, %v794_v36  ;;  %v337_v47 = vadd.f32 %v615_v39, %v794_v36 }
 0x100   :  { %v593_v44 = vpop.f32.mrf.mxu0  ;;  %v617_v45 = vpop.f32.mrf.mxu1 }
 0x101   :  { %549 = vst [vmem:[%s839_s3 + $0x10] sm:$0xff] %v521_v42   ;;  %553 = vst [vmem:[%s839_s3 + $0x30] sm:$0xff] %v541_v43   ;;  %v594_v48 = vadd.f32 %v593_v44, %v592_v40  ;;  %v618_v49 = vadd.f32 %v617_v45, %v616_v41  ;;  %v349_v52 = vmax.f32 %v305_v46, 0.0  ;;  %v357_v53 = vmax.f32 %v337_v47, 0.0 }
 0x103   :  { %v308_v50 = vadd.f32 %v594_v48, %v794_v36  ;;  %v340_v51 = vadd.f32 %v618_v49, %v794_v36 }
 0x105   :  { %v350_v54 = vmax.f32 %v308_v50, 0.0  ;;  %v358_v55 = vmax.f32 %v340_v51, 0.0 }
 0x107   :  { %v526_v56 = vpack.c.bf16 %v350_v54, %v349_v52  ;;  %v546_v57 = vpack.c.bf16 %v358_v55, %v357_v53 }
 0x109   :  { %550 = vst [vmem:[%s839_s3 + $0x18] sm:$0xff] %v526_v56   ;;  %554 = vst [vmem:[%s839_s3 + $0x38] sm:$0xff] %v546_v57  }

// kernel: forward.14
= control target key start
LH: loop header
LB: loop body
LE: loop exit
PB: predicated region body
PF: predicated region fallthrough
CT: control target
= control target key end

     0   :  { %s1352_s12 = smov 0   ;;  %s1521_s0 = inlined_call_operand.vmem [shape: bf16[512,128], index: 0, kind: input, shape index: {}]   ;;  %s1522_s1 = inlined_call_operand.vmem [shape: bf16[128,4], index: 1, kind: input, shape index: {}]   ;;  %s1523_s2 = inlined_call_operand.vmem [shape: f32[1,4], index: 2, kind: input, shape index: {}]   ;;  %s1524_s3 = inlined_call_operand.vmem [shape: bf16[512,4], index: 3, kind: output, shape index: {}]  }
   0x1 LB: > { %s944_s13 = sadd.s32 4294967295, %s1330_s12   ;;  %p948_p0 = scmp.ge.s32.totalorder %s1330_s12, 1  ;;  %s1330_s12 = sphi %s1352_s12, %s13_s12  }
   0x2   : > { %p138_p1 = scmp.lt.s32.totalorder %s1330_s12, 3 }
   0x4   : > { %p139_p2 = pnand %p948_p0, %p138_p1 }
   0x5   : > { %s949_s16 = sshll.u32 (!%p139_p2), %s944_s13, 5 }
   0x6   : > { %142 = sbr.rel (%p139_p2) target bundleno = 321 (0x141), region = 32  ;;  %p163_p3 = scmp.lt.s32.totalorder (!%p139_p2), %s949_s16, 63 }
   0xb   : > { %v1172_v0 = vld [vmem:[%s1522_s1 + $0x38] sm:$0xff]   ;;  %v1173_v1 = vld [vmem:[%s1522_s1 + $0x30] sm:$0xff]   ;;  %s1526_s16 = smov (!%p163_p3, %s949_s16), 63  ;;  %v1174_v2 = vld [vmem:[%s1522_s1 + $0x28] sm:$0xff]   ;;  %vm855_vm0 = vcmask 27648  }
   0xc   : > { %1100 = vmatprep.subr.bf16.mxu0 %v1172_v0  ;;  %1148 = vmatprep.subr.bf16.mxu1 %v1172_v0  ;;  %s950_s21 = sshll.u32 %s1526_s16, 2  ;;  %v1175_v3 = vld [vmem:[%s1522_s1 + $0x20] sm:$0xff]   ;;  %v1176_v6 = vld [vmem:[%s1522_s1 + $0x18] sm:$0xff]   ;;  %v1177_v7 = vld [vmem:[%s1522_s1 + $0x10] sm:$0xff]  }
   0xd   : > { %1101 = vmatpush3.bf16.msra.mxu0 %v1172_v0  ;;  %1156 = vmatpush3.bf16.msra.mxu1 %v1172_v0  ;;  %s1377_s24 = scalar_lea.vmem %s1521_s0, %s950_s21  ;;  %v1178_v8 = vld [vmem:[%s1522_s1 + $0x8] sm:$0xff]   ;;  %v1179_v9 = vld [vmem:[%s1522_s1] sm:$0xff]   ;;  %s1441_s13 = scalar_lea.vmem %s1524_s3, %s950_s21 }
   0xe   : > { %1102 = vmatprep.subr.bf16.mxu0 %v1173_v1  ;;  %1149 = vmatprep.subr.bf16.mxu1 %v1173_v1  ;;  %v1180_v4 = vld [vmem:[%s1377_s24] sm:$0xff]   ;;  %v1182_v10 = vld [vmem:[%s1377_s24 + $0x8] sm:$0xff]   ;;  %v1184_v12 = vld [vmem:[%s1377_s24 + $0x10] sm:$0xff]  }
   0xf   : > { %v1181_v5 = vld [vmem:[%s1377_s24 + $0x40] sm:$0xff]   ;;  %1116 = vmatprep.mubr.bf16.mxu0 %v1180_v4  ;;  %v1183_v11 = vld [vmem:[%s1377_s24 + $0x48] sm:$0xff]   ;;  %v1185_v13 = vld [vmem:[%s1377_s24 + $0x50] sm:$0xff]  }
  0x10   : > { %1132 = vmatprep.mubr.bf16.mxu1 %v1181_v5  ;;  %v1186_v14 = vld [vmem:[%s1377_s24 + $0x18] sm:$0xff]   ;;  %v1188_v16 = vld [vmem:[%s1377_s24 + $0x20] sm:$0xff]   ;;  %v1190_v18 = vld [vmem:[%s1377_s24 + $0x28] sm:$0xff]  }
  0x11   : > { %1103 = vmatpush3.bf16.msra.mxu0 %v1173_v1  ;;  %1157 = vmatpush3.bf16.msra.mxu1 %v1173_v1  ;;  %v1187_v15 = vld [vmem:[%s1377_s24 + $0x58] sm:$0xff]   ;;  %v1189_v17 = vld [vmem:[%s1377_s24 + $0x60] sm:$0xff]   ;;  %v1191_v19 = vld [vmem:[%s1377_s24 + $0x68] sm:$0xff]  }
  0x12   : > { %1104 = vmatprep.subr.bf16.mxu0 %v1174_v2  ;;  %1150 = vmatprep.subr.bf16.mxu1 %v1174_v2  ;;  %v1192_v20 = vld [vmem:[%s1377_s24 + $0x30] sm:$0xff]   ;;  %v1194_v22 = vld [vmem:[%s1377_s24 + $0x38] sm:$0xff]   ;;  %v1413_v24 = vld [vmem:[%s1523_s2] ss:$0 sm:$0xff] }
  0x13   : > { %v1193_v21 = vld [vmem:[%s1377_s24 + $0x70] sm:$0xff]   ;;  %v1195_v23 = vld [vmem:[%s1377_s24 + $0x78] sm:$0xff]  }
  0x15   : > { %1105 = vmatpush3.bf16.msra.mxu0 %v1174_v2  ;;  %1158 = vmatpush3.bf16.msra.mxu1 %v1174_v2 }
  0x16   : > { %1106 = vmatprep.subr.bf16.mxu0 %v1175_v3  ;;  %1151 = vmatprep.subr.bf16.mxu1 %v1175_v3 }
  0x19   : > { %1107 = vmatpush3.bf16.msra.mxu0 %v1175_v3  ;;  %1159 = vmatpush3.bf16.msra.mxu1 %v1175_v3 }
  0x1a   : > { %1108 = vmatprep.subr.bf16.mxu0 %v1176_v6  ;;  %1152 = vmatprep.subr.bf16.mxu1 %v1176_v6 }
  0x1d   : > { %1109 = vmatpush3.bf16.msra.mxu0 %v1176_v6  ;;  %1160 = vmatpush3.bf16.msra.mxu1 %v1176_v6 }
  0x1e   : > { %1110 = vmatprep.subr.bf16.mxu0 %v1177_v7  ;;  %1153 = vmatprep.subr.bf16.mxu1 %v1177_v7 }
  0x21   : > { %1111 = vmatpush3.bf16.msra.mxu0 %v1177_v7  ;;  %1161 = vmatpush3.bf16.msra.mxu1 %v1177_v7 }
  0x22   : > { %1112 = vmatprep.subr.bf16.mxu0 %v1178_v8  ;;  %1154 = vmatprep.subr.bf16.mxu1 %v1178_v8 }
  0x25   : > { %1113 = vmatpush3.bf16.msra.mxu0 %v1178_v8  ;;  %1162 = vmatpush3.bf16.msra.mxu1 %v1178_v8 }
  0x26   : > { %1114 = vmatprep.subr.bf16.mxu0 %v1179_v9  ;;  %1155 = vmatprep.subr.bf16.mxu1 %v1179_v9 }
  0x29   : > { %1115 = vmatpush3.bf16.msra.mxu0 %v1179_v9  ;;  %1163 = vmatpush3.bf16.msra.mxu1 %v1179_v9 }
  0x2c   : > { %1117 = vmatmul.mubr.bf16.vlgmr.msra.gmra.mxu0 %v1182_v10  ;;  %1133 = vmatmul.mubr.bf16.vlgmr.msra.gmra.mxu1 %v1183_v11 }
  0x2d   : > { %1120 = vmatprep.mubr.bf16.mxu0 %v1184_v12  ;;  %1136 = vmatprep.mubr.bf16.mxu1 %v1185_v13 }
  0x34   : > { %1121 = vmatmul.mubr.bf16.gmra.mxu0 %v1186_v14  ;;  %1137 = vmatmul.mubr.bf16.gmra.mxu1 %v1187_v15 }
  0x35   : > { %1124 = vmatprep.mubr.bf16.mxu0 %v1188_v16  ;;  %1140 = vmatprep.mubr.bf16.mxu1 %v1189_v17 }
  0x3c   : > { %1125 = vmatmul.mubr.bf16.gmra.mxu0 %v1190_v18  ;;  %1141 = vmatmul.mubr.bf16.gmra.mxu1 %v1191_v19 }
  0x3d   : > { %1128 = vmatprep.mubr.bf16.mxu0 %v1192_v20  ;;  %1144 = vmatprep.mubr.bf16.mxu1 %v1193_v21 }
  0x44   : > { %1129 = vmatmul.mubr.bf16.gmra.mxu0 %v1194_v22  ;;  %1145 = vmatmul.mubr.bf16.gmra.mxu1 %v1195_v23 }
  0xec   : > { %v1118_v25 = vpop.f32.mrf.mxu0  ;;  %v1134_v26 = vpop.f32.mrf.mxu1 }
  0xed   : > { %v417_v27 = vadd.f32 %v1118_v25, %v1413_v24  ;;  %v481_v28 = vadd.f32 %v1134_v26, %v1413_v24 }
  0xee   : > { %v408_v29 = vpop.f32.mrf.mxu0  ;;  %v472_v30 = vpop.f32.mrf.mxu1 }
  0xef   : > { %v980_v31 = vmul.f32 -1.442695, %v417_v27  ;;  %v996_v32 = vmul.f32 -1.442695, %v481_v28  ;;  %v409_v33 = vadd.f32 %v1413_v24, %v408_v29  ;;  %v473_v34 = vadd.f32 %v1413_v24, %v472_v30 }
  0xf0   : > { %v1119_v35 = vpop.f32.mrf.mxu0  ;;  %v1135_v36 = vpop.f32.mrf.mxu1 }
  0xf1   : > { %1196 = vpow2.f32 %v980_v31  ;;  %v978_v37 = vmul.f32 -1.442695, %v409_v33  ;;  %v994_v38 = vmul.f32 -1.442695, %v473_v34  ;;  %v420_v39 = vadd.f32 %v1119_v35, %v1413_v24 }
  0xf2   : > { %1198 = vpow2.f32 %v996_v32  ;;  %v484_v40 = vadd.f32 %v1135_v36, %v1413_v24  ;;  %v411_v41 = vpop.f32.mrf.mxu0  ;;  %v475_v42 = vpop.f32.mrf.mxu1 }
  0xf3   : > { %1200 = vpow2.f32 %v978_v37  ;;  %v981_v43 = vmul.f32 -1.442695, %v420_v39  ;;  %v412_v44 = vadd.f32 %v1413_v24, %v411_v41  ;;  %v476_v45 = vadd.f32 %v1413_v24, %v475_v42 }
  0xf4   : > { %1202 = vpow2.f32 %v994_v38  ;;  %v997_v46 = vmul.f32 -1.442695, %v484_v40  ;;  %v1122_v47 = vpop.f32.mrf.mxu0  ;;  %v1138_v48 = vpop.f32.mrf.mxu1 }
  0xf5   : > { %1204 = vpow2.f32 %v981_v43  ;;  %v979_v49 = vmul.f32 -1.442695, %v412_v44  ;;  %v995_v50 = vmul.f32 -1.442695, %v476_v45  ;;  %v433_v51 = vadd.f32 %v1122_v47, %v1413_v24 }
  0xf6   : > { %1206 = vpow2.f32 %v997_v46  ;;  %v497_v52 = vadd.f32 %v1138_v48, %v1413_v24  ;;  %v424_v53 = vpop.f32.mrf.mxu0  ;;  %v488_v54 = vpop.f32.mrf.mxu1 }
  0xf7   : > { %1208 = vpow2.f32 %v979_v49  ;;  %v984_v55 = vmul.f32 -1.442695, %v433_v51  ;;  %v425_v56 = vadd.f32 %v1413_v24, %v424_v53  ;;  %v489_v57 = vadd.f32 %v1413_v24, %v488_v54 }
  0xf8   : > { %1210 = vpow2.f32 %v995_v50  ;;  %v1000_v58 = vmul.f32 -1.442695, %v497_v52  ;;  %v1123_v59 = vpop.f32.mrf.mxu0  ;;  %v1139_v60 = vpop.f32.mrf.mxu1 }
  0xf9   : > { %1212 = vpow2.f32 %v984_v55  ;;  %v982_v61 = vmul.f32 -1.442695, %v425_v56  ;;  %v998_v62 = vmul.f32 -1.442695, %v489_v57  ;;  %v436_v63 = vadd.f32 %v1123_v59, %v1413_v24 }
  0xfa   : > { %1214 = vpow2.f32 %v1000_v58  ;;  %v500_v0 = vadd.f32 %v1139_v60, %v1413_v24  ;;  %v427_v1 = vpop.f32.mrf.mxu0  ;;  %v491_v2 = vpop.f32.mrf.mxu1 }
  0xfb   : > { %1216 = vpow2.f32 %v982_v61  ;;  %v985_v3 = vmul.f32 -1.442695, %v436_v63  ;;  %v428_v4 = vadd.f32 %v1413_v24, %v427_v1  ;;  %v492_v5 = vadd.f32 %v1413_v24, %v491_v2 }
  0xfc   : > { %1218 = vpow2.f32 %v998_v62  ;;  %v1001_v6 = vmul.f32 -1.442695, %v500_v0  ;;  %v1126_v7 = vpop.f32.mrf.mxu0  ;;  %v1142_v8 = vpop.f32.mrf.mxu1 }
  0xfd   : > { %1220 = vpow2.f32 %v985_v3  ;;  %v983_v9 = vmul.f32 -1.442695, %v428_v4  ;;  %v999_v10 = vmul.f32 -1.442695, %v492_v5  ;;  %v449_v42 = vadd.f32 %v1126_v7, %v1413_v24 }
  0xfe   : > { %v1197_v11 = vpop.eup %1196  ;;  %1222 = vpow2.f32 %v1001_v6  ;;  %v440_v12 = vpop.f32.mrf.mxu0  ;;  %v513_v46 = vadd.f32 %v1142_v8, %v1413_v24 }
  0xff   : > { %v504_v13 = vpop.f32.mrf.mxu1  ;;  %v1199_v14 = vpop.eup %1198  ;;  %v633_v15 = vadd.f32 1.0, %v1197_v11  ;;  %1224 = vpow2.f32 %v983_v9  ;;  %v441_v49 = vadd.f32 %v1413_v24, %v440_v12  ;;  %v988_v56 = vmul.f32 -1.442695, %v449_v42 }
 0x100   : > { %v1201_v16 = vpop.eup %1200  ;;  %v649_v17 = vadd.f32 1.0, %v1199_v14  ;;  %1226 = vpow2.f32 %v999_v10  ;;  %v1127_v18 = vpop.f32.mrf.mxu0  ;;  %v505_v52 = vadd.f32 %v1413_v24, %v504_v13  ;;  %v1004_v61 = vmul.f32 -1.442695, %v513_v46 }
 0x101   : > { %v1203_v19 = vpop.eup %1202  ;;  %1228 = vrcp.f32 %v633_v15  ;;  %v631_v20 = vadd.f32 1.0, %v1201_v16  ;;  %v1143_v21 = vpop.f32.mrf.mxu1  ;;  %v452_v57 = vadd.f32 %v1127_v18, %v1413_v24  ;;  %v986_v1 = vmul.f32 -1.442695, %v441_v49 }
 0x102   : > { %v1205_v22 = vpop.eup %1204  ;;  %1230 = vrcp.f32 %v649_v17  ;;  %v647_v23 = vadd.f32 1.0, %v1203_v19  ;;  %v443_v29 = vpop.f32.mrf.mxu0  ;;  %v516_v62 = vadd.f32 %v1143_v21, %v1413_v24  ;;  %v1002_v5 = vmul.f32 -1.442695, %v505_v52 }
 0x103   : > { %v1207_v25 = vpop.eup %1206  ;;  %1232 = vrcp.f32 %v631_v20  ;;  %v634_v26 = vadd.f32 1.0, %v1205_v22  ;;  %v507_v32 = vpop.f32.mrf.mxu1  ;;  %v444_v2 = vadd.f32 %v1413_v24, %v443_v29  ;;  %v989_v10 = vmul.f32 -1.442695, %v452_v57 }
 0x104   : > { %v1209_v27 = vpop.eup %1208  ;;  %1234 = vrcp.f32 %v647_v23  ;;  %v650_v28 = vadd.f32 1.0, %v1207_v25  ;;  %v1130_v39 = vpop.f32.mrf.mxu0  ;;  %v508_v6 = vadd.f32 %v1413_v24, %v507_v32  ;;  %v1005_v15 = vmul.f32 -1.442695, %v516_v62 }
 0x105   : > { %v1211_v30 = vpop.eup %1210  ;;  %1236 = vrcp.f32 %v634_v26  ;;  %v632_v31 = vadd.f32 1.0, %v1209_v27  ;;  %v1146_v43 = vpop.f32.mrf.mxu1  ;;  %v465_v11 = vadd.f32 %v1130_v39, %v1413_v24  ;;  %v987_v19 = vmul.f32 -1.442695, %v444_v2 }
 0x106   : > { %v1213_v33 = vpop.eup %1212  ;;  %1238 = vrcp.f32 %v650_v28  ;;  %v648_v34 = vadd.f32 1.0, %v1211_v30  ;;  %v456_v53 = vpop.f32.mrf.mxu0  ;;  %v529_v16 = vadd.f32 %v1146_v43, %v1413_v24  ;;  %v1003_v23 = vmul.f32 -1.442695, %v508_v6 }
 0x107   : > { %v1215_v35 = vpop.eup %1214  ;;  %1240 = vrcp.f32 %v632_v31  ;;  %v637_v36 = vadd.f32 1.0, %v1213_v33  ;;  %v520_v58 = vpop.f32.mrf.mxu1  ;;  %v457_v20 = vadd.f32 %v1413_v24, %v456_v53  ;;  %v992_v29 = vmul.f32 -1.442695, %v465_v11 }
 0x108   : > { %v1217_v37 = vpop.eup %1216  ;;  %1242 = vrcp.f32 %v648_v34  ;;  %v653_v38 = vadd.f32 1.0, %v1215_v35  ;;  %v1131_v7 = vpop.f32.mrf.mxu0  ;;  %v521_v25 = vadd.f32 %v1413_v24, %v520_v58  ;;  %v1008_v34 = vmul.f32 -1.442695, %v529_v16 }
 0x109   : > { %v1219_v40 = vpop.eup %1218  ;;  %1244 = vrcp.f32 %v637_v36  ;;  %v635_v41 = vadd.f32 1.0, %v1217_v37  ;;  %v1147_v12 = vpop.f32.mrf.mxu1  ;;  %v468_v30 = vadd.f32 %v1131_v7, %v1413_v24 }
 0x10a   : > { %v1221_v44 = vpop.eup %1220  ;;  %1246 = vrcp.f32 %v653_v38  ;;  %v651_v45 = vadd.f32 1.0, %v1219_v40  ;;  %v459_v26 = vpop.f32.mrf.mxu0  ;;  %v532_v35 = vadd.f32 %v1147_v12, %v1413_v24  ;;  %v990_v38 = vmul.f32 -1.442695, %v457_v20 }
 0x10b   : > { %v1223_v47 = vpop.eup %1222  ;;  %1248 = vrcp.f32 %v635_v41  ;;  %v638_v48 = vadd.f32 1.0, %v1221_v44  ;;  %v523_v31 = vpop.f32.mrf.mxu1  ;;  %v460_v39 = vadd.f32 %v1413_v24, %v459_v26  ;;  %v1006_v42 = vmul.f32 -1.442695, %v521_v25 }
 0x10c   : > { %v1225_v50 = vpop.eup %1224  ;;  %1250 = vrcp.f32 %v651_v45  ;;  %v654_v51 = vadd.f32 1.0, %v1223_v47  ;;  %v524_v43 = vadd.f32 %v1413_v24, %v523_v31  ;;  %v993_v46 = vmul.f32 -1.442695, %v468_v30 }
 0x10d   : > { %v1227_v54 = vpop.eup %1226  ;;  %1252 = vrcp.f32 %v638_v48  ;;  %v636_v55 = vadd.f32 1.0, %v1225_v50  ;;  %v1009_v49 = vmul.f32 -1.442695, %v532_v35  ;;  %v991_v24 = vmul.f32 -1.442695, %v460_v39 }
 0x10e   : > { %v1229_v59 = vpop.eup %1228  ;;  %1254 = vrcp.f32 %v654_v51  ;;  %v652_v60 = vadd.f32 1.0, %v1227_v54  ;;  %v1007_v54 = vmul.f32 -1.442695, %v524_v43 }
 0x10f   : > { %v1231_v63 = vpop.eup %1230  ;;  %v1046_v0 = vpack.c.bf16 %v1229_v59, %v1229_v59  ;;  %1256 = vrcp.f32 %v636_v55 }
 0x110   : > { %v1233_v3 = vpop.eup %1232  ;;  %v1062_v4 = vpack.c.bf16 %v1231_v63, %v1231_v63  ;;  %1258 = vrcp.f32 %v652_v60 }
 0x111   : > { %v1235_v8 = vpop.eup %1234  ;;  %858 = vst.msk [vmem:[%s1441_s13 + $0x8] sm:$0xf] %vm855_vm0, %v1046_v0  ;;  %v1044_v9 = vpack.c.bf16 %v1233_v3, %v1233_v3  ;;  %1260 = vpow2.f32 %v988_v56 }
 0x112   : > { %v1237_v13 = vpop.eup %1236  ;;  %874 = vst.msk [vmem:[%s1441_s13 + $0x48] sm:$0xf] %vm855_vm0, %v1062_v4  ;;  %v1060_v14 = vpack.c.bf16 %v1235_v8, %v1235_v8  ;;  %1262 = vpow2.f32 %v1004_v61 }
 0x113   : > { %v1239_v17 = vpop.eup %1238  ;;  %856 = vst.msk [vmem:[%s1441_s13] sm:$0xf] %vm855_vm0, %v1044_v9  ;;  %v1047_v18 = vpack.c.bf16 %v1237_v13, %v1237_v13  ;;  %1264 = vpow2.f32 %v986_v1 }
 0x114   : > { %v1241_v21 = vpop.eup %1240  ;;  %872 = vst.msk [vmem:[%s1441_s13 + $0x40] sm:$0xf] %vm855_vm0, %v1060_v14  ;;  %v1063_v22 = vpack.c.bf16 %v1239_v17, %v1239_v17  ;;  %1266 = vpow2.f32 %v1002_v5 }
 0x115   : > { %v1243_v27 = vpop.eup %1242  ;;  %859 = vst.msk [vmem:[%s1441_s13 + $0xc] sm:$0xf] %vm855_vm0, %v1047_v18  ;;  %v1045_v28 = vpack.c.bf16 %v1241_v21, %v1241_v21  ;;  %1268 = vpow2.f32 %v989_v10 }
 0x116   : > { %v1245_v32 = vpop.eup %1244  ;;  %875 = vst.msk [vmem:[%s1441_s13 + $0x4c] sm:$0xf] %vm855_vm0, %v1063_v22  ;;  %v1061_v33 = vpack.c.bf16 %v1243_v27, %v1243_v27  ;;  %1270 = vpow2.f32 %v1005_v15 }
 0x117   : > { %v1247_v36 = vpop.eup %1246  ;;  %857 = vst.msk [vmem:[%s1441_s13 + $0x4] sm:$0xf] %vm855_vm0, %v1045_v28  ;;  %v1050_v37 = vpack.c.bf16 %v1245_v32, %v1245_v32  ;;  %1272 = vpow2.f32 %v987_v19 }
 0x118   : > { %v1249_v40 = vpop.eup %1248  ;;  %873 = vst.msk [vmem:[%s1441_s13 + $0x44] sm:$0xf] %vm855_vm0, %v1061_v33  ;;  %v1066_v41 = vpack.c.bf16 %v1247_v36, %v1247_v36  ;;  %1274 = vpow2.f32 %v1003_v23 }
 0x119   : > { %v1251_v44 = vpop.eup %1250  ;;  %862 = vst.msk [vmem:[%s1441_s13 + $0x18] sm:$0xf] %vm855_vm0, %v1050_v37  ;;  %v1048_v45 = vpack.c.bf16 %v1249_v40, %v1249_v40  ;;  %1276 = vpow2.f32 %v992_v29 }
 0x11a   : > { %v1253_v47 = vpop.eup %1252  ;;  %878 = vst.msk [vmem:[%s1441_s13 + $0x58] sm:$0xf] %vm855_vm0, %v1066_v41  ;;  %v1064_v48 = vpack.c.bf16 %v1251_v44, %v1251_v44  ;;  %1278 = vpow2.f32 %v1008_v34 }
 0x11b   : > { %v1255_v50 = vpop.eup %1254  ;;  %860 = vst.msk [vmem:[%s1441_s13 + $0x10] sm:$0xf] %vm855_vm0, %v1048_v45  ;;  %v1051_v51 = vpack.c.bf16 %v1253_v47, %v1253_v47  ;;  %1280 = vpow2.f32 %v990_v38 }
 0x11c   : > { %v1257_v52 = vpop.eup %1256  ;;  %876 = vst.msk [vmem:[%s1441_s13 + $0x50] sm:$0xf] %vm855_vm0, %v1064_v48  ;;  %v1067_v53 = vpack.c.bf16 %v1255_v50, %v1255_v50  ;;  %1282 = vpow2.f32 %v1006_v42 }
 0x11d   : > { %v1259_v55 = vpop.eup %1258  ;;  %863 = vst.msk [vmem:[%s1441_s13 + $0x1c] sm:$0xf] %vm855_vm0, %v1051_v51  ;;  %v1049_v56 = vpack.c.bf16 %v1257_v52, %v1257_v52  ;;  %1284 = vpow2.f32 %v993_v46 }
 0x11e   : > { %v1261_v57 = vpop.eup %1260  ;;  %879 = vst.msk [vmem:[%s1441_s13 + $0x5c] sm:$0xf] %vm855_vm0, %v1067_v53  ;;  %v1065_v58 = vpack.c.bf16 %v1259_v55, %v1259_v55  ;;  %1286 = vpow2.f32 %v1009_v49 }
 0x11f   : > { %v1263_v59 = vpop.eup %1262  ;;  %861 = vst.msk [vmem:[%s1441_s13 + $0x14] sm:$0xf] %vm855_vm0, %v1049_v56  ;;  %v641_v60 = vadd.f32 1.0, %v1261_v57  ;;  %1288 = vpow2.f32 %v991_v24 }
 0x120   : > { %v1265_v61 = vpop.eup %1264  ;;  %877 = vst.msk [vmem:[%s1441_s13 + $0x54] sm:$0xf] %vm855_vm0, %v1065_v58  ;;  %v657_v62 = vadd.f32 1.0, %v1263_v59  ;;  %1290 = vpow2.f32 %v1007_v54 }
 0x121   : > { %v1267_v63 = vpop.eup %1266  ;;  %1292 = vrcp.f32 %v641_v60  ;;  %v639_v0 = vadd.f32 1.0, %v1265_v61 }
 0x122   : > { %v1269_v1 = vpop.eup %1268  ;;  %1294 = vrcp.f32 %v657_v62  ;;  %v655_v2 = vadd.f32 1.0, %v1267_v63 }
 0x123   : > { %v1271_v3 = vpop.eup %1270  ;;  %1296 = vrcp.f32 %v639_v0  ;;  %v642_v4 = vadd.f32 1.0, %v1269_v1 }
 0x124   : > { %v1273_v5 = vpop.eup %1272  ;;  %1298 = vrcp.f32 %v655_v2  ;;  %v658_v6 = vadd.f32 1.0, %v1271_v3 }
 0x125   : > { %v1275_v7 = vpop.eup %1274  ;;  %1300 = vrcp.f32 %v642_v4  ;;  %v640_v8 = vadd.f32 1.0, %v1273_v5 }
 0x126   : > { %v1277_v9 = vpop.eup %1276  ;;  %1302 = vrcp.f32 %v658_v6  ;;  %v656_v10 = vadd.f32 1.0, %v1275_v7 }
 0x127   : > { %v1279_v11 = vpop.eup %1278  ;;  %1304 = vrcp.f32 %v640_v8  ;;  %v645_v12 = vadd.f32 1.0, %v1277_v9 }
 0x128   : > { %v1281_v13 = vpop.eup %1280  ;;  %1306 = vrcp.f32 %v656_v10  ;;  %v661_v14 = vadd.f32 1.0, %v1279_v11 }
 0x129   : > { %v1283_v15 = vpop.eup %1282  ;;  %1308 = vrcp.f32 %v645_v12  ;;  %v643_v16 = vadd.f32 1.0, %v1281_v13 }
 0x12a   : > { %v1285_v17 = vpop.eup %1284  ;;  %1310 = vrcp.f32 %v661_v14  ;;  %v659_v18 = vadd.f32 1.0, %v1283_v15 }
 0x12b   : > { %v1287_v19 = vpop.eup %1286  ;;  %1312 = vrcp.f32 %v643_v16  ;;  %v646_v20 = vadd.f32 1.0, %v1285_v17 }
 0x12c   : > { %v1289_v21 = vpop.eup %1288  ;;  %1314 = vrcp.f32 %v659_v18  ;;  %v662_v22 = vadd.f32 1.0, %v1287_v19 }
 0x12d   : > { %v1291_v23 = vpop.eup %1290  ;;  %1316 = vrcp.f32 %v646_v20  ;;  %v644_v25 = vadd.f32 1.0, %v1289_v21 }
 0x12e   : > { %v1293_v26 = vpop.eup %1292  ;;  %1318 = vrcp.f32 %v662_v22  ;;  %v660_v27 = vadd.f32 1.0, %v1291_v23 }
 0x12f   : > { %v1295_v28 = vpop.eup %1294  ;;  %v1054_v29 = vpack.c.bf16 %v1293_v26, %v1293_v26  ;;  %1320 = vrcp.f32 %v644_v25 }
 0x130   : > { %v1297_v30 = vpop.eup %1296  ;;  %v1070_v31 = vpack.c.bf16 %v1295_v28, %v1295_v28  ;;  %1322 = vrcp.f32 %v660_v27 }
 0x131   : > { %v1299_v32 = vpop.eup %1298  ;;  %866 = vst.msk [vmem:[%s1441_s13 + $0x28] sm:$0xf] %vm855_vm0, %v1054_v29  ;;  %v1052_v33 = vpack.c.bf16 %v1297_v30, %v1297_v30 }
 0x132   : > { %v1301_v34 = vpop.eup %1300  ;;  %882 = vst.msk [vmem:[%s1441_s13 + $0x68] sm:$0xf] %vm855_vm0, %v1070_v31  ;;  %v1068_v35 = vpack.c.bf16 %v1299_v32, %v1299_v32 }
 0x133   : > { %v1303_v36 = vpop.eup %1302  ;;  %864 = vst.msk [vmem:[%s1441_s13 + $0x20] sm:$0xf] %vm855_vm0, %v1052_v33  ;;  %v1055_v37 = vpack.c.bf16 %v1301_v34, %v1301_v34 }
 0x134   : > { %v1305_v38 = vpop.eup %1304  ;;  %880 = vst.msk [vmem:[%s1441_s13 + $0x60] sm:$0xf] %vm855_vm0, %v1068_v35  ;;  %v1071_v39 = vpack.c.bf16 %v1303_v36, %v1303_v36 }
 0x135   : > { %v1307_v40 = vpop.eup %1306  ;;  %867 = vst.msk [vmem:[%s1441_s13 + $0x2c] sm:$0xf] %vm855_vm0, %v1055_v37  ;;  %v1053_v41 = vpack.c.bf16 %v1305_v38, %v1305_v38 }
 0x136   : > { %v1309_v42 = vpop.eup %1308  ;;  %883 = vst.msk [vmem:[%s1441_s13 + $0x6c] sm:$0xf] %vm855_vm0, %v1071_v39  ;;  %v1069_v43 = vpack.c.bf16 %v1307_v40, %v1307_v40 }
 0x137   : > { %v1311_v44 = vpop.eup %1310  ;;  %865 = vst.msk [vmem:[%s1441_s13 + $0x24] sm:$0xf] %vm855_vm0, %v1053_v41  ;;  %v1058_v45 = vpack.c.bf16 %v1309_v42, %v1309_v42 }
 0x138   : > { %v1313_v46 = vpop.eup %1312  ;;  %881 = vst.msk [vmem:[%s1441_s13 + $0x64] sm:$0xf] %vm855_vm0, %v1069_v43  ;;  %v1074_v47 = vpack.c.bf16 %v1311_v44, %v1311_v44 }
 0x139   : > { %v1315_v48 = vpop.eup %1314  ;;  %870 = vst.msk [vmem:[%s1441_s13 + $0x38] sm:$0xf] %vm855_vm0, %v1058_v45  ;;  %v1056_v49 = vpack.c.bf16 %v1313_v46, %v1313_v46 }
 0x13a   : > { %v1317_v50 = vpop.eup %1316  ;;  %886 = vst.msk [vmem:[%s1441_s13 + $0x78] sm:$0xf] %vm855_vm0, %v1074_v47  ;;  %v1072_v51 = vpack.c.bf16 %v1315_v48, %v1315_v48 }
 0x13b   : > { %v1319_v24 = vpop.eup %1318  ;;  %868 = vst.msk [vmem:[%s1441_s13 + $0x30] sm:$0xf] %vm855_vm0, %v1056_v49  ;;  %v1059_v52 = vpack.c.bf16 %v1317_v50, %v1317_v50 }
 0x13c   : > { %v1321_v53 = vpop.eup %1320  ;;  %884 = vst.msk [vmem:[%s1441_s13 + $0x70] sm:$0xf] %vm855_vm0, %v1072_v51  ;;  %v1075_v54 = vpack.c.bf16 %v1319_v24, %v1319_v24 }
 0x13d   : > { %v1323_v55 = vpop.eup %1322  ;;  %871 = vst.msk [vmem:[%s1441_s13 + $0x3c] sm:$0xf] %vm855_vm0, %v1059_v52  ;;  %v1057_v56 = vpack.c.bf16 %v1321_v53, %v1321_v53 }
 0x13e   : > { %887 = vst.msk [vmem:[%s1441_s13 + $0x7c] sm:$0xf] %vm855_vm0, %v1075_v54  ;;  %v1073_v57 = vpack.c.bf16 %v1323_v55, %v1323_v55 }
 0x13f   : > { %869 = vst.msk [vmem:[%s1441_s13 + $0x34] sm:$0xf] %vm855_vm0, %v1057_v56 }
 0x140   : > { %885 = vst.msk [vmem:[%s1441_s13 + $0x74] sm:$0xf] %vm855_vm0, %v1073_v57 }
 0x141 PF: > { %s13_s12 = sadd.s32 1, %s1330_s12  }
 0x142   : > { %p10_p4 = scmp.ge.s32.totalorder %s13_s12, 4  }
 0x144   :  { %12 = sbr.rel (!%p10_p4) target bundleno = 1 (0x1), region = 62 }

// kernel: forward.15
= control target key start
LH: loop header
LB: loop body
LE: loop exit
PB: predicated region body
PF: predicated region fallthrough
CT: control target
= control target key end

     0   :  { %s1034_s14 = smov 0   ;;  %s1163_s0 = inlined_call_operand.vmem [shape: bf16[1568,25], index: 0, kind: input, shape index: {}]   ;;  %s1164_s1 = inlined_call_operand.vmem [shape: bf16[25,1], index: 1, kind: input, shape index: {}]   ;;  %s1165_s2 = inlined_call_operand.<no memory space> [shape: f32[1,1], index: 2, kind: input, shape index: {}]   ;;  %s1166_s3 = inlined_call_operand.vmem [shape: f32[1568,1], index: 3, kind: output, shape index: {}]  }
   0x1   :  { %v8_v0 = vstv %s1165_s2 }
   0x2   :  { %9 = vst [vmem:[#allocation2] sm:$0x1] %v8_v0 }
   0x3 LB: > { %s745_s15 = sadd.s32 4294967295, %s1008_s14   ;;  %p749_p0 = scmp.ge.s32.totalorder %s1008_s14, 1  ;;  %s1008_s14 = sphi %s1034_s14, %s15_s14  }
   0x4   : > { %p140_p1 = scmp.lt.s32.totalorder %s1008_s14, 8 }
   0x6   : > { %p141_p2 = pnand %p749_p0, %p140_p1 }
   0x7   : > { %s164_s2 = smul.u32 (!%p141_p2), 28, %s745_s15 }
   0x8   : > { %144 = sbr.rel (%p141_p2) target bundleno = 297 (0x129), region = 32 }
   0x9   : > { %p165_p3 = scmp.lt.s32.totalorder (!%p141_p2), %s164_s2, 195 }
   0xd   : > { %v874_v1 = vld [vmem:[%s1164_s1 + $0x8] sm:$0x1f]   ;;  %vm340_vm0 = vcmask 1043456   ;;  %vm341_vm1 = vcmask 1044480   ;;  %v1010_v2 = vmov 65535   ;;  %v875_v6 = vld [vmem:[%s1164_s1] sm:$0xff]  }
   0xe   : > { %v342_v3 = vsel %vm340_vm0, 4294967295, %v1010_v2  ;;  %s1168_s2 = smov (!%p165_p3, %s164_s2), 195  ;;  %vm297_vm2 = vcmask 203776   ;;  %v1068_v21 = vld [vmem:[#allocation2] ss:$0 sm:$0xff]  ;;  %vm660_vm3 = vcmask 7168  }
   0xf   : > { %v343_v4 = vsel %vm341_vm1, %v342_v3, 0  ;;  %s750_s20 = sshll.u32 %s1168_s2, 2  ;;  %s751_s24 = sshll.u32 %s1168_s2, 3 }
  0x10   : > { %v345_v5 = vand.u32 %v874_v1, %v343_v4  ;;  %s168_s23 = scalar_lea.vmem %s1163_s0, %s750_s20  ;;  %s1093_s27 = scalar_lea.vmem %s1166_s3, %s751_s24 }
  0x11   : > { %v876_v7 = vld [vmem:[%s168_s23] sm:$0xff]   ;;  %v877_v8 = vld [vmem:[%s168_s23 + $0x8] sm:$0xff]   ;;  %v880_v11 = vld [vmem:[%s168_s23 + $0x10] sm:$0xff]  }
  0x12   : > { %829 = vmatprep.subr.bf16.mxu0 %v345_v5  ;;  %861 = vmatprep.subr.bf16.mxu1 %v345_v5  ;;  %v878_v9 = vld [vmem:[%s168_s23 + $0x40] sm:$0xff]   ;;  %v879_v10 = vld [vmem:[%s168_s23 + $0x48] sm:$0xff]   ;;  %v882_v12 = vld [vmem:[%s168_s23 + $0x50] sm:$0xff]  }
  0x13   : > { %830 = vmatpush3.bf16.msra.mxu0 %v345_v5  ;;  %863 = vmatpush3.bf16.msra.mxu1 %v345_v5  ;;  %v881_v13 = vld [vmem:[%s168_s23 + $0x18] sm:$0xff]   ;;  %v884_v15 = vld [vmem:[%s168_s23 + $0x20] sm:$0xff]   ;;  %v885_v17 = vld [vmem:[%s168_s23 + $0x28] sm:$0xff]  }
  0x14   : > { %831 = vmatprep.subr.bf16.mxu0 %v875_v6  ;;  %862 = vmatprep.subr.bf16.mxu1 %v875_v6  ;;  %v883_v14 = vld [vmem:[%s168_s23 + $0x58] sm:$0xff]   ;;  %v886_v16 = vld [vmem:[%s168_s23 + $0x60] sm:$0xff]   ;;  %v887_v18 = vld [vmem:[%s168_s23 + $0x68] sm:$0xff]  }
  0x15   : > { %833 = vmatprep.mubr.msk.bf16.mxu0 %vm297_vm2, %v876_v7  ;;  %849 = vmatprep.mubr.msk.bf16.mxu1 %vm297_vm2, %v878_v9  ;;  %v888_v19 = vld [vmem:[%s168_s23 + $0x30] sm:$0xff]   ;;  %v889_v20 = vld [vmem:[%s168_s23 + $0x38] sm:$0xff]  }
  0x17   : > { %832 = vmatpush3.bf16.msra.mxu0 %v875_v6  ;;  %864 = vmatpush3.bf16.msra.mxu1 %v875_v6 }
  0x1a   : > { %834 = vmatmul.mubr.msk.bf16.vlgmr.msra.gmra.mxu0 %vm297_vm2, %v877_v8  ;;  %850 = vmatmul.mubr.msk.bf16.vlgmr.msra.gmra.mxu1 %vm297_vm2, %v879_v10 }
  0x1b   : > { %837 = vmatprep.mubr.msk.bf16.mxu0 %vm297_vm2, %v880_v11  ;;  %853 = vmatprep.mubr.msk.bf16.mxu1 %vm297_vm2, %v882_v12 }
  0x22   : > { %838 = vmatmul.mubr.msk.bf16.gmra.mxu0 %vm297_vm2, %v881_v13  ;;  %854 = vmatmul.mubr.msk.bf16.gmra.mxu1 %vm297_vm2, %v883_v14 }
  0x23   : > { %841 = vmatprep.mubr.msk.bf16.mxu0 %vm297_vm2, %v884_v15  ;;  %857 = vmatprep.mubr.msk.bf16.mxu1 %vm297_vm2, %v886_v16 }
  0x2a   : > { %842 = vmatmul.mubr.msk.bf16.gmra.mxu0 %vm297_vm2, %v885_v17  ;;  %858 = vmatmul.mubr.msk.bf16.gmra.mxu1 %vm297_vm2, %v887_v18 }
  0x2b   : > { %845 = vmatprep.mubr.msk.bf16.mxu0 %vm297_vm2, %v888_v19 }
  0x32   : > { %846 = vmatmul.mubr.msk.bf16.gmra.mxu0 %vm297_vm2, %v889_v20 }
  0xda   : > { %v835_v22 = vpop.f32.mrf.mxu0  ;;  %v851_v24 = vpop.f32.mrf.mxu1 }
  0xdb   : > { %v390_v23 = vadd.f32 %v835_v22, %v1068_v21  ;;  %v454_v26 = vadd.f32 %v851_v24, %v1068_v21 }
  0xdc   : > { %v381_v25 = vpop.f32.mrf.mxu0  ;;  %v445_v29 = vpop.f32.mrf.mxu1 }
  0xdd   : > { %v785_v27 = vmul.f32 -1.442695, %v390_v23  ;;  %v382_v28 = vadd.f32 %v1068_v21, %v381_v25  ;;  %v801_v30 = vmul.f32 -1.442695, %v454_v26  ;;  %v446_v32 = vadd.f32 %v1068_v21, %v445_v29 }
  0xde   : > { %v836_v31 = vpop.f32.mrf.mxu0  ;;  %v852_v35 = vpop.f32.mrf.mxu1 }
  0xdf   : > { %890 = vpow2.f32 %v785_v27  ;;  %v783_v33 = vmul.f32 -1.442695, %v382_v28  ;;  %v393_v34 = vadd.f32 %v836_v31, %v1068_v21  ;;  %v799_v36 = vmul.f32 -1.442695, %v446_v32 }
  0xe0   : > { %892 = vpow2.f32 %v801_v30  ;;  %v384_v37 = vpop.f32.mrf.mxu0  ;;  %v457_v38 = vadd.f32 %v852_v35, %v1068_v21  ;;  %v448_v41 = vpop.f32.mrf.mxu1 }
  0xe1   : > { %894 = vpow2.f32 %v783_v33  ;;  %v786_v39 = vmul.f32 -1.442695, %v393_v34  ;;  %v385_v40 = vadd.f32 %v1068_v21, %v384_v37  ;;  %v449_v44 = vadd.f32 %v1068_v21, %v448_v41 }
  0xe2   : > { %896 = vpow2.f32 %v799_v36  ;;  %v802_v42 = vmul.f32 -1.442695, %v457_v38  ;;  %v839_v43 = vpop.f32.mrf.mxu0  ;;  %v855_v47 = vpop.f32.mrf.mxu1 }
  0xe3   : > { %898 = vpow2.f32 %v786_v39  ;;  %v784_v45 = vmul.f32 -1.442695, %v385_v40  ;;  %v406_v46 = vadd.f32 %v839_v43, %v1068_v21  ;;  %v800_v48 = vmul.f32 -1.442695, %v449_v44 }
  0xe4   : > { %900 = vpow2.f32 %v802_v42  ;;  %v397_v49 = vpop.f32.mrf.mxu0  ;;  %v470_v50 = vadd.f32 %v855_v47, %v1068_v21  ;;  %v461_v53 = vpop.f32.mrf.mxu1 }
  0xe5   : > { %902 = vpow2.f32 %v784_v45  ;;  %v789_v51 = vmul.f32 -1.442695, %v406_v46  ;;  %v398_v52 = vadd.f32 %v1068_v21, %v397_v49  ;;  %v462_v56 = vadd.f32 %v1068_v21, %v461_v53 }
  0xe6   : > { %904 = vpow2.f32 %v800_v48  ;;  %v805_v54 = vmul.f32 -1.442695, %v470_v50  ;;  %v840_v55 = vpop.f32.mrf.mxu0  ;;  %v856_v59 = vpop.f32.mrf.mxu1 }
  0xe7   : > { %906 = vpow2.f32 %v789_v51  ;;  %v787_v57 = vmul.f32 -1.442695, %v398_v52  ;;  %v409_v58 = vadd.f32 %v840_v55, %v1068_v21  ;;  %v803_v60 = vmul.f32 -1.442695, %v462_v56 }
  0xe8   : > { %908 = vpow2.f32 %v805_v54  ;;  %v400_v61 = vpop.f32.mrf.mxu0  ;;  %v473_v62 = vadd.f32 %v856_v59, %v1068_v21  ;;  %v464_v1 = vpop.f32.mrf.mxu1 }
  0xe9   : > { %910 = vpow2.f32 %v787_v57  ;;  %v790_v63 = vmul.f32 -1.442695, %v409_v58  ;;  %v401_v0 = vadd.f32 %v1068_v21, %v400_v61  ;;  %v465_v4 = vadd.f32 %v1068_v21, %v464_v1 }
  0xea   : > { %912 = vpow2.f32 %v803_v60  ;;  %v806_v2 = vmul.f32 -1.442695, %v473_v62  ;;  %v843_v3 = vpop.f32.mrf.mxu0  ;;  %v859_v18 = vpop.f32.mrf.mxu1 }
  0xeb   : > { %914 = vpow2.f32 %v790_v63  ;;  %v788_v5 = vmul.f32 -1.442695, %v401_v0  ;;  %v804_v7 = vmul.f32 -1.442695, %v465_v4  ;;  %v422_v35 = vadd.f32 %v843_v3, %v1068_v21 }
  0xec   : > { %v891_v6 = vpop.eup %890  ;;  %916 = vpow2.f32 %v806_v2  ;;  %v413_v8 = vpop.f32.mrf.mxu0  ;;  %v486_v45 = vadd.f32 %v859_v18, %v1068_v21 }
  0xed   : > { %v893_v9 = vpop.eup %892  ;;  %v578_v10 = vadd.f32 1.0, %v891_v6  ;;  %918 = vpow2.f32 %v788_v5  ;;  %v477_v30 = vpop.f32.mrf.mxu1  ;;  %v414_v41 = vadd.f32 %v1068_v21, %v413_v8  ;;  %v793_v48 = vmul.f32 -1.442695, %v422_v35 }
  0xee   : > { %v895_v11 = vpop.eup %894  ;;  %v594_v12 = vadd.f32 1.0, %v893_v9  ;;  %920 = vpow2.f32 %v804_v7  ;;  %v844_v13 = vpop.f32.mrf.mxu0  ;;  %v478_v52 = vadd.f32 %v1068_v21, %v477_v30  ;;  %v809_v60 = vmul.f32 -1.442695, %v486_v45 }
  0xef   : > { %v897_v14 = vpop.eup %896  ;;  %922 = vrcp.f32 %v578_v10  ;;  %v576_v15 = vadd.f32 1.0, %v895_v11  ;;  %v860_v42 = vpop.f32.mrf.mxu1  ;;  %v425_v49 = vadd.f32 %v844_v13, %v1068_v21  ;;  %v791_v56 = vmul.f32 -1.442695, %v414_v41 }
  0xf0   : > { %v899_v16 = vpop.eup %898  ;;  %924 = vrcp.f32 %v594_v12  ;;  %v592_v17 = vadd.f32 1.0, %v897_v14  ;;  %v416_v19 = vpop.f32.mrf.mxu0  ;;  %v489_v61 = vadd.f32 %v860_v42, %v1068_v21  ;;  %v807_v2 = vmul.f32 -1.442695, %v478_v52 }
  0xf1   : > { %v901_v20 = vpop.eup %900  ;;  %926 = vrcp.f32 %v576_v15  ;;  %v579_v22 = vadd.f32 1.0, %v899_v16  ;;  %v417_v57 = vadd.f32 %v1068_v21, %v416_v19  ;;  %v480_v58 = vpop.f32.mrf.mxu1  ;;  %v794_v63 = vmul.f32 -1.442695, %v425_v49 }
  0xf2   : > { %v903_v23 = vpop.eup %902  ;;  %928 = vrcp.f32 %v592_v17  ;;  %v595_v24 = vadd.f32 1.0, %v901_v20  ;;  %v847_v27 = vpop.f32.mrf.mxu0  ;;  %v481_v3 = vadd.f32 %v1068_v21, %v480_v58  ;;  %v810_v9 = vmul.f32 -1.442695, %v489_v61 }
  0xf3   : > { %v905_v25 = vpop.eup %904  ;;  %930 = vrcp.f32 %v579_v22  ;;  %v577_v26 = vadd.f32 1.0, %v903_v23  ;;  %v438_v0 = vadd.f32 %v847_v27, %v1068_v21  ;;  %v792_v6 = vmul.f32 -1.442695, %v417_v57 }
  0xf4   : > { %v907_v28 = vpop.eup %906  ;;  %932 = vrcp.f32 %v595_v24  ;;  %v593_v29 = vadd.f32 1.0, %v905_v25  ;;  %v429_v38 = vpop.f32.mrf.mxu0  ;;  %v808_v15 = vmul.f32 -1.442695, %v481_v3 }
  0xf5   : > { %v909_v31 = vpop.eup %908  ;;  %934 = vrcp.f32 %v577_v26  ;;  %v582_v32 = vadd.f32 1.0, %v907_v28  ;;  %v430_v7 = vadd.f32 %v1068_v21, %v429_v38  ;;  %v797_v12 = vmul.f32 -1.442695, %v438_v0 }
  0xf6   : > { %v911_v33 = vpop.eup %910  ;;  %936 = vrcp.f32 %v593_v29  ;;  %v598_v34 = vadd.f32 1.0, %v909_v31  ;;  %v848_v53 = vpop.f32.mrf.mxu0 }
  0xf7   : > { %v913_v36 = vpop.eup %912  ;;  %938 = vrcp.f32 %v582_v32  ;;  %v580_v37 = vadd.f32 1.0, %v911_v33  ;;  %v441_v10 = vadd.f32 %v848_v53, %v1068_v21  ;;  %v795_v17 = vmul.f32 -1.442695, %v430_v7 }
  0xf8   : > { %v915_v39 = vpop.eup %914  ;;  %940 = vrcp.f32 %v598_v34  ;;  %v596_v40 = vadd.f32 1.0, %v913_v36  ;;  %v432_v4 = vpop.f32.mrf.mxu0 }
  0xf9   : > { %v917_v43 = vpop.eup %916  ;;  %942 = vrcp.f32 %v580_v37  ;;  %v583_v44 = vadd.f32 1.0, %v915_v39  ;;  %v433_v13 = vadd.f32 %v1068_v21, %v432_v4  ;;  %v798_v19 = vmul.f32 -1.442695, %v441_v10 }
  0xfa   : > { %v919_v46 = vpop.eup %918  ;;  %944 = vrcp.f32 %v596_v40  ;;  %v599_v47 = vadd.f32 1.0, %v917_v43 }
  0xfb   : > { %v921_v50 = vpop.eup %920  ;;  %946 = vrcp.f32 %v583_v44  ;;  %v581_v51 = vadd.f32 1.0, %v919_v46  ;;  %v796_v20 = vmul.f32 -1.442695, %v433_v13 }
  0xfc   : > { %v923_v54 = vpop.eup %922  ;;  %948 = vrcp.f32 %v599_v47  ;;  %v597_v55 = vadd.f32 1.0, %v921_v50 }
  0xfd   : > { %v925_v59 = vpop.eup %924  ;;  %663 = vst.msk [vmem:[%s1093_s27 + $0x10] sm:$0xff] %vm660_vm3, %v923_v54  ;;  %950 = vrcp.f32 %v581_v51 }
  0xfe   : > { %v927_v62 = vpop.eup %926  ;;  %679 = vst.msk [vmem:[%s1093_s27 + $0x90] sm:$0xff] %vm660_vm3, %v925_v59  ;;  %952 = vpow2.f32 %v793_v48 }
  0xff   : > { %v929_v1 = vpop.eup %928  ;;  %661 = vst.msk [vmem:[%s1093_s27] sm:$0xff] %vm660_vm3, %v927_v62  ;;  %954 = vrcp.f32 %v597_v55 }
 0x100   : > { %v931_v5 = vpop.eup %930  ;;  %677 = vst.msk [vmem:[%s1093_s27 + $0x80] sm:$0xff] %vm660_vm3, %v929_v1  ;;  %956 = vpow2.f32 %v791_v56 }
 0x101   : > { %v933_v8 = vpop.eup %932  ;;  %664 = vst.msk [vmem:[%s1093_s27 + $0x18] sm:$0xff] %vm660_vm3, %v931_v5  ;;  %958 = vpow2.f32 %v809_v60 }
 0x102   : > { %v935_v11 = vpop.eup %934  ;;  %680 = vst.msk [vmem:[%s1093_s27 + $0x98] sm:$0xff] %vm660_vm3, %v933_v8  ;;  %960 = vpow2.f32 %v794_v63 }
 0x103   : > { %v937_v14 = vpop.eup %936  ;;  %662 = vst.msk [vmem:[%s1093_s27 + $0x8] sm:$0xff] %vm660_vm3, %v935_v11  ;;  %962 = vpow2.f32 %v807_v2 }
 0x104   : > { %v939_v16 = vpop.eup %938  ;;  %678 = vst.msk [vmem:[%s1093_s27 + $0x88] sm:$0xff] %vm660_vm3, %v937_v14  ;;  %964 = vpow2.f32 %v792_v6 }
 0x105   : > { %v941_v18 = vpop.eup %940  ;;  %667 = vst.msk [vmem:[%s1093_s27 + $0x30] sm:$0xff] %vm660_vm3, %v939_v16  ;;  %966 = vpow2.f32 %v810_v9 }
 0x106   : > { %v943_v21 = vpop.eup %942  ;;  %683 = vst.msk [vmem:[%s1093_s27 + $0xb0] sm:$0xff] %vm660_vm3, %v941_v18  ;;  %968 = vpow2.f32 %v797_v12 }
 0x107   : > { %v945_v22 = vpop.eup %944  ;;  %665 = vst.msk [vmem:[%s1093_s27 + $0x20] sm:$0xff] %vm660_vm3, %v943_v21  ;;  %970 = vpow2.f32 %v808_v15 }
 0x108   : > { %v947_v23 = vpop.eup %946  ;;  %681 = vst.msk [vmem:[%s1093_s27 + $0xa0] sm:$0xff] %vm660_vm3, %v945_v22  ;;  %972 = vpow2.f32 %v795_v17 }
 0x109   : > { %v949_v24 = vpop.eup %948  ;;  %668 = vst.msk [vmem:[%s1093_s27 + $0x38] sm:$0xff] %vm660_vm3, %v947_v23  ;;  %974 = vpow2.f32 %v798_v19 }
 0x10a   : > { %v951_v25 = vpop.eup %950  ;;  %684 = vst.msk [vmem:[%s1093_s27 + $0xb8] sm:$0xff] %vm660_vm3, %v949_v24  ;;  %976 = vpow2.f32 %v796_v20 }
 0x10b   : > { %v953_v26 = vpop.eup %952  ;;  %666 = vst.msk [vmem:[%s1093_s27 + $0x28] sm:$0xff] %vm660_vm3, %v951_v25 }
 0x10c   : > { %v955_v27 = vpop.eup %954  ;;  %v586_v28 = vadd.f32 1.0, %v953_v26 }
 0x10d   : > { %v957_v29 = vpop.eup %956  ;;  %682 = vst.msk [vmem:[%s1093_s27 + $0xa8] sm:$0xff] %vm660_vm3, %v955_v27 }
 0x10e   : > { %v959_v30 = vpop.eup %958  ;;  %978 = vrcp.f32 %v586_v28  ;;  %v584_v31 = vadd.f32 1.0, %v957_v29 }
 0x10f   : > { %v961_v32 = vpop.eup %960  ;;  %v602_v33 = vadd.f32 1.0, %v959_v30 }
 0x110   : > { %v963_v34 = vpop.eup %962  ;;  %980 = vrcp.f32 %v584_v31  ;;  %v587_v35 = vadd.f32 1.0, %v961_v32 }
 0x111   : > { %v965_v36 = vpop.eup %964  ;;  %982 = vrcp.f32 %v602_v33  ;;  %v600_v37 = vadd.f32 1.0, %v963_v34 }
 0x112   : > { %v967_v38 = vpop.eup %966  ;;  %984 = vrcp.f32 %v587_v35  ;;  %v585_v39 = vadd.f32 1.0, %v965_v36 }
 0x113   : > { %v969_v40 = vpop.eup %968  ;;  %986 = vrcp.f32 %v600_v37  ;;  %v603_v41 = vadd.f32 1.0, %v967_v38 }
 0x114   : > { %v971_v42 = vpop.eup %970  ;;  %988 = vrcp.f32 %v585_v39  ;;  %v590_v43 = vadd.f32 1.0, %v969_v40 }
 0x115   : > { %v973_v44 = vpop.eup %972  ;;  %990 = vrcp.f32 %v603_v41  ;;  %v601_v45 = vadd.f32 1.0, %v971_v42 }
 0x116   : > { %v975_v46 = vpop.eup %974  ;;  %992 = vrcp.f32 %v590_v43  ;;  %v588_v47 = vadd.f32 1.0, %v973_v44 }
 0x117   : > { %v977_v48 = vpop.eup %976  ;;  %994 = vrcp.f32 %v601_v45  ;;  %v591_v49 = vadd.f32 1.0, %v975_v46 }
 0x118   : > { %996 = vrcp.f32 %v588_v47  ;;  %v589_v50 = vadd.f32 1.0, %v977_v48 }
 0x119   : > { %998 = vrcp.f32 %v591_v49 }
 0x11a   : > { %1000 = vrcp.f32 %v589_v50 }
 0x11b   : > { %v979_v51 = vpop.eup %978 }
 0x11c   : > { %671 = vst.msk [vmem:[%s1093_s27 + $0x50] sm:$0xff] %vm660_vm3, %v979_v51 }
 0x11d   : > { %v981_v52 = vpop.eup %980 }
 0x11e   : > { %v983_v53 = vpop.eup %982  ;;  %669 = vst.msk [vmem:[%s1093_s27 + $0x40] sm:$0xff] %vm660_vm3, %v981_v52 }
 0x11f   : > { %v985_v54 = vpop.eup %984  ;;  %687 = vst.msk [vmem:[%s1093_s27 + $0xd0] sm:$0xff] %vm660_vm3, %v983_v53 }
 0x120   : > { %v987_v55 = vpop.eup %986  ;;  %672 = vst.msk [vmem:[%s1093_s27 + $0x58] sm:$0xff] %vm660_vm3, %v985_v54 }
 0x121   : > { %v989_v56 = vpop.eup %988  ;;  %685 = vst.msk [vmem:[%s1093_s27 + $0xc0] sm:$0xff] %vm660_vm3, %v987_v55 }
 0x122   : > { %v991_v57 = vpop.eup %990  ;;  %670 = vst.msk [vmem:[%s1093_s27 + $0x48] sm:$0xff] %vm660_vm3, %v989_v56 }
 0x123   : > { %v993_v58 = vpop.eup %992  ;;  %688 = vst.msk [vmem:[%s1093_s27 + $0xd8] sm:$0xff] %vm660_vm3, %v991_v57 }
 0x124   : > { %v995_v59 = vpop.eup %994  ;;  %675 = vst.msk [vmem:[%s1093_s27 + $0x70] sm:$0xff] %vm660_vm3, %v993_v58 }
 0x125   : > { %v997_v60 = vpop.eup %996  ;;  %686 = vst.msk [vmem:[%s1093_s27 + $0xc8] sm:$0xff] %vm660_vm3, %v995_v59 }
 0x126   : > { %v999_v61 = vpop.eup %998  ;;  %673 = vst.msk [vmem:[%s1093_s27 + $0x60] sm:$0xff] %vm660_vm3, %v997_v60 }
 0x127   : > { %v1001_v62 = vpop.eup %1000  ;;  %676 = vst.msk [vmem:[%s1093_s27 + $0x78] sm:$0xff] %vm660_vm3, %v999_v61 }
 0x128   : > { %674 = vst.msk [vmem:[%s1093_s27 + $0x68] sm:$0xff] %vm660_vm3, %v1001_v62 }
 0x129 PF: > { %s15_s14 = sadd.s32 1, %s1008_s14  }
 0x12a   : > { %p12_p4 = scmp.ge.s32.totalorder %s15_s14, 9  }
 0x12c   :  { %14 = sbr.rel (!%p12_p4) target bundleno = 3 (0x3), region = 62 }

</bundles_post_ra>
